<compile_context>
chip_gen: v6e
topology: v6e:2x2x1
jax: 0.10.0
libtpu: 0.0.40
codegen_flags: <defaults>
</compile_context>

<pallas_src>
import jax
import jax.numpy as jnp
import numpy as np
from jax.experimental import pallas as pl
from jax.experimental.pallas import tpu as pltpu


def _clp_kernel(xr_ref, xi_ref,          # (C*F, bt)   input real / imag, f32
                w1a_ref, w1b_ref,        # (2*P*G, C*F) block-real fused beam+proj, bf16
                w2t_ref,                 # (2*F, 2*P*G) block-real affine, bf16
                out_ref):                # (2*F, bt)    [zr ; zi] columns, f32
    # Cast activations to bf16 at the MXU boundary; accumulate in f32.
    xr = xr_ref[...].astype(jnp.bfloat16)
    xi = xi_ref[...].astype(jnp.bfloat16)

    # Fused beamformer + complex projection (block-real, transposed layout):
    #   Y = [[yr],[yi]] = W1a @ Xr + W1b @ Xi,   shape (2*P*G, bt)
    y = (jnp.dot(w1a_ref[...], xr, preferred_element_type=jnp.float32)
         + jnp.dot(w1b_ref[...], xi, preferred_element_type=jnp.float32))
    y = y.astype(jnp.bfloat16)

    # Complex affine (P*G -> F), block-real:  Z = [[zr],[zi]] = W2T @ Y
    out_ref[...] = jnp.dot(w2t_ref[...], y, preferred_element_type=jnp.float32)


def prepare_params(bwr, bwi, pwr, pwi, awr, awi):
    """One-time parameter preparation (do at parameter-load time).

    Args (PyTorch layouts):
      bwr, bwi : (P, C, F)    FixedBeamformer weights
      pwr, pwi : (G, F)       proj.{real,imag}.weight   (nn.Linear: out x in)
      awr, awi : (F, P*G)     affine.{real,imag}.weight (out x in)
    Returns bf16 block-real weights for the column (time-on-lanes) layout:
      w1a, w1b : (2*P*G, C*F)  so that  [[yr],[yi]] = w1a @ xr + w1b @ xi
      w2t      : (2*F, 2*P*G)  so that  [[zr],[zi]] = w2t @ [[yr],[yi]]
    """
    P, C, F = bwr.shape
    G = pwr.shape[0]

    # Fused beam+proj complex weight: conj(w_beam)[p,c,f] * w_proj[g,f]
    #   conj(w_beam) = bwr - i*bwi ;  w_proj = pwr + i*pwi
    fwr = (jnp.einsum('pcf,gf->cfpg', bwr, pwr)
           + jnp.einsum('pcf,gf->cfpg', bwi, pwi)).reshape(C * F, P * G)
    fwi = (jnp.einsum('pcf,gf->cfpg', bwr, pwi)
           - jnp.einsum('pcf,gf->cfpg', bwi, pwr)).reshape(C * F, P * G)

    # Block-real, transposed for (weights @ x_columns):
    #   W1^T = [[fwr^T, -fwi^T], [fwi^T, fwr^T]] split into its two column blocks.
    w1a = jnp.concatenate([fwr.T, fwi.T], axis=0).astype(jnp.bfloat16)     # (2PG, CF)
    w1b = jnp.concatenate([-fwi.T, fwr.T], axis=0).astype(jnp.bfloat16)    # (2PG, CF)

    # Affine block-real (transposed):  W2^T = [[awr, -awi], [awi, awr]]
    w2t = jnp.concatenate(
        [jnp.concatenate([awr, -awi], axis=1),
         jnp.concatenate([awi, awr], axis=1)], axis=0).astype(jnp.bfloat16)  # (2F, 2PG)
    return w1a, w1b, w2t


def clp_fs_beamformer(xr, xi, params, *, block_t=256):
    """Forward pass.

    Args:
      xr, xi : (N, C, F, T)  complex STFT input (real / imag), float32
      params : output of prepare_params
    Returns:
      zr, zi : (N, T, F)     complex output of the affine ComplexLinear
    """
    w1a, w1b, w2t = params
    N, C, F, T = xr.shape
    CF = C * F
    PG2 = w1a.shape[0]           # 2 * P * G
    F2 = w2t.shape[0]            # 2 * F_out
    Fout = F2 // 2

    # Free reshapes (no HBM pass): kernel reads the native (N, C*F, T) layout.
    xr_k = xr.reshape(N, CF, T)
    xi_k = xi.reshape(N, CF, T)

    # Time-tile: the full T when it is small, otherwise a multiple of 128 so
    # loads / stores are lane-dense.  Ragged final tiles are safe: time
    # columns are independent and out-of-bounds output columns are masked.
    if T <= block_t:
        bt = T
    else:
        bt = max(128, (block_t // 128) * 128)
    nt = pl.cdiv(T, bt)

    x_spec = pl.BlockSpec((None, CF, bt), lambda n, t: (n, 0, t))
    w1_spec = pl.BlockSpec((PG2, CF), lambda n, t: (0, 0))
    w2_spec = pl.BlockSpec((F2, PG2), lambda n, t: (0, 0))
    out_spec = pl.BlockSpec((None, F2, bt), lambda n, t: (n, 0, t))

    z = pl.pallas_call(
        _clp_kernel,
        out_shape=jax.ShapeDtypeStruct((N, F2, T), jnp.float32),
        grid=(N, nt),
        in_specs=[x_spec, x_spec, w1_spec, w1_spec, w2_spec],
        out_specs=out_spec,
        compiler_params=pltpu.CompilerParams(
            dimension_semantics=("parallel", "parallel")),
    )(xr_k, xi_k, w1a, w1b, w2t)

    # The output is C-times smaller than the input, so this transpose is cheap.
    # TODO(synk): if downstream accepts (N, F, T) features, return z slices
    # directly and skip this transpose entirely.
    zr = jnp.transpose(z[:, :Fout, :], (0, 2, 1))
    zi = jnp.transpose(z[:, Fout:, :], (0, 2, 1))
    return zr, zi


def _reference_numpy(xr, xi, bwr, bwi, pwr, pwi, awr, awi):
    """float64 numpy reference mirroring the PyTorch forward."""
    xr = np.asarray(xr, np.float64); xi = np.asarray(xi, np.float64)
    bwr = np.asarray(bwr, np.float64); bwi = np.asarray(bwi, np.float64)
    pwr = np.asarray(pwr, np.float64); pwi = np.asarray(pwi, np.float64)
    awr = np.asarray(awr, np.float64); awi = np.asarray(awi, np.float64)
    N, C, F, T = xr.shape
    P = bwr.shape[0]; G = pwr.shape[0]
    # beamformer (N,P,F,T) then trans -> (N,P,T,F)
    br = np.einsum('ncft,pcf->npft', xr, bwr) + np.einsum('ncft,pcf->npft', xi, bwi)
    bi = np.einsum('ncft,pcf->npft', xi, bwr) - np.einsum('ncft,pcf->npft', xr, bwi)
    br = br.transpose(0, 1, 3, 2); bi = bi.transpose(0, 1, 3, 2)
    # proj (ComplexLinear F -> G)
    pr = br @ pwr.T - bi @ pwi.T
    pi = bi @ pwr.T + br @ pwi.T
    # transpose(1,2) + flatten
    yr = pr.transpose(0, 2, 1, 3).reshape(N, T, P * G)
    yi = pi.transpose(0, 2, 1, 3).reshape(N, T, P * G)
    # affine (ComplexLinear P*G -> F)
    zr = yr @ awr.T - yi @ awi.T
    zi = yi @ awr.T + yr @ awi.T
    return zr, zi


if __name__ == "__main__":
    # Small, lane-friendly shapes consistent with the module
    # (num_bins=F, num_channels=C, spatial_filters=P, spectra_filters=G).
    N, C, F, T = 2, 4, 128, 8
    P, G = 4, 128

    key = jax.random.PRNGKey(0)
    ks = jax.random.split(key, 8)
    xr = jax.random.normal(ks[0], (N, C, F, T), jnp.float32)
    xi = jax.random.normal(ks[1], (N, C, F, T), jnp.float32)
    bwr = jax.random.normal(ks[2], (P, C, F), jnp.float32) * 0.1
    bwi = jax.random.normal(ks[3], (P, C, F), jnp.float32) * 0.1
    pwr = jax.random.normal(ks[4], (G, F), jnp.float32) * (1.0 / F ** 0.5)
    pwi = jax.random.normal(ks[5], (G, F), jnp.float32) * (1.0 / F ** 0.5)
    awr = jax.random.normal(ks[6], (F, P * G), jnp.float32) * (1.0 / (P * G) ** 0.5)
    awi = jax.random.normal(ks[7], (F, P * G), jnp.float32) * (1.0 / (P * G) ** 0.5)

    # One-time parameter prep (beamformer folded in, block-real, bf16).
    params = jax.block_until_ready(prepare_params(bwr, bwi, pwr, pwi, awr, awi))

    zr, zi = clp_fs_beamformer(xr, xi, params)
    jax.block_until_ready((zr, zi))

    zr_ref, zi_ref = _reference_numpy(xr, xi, bwr, bwi, pwr, pwi, awr, awi)
    # bf16 matmul operands (f32 accumulation) -> widened tolerance.
    np.testing.assert_allclose(np.asarray(zr), zr_ref, rtol=2e-2, atol=2e-2)
    np.testing.assert_allclose(np.asarray(zi), zi_ref, rtol=2e-2, atol=2e-2)

    print("KERNEL_OK")
</pallas_src>

<mosaic_0001>
module attributes {stable_mosaic.version = 11 : i64} {
  func.func @_clp_kernel(%arg0: i32, %arg1: i32, %arg2: memref<1x512x8xf32, #tpu.memory_space<vmem>>, %arg3: memref<1x512x8xf32, #tpu.memory_space<vmem>>, %arg4: memref<1024x512xbf16, #tpu.memory_space<vmem>>, %arg5: memref<1024x512xbf16, #tpu.memory_space<vmem>>, %arg6: memref<256x1024xbf16, #tpu.memory_space<vmem>>, %arg7: memref<1x256x8xf32, #tpu.memory_space<vmem>>) attributes {dimension_semantics = [#tpu.dimension_semantics<parallel>, #tpu.dimension_semantics<parallel>], iteration_bounds = array<i64: 2, 1>, scalar_prefetch = 0 : i64, scratch_operands = 0 : i64, tpu.core_type = #tpu.core_type<tc>, window_params = [{transform_indices = @transform_0, window_bounds = array<i64: 1, 512, 8>}, {transform_indices = @transform_1, window_bounds = array<i64: 1, 512, 8>}, {pipeline_mode = #tpu.pipeline_mode<synchronous>, transform_indices = @transform_2, window_bounds = array<i64: 1024, 512>}, {pipeline_mode = #tpu.pipeline_mode<synchronous>, transform_indices = @transform_3, window_bounds = array<i64: 1024, 512>}, {pipeline_mode = #tpu.pipeline_mode<synchronous>, transform_indices = @transform_4, window_bounds = array<i64: 256, 1024>}, {transform_indices = @transform_5, window_bounds = array<i64: 1, 256, 8>}]} {
    %c0 = arith.constant 0 : index
    %c0_0 = arith.constant 0 : index
    %c0_1 = arith.constant 0 : index
    %0 = vector.load %arg2[%c0, %c0_0, %c0_1] : memref<1x512x8xf32, #tpu.memory_space<vmem>>, vector<1x512x8xf32>
    %1 = vector.shape_cast %0 : vector<1x512x8xf32> to vector<512x8xf32>
    %2 = arith.truncf %1 : vector<512x8xf32> to vector<512x8xbf16>
    %c0_2 = arith.constant 0 : index
    %c0_3 = arith.constant 0 : index
    %c0_4 = arith.constant 0 : index
    %3 = vector.load %arg3[%c0_2, %c0_3, %c0_4] : memref<1x512x8xf32, #tpu.memory_space<vmem>>, vector<1x512x8xf32>
    %4 = vector.shape_cast %3 : vector<1x512x8xf32> to vector<512x8xf32>
    %5 = arith.truncf %4 : vector<512x8xf32> to vector<512x8xbf16>
    %c0_5 = arith.constant 0 : index
    %c0_6 = arith.constant 0 : index
    %6 = vector.load %arg4[%c0_5, %c0_6] : memref<1024x512xbf16, #tpu.memory_space<vmem>>, vector<1024x512xbf16>
    %cst = arith.constant dense<0.000000e+00> : vector<1024x8xf32>
    %7 = tpu.matmul %6, %2, %cst {dimension_numbers = #tpu.dot_dimension_numbers<[1], [0], [0], [1], [0, 0, 1, 1], [], []>} : vector<1024x512xbf16>, vector<512x8xbf16>, vector<1024x8xf32> -> vector<1024x8xf32>
    %c0_7 = arith.constant 0 : index
    %c0_8 = arith.constant 0 : index
    %8 = vector.load %arg5[%c0_7, %c0_8] : memref<1024x512xbf16, #tpu.memory_space<vmem>>, vector<1024x512xbf16>
    %cst_9 = arith.constant dense<0.000000e+00> : vector<1024x8xf32>
    %9 = tpu.matmul %8, %5, %cst_9 {dimension_numbers = #tpu.dot_dimension_numbers<[1], [0], [0], [1], [0, 0, 1, 1], [], []>} : vector<1024x512xbf16>, vector<512x8xbf16>, vector<1024x8xf32> -> vector<1024x8xf32>
    %10 = arith.addf %7, %9 : vector<1024x8xf32>
    %11 = arith.truncf %10 : vector<1024x8xf32> to vector<1024x8xbf16>
    %c0_10 = arith.constant 0 : index
    %c0_11 = arith.constant 0 : index
    %12 = vector.load %arg6[%c0_10, %c0_11] : memref<256x1024xbf16, #tpu.memory_space<vmem>>, vector<256x1024xbf16>
    %cst_12 = arith.constant dense<0.000000e+00> : vector<256x8xf32>
    %13 = tpu.matmul %12, %11, %cst_12 {dimension_numbers = #tpu.dot_dimension_numbers<[1], [0], [0], [1], [0, 0, 1, 1], [], []>} : vector<256x1024xbf16>, vector<1024x8xbf16>, vector<256x8xf32> -> vector<256x8xf32>
    %c0_13 = arith.constant 0 : index
    %c0_14 = arith.constant 0 : index
    %c0_15 = arith.constant 0 : index
    %14 = vector.load %arg7[%c0_13, %c0_14, %c0_15] : memref<1x256x8xf32, #tpu.memory_space<vmem>>, vector<1x256x8xf32>
    %15 = vector.shape_cast %14 : vector<1x256x8xf32> to vector<256x8xf32>
    %16 = vector.shape_cast %13 : vector<256x8xf32> to vector<1x256x8xf32>
    tpu.vector_store %arg7[%c0_13, %c0_14, %c0_15], %16 {strides = array<i32>} : memref<1x256x8xf32, #tpu.memory_space<vmem>>, vector<1x256x8xf32>,
    return
  }
  func.func @transform_0(%arg0: i32, %arg1: i32) -> (i32, i32, i32) {
    %c0_i32 = arith.constant 0 : i32
    %c0_i32_0 = arith.constant 0 : i32
    return %arg0, %c0_i32, %arg1 : i32, i32, i32
  }
  func.func @transform_1(%arg0: i32, %arg1: i32) -> (i32, i32, i32) {
    %c0_i32 = arith.constant 0 : i32
    %c0_i32_0 = arith.constant 0 : i32
    return %arg0, %c0_i32, %arg1 : i32, i32, i32
  }
  func.func @transform_2(%arg0: i32, %arg1: i32) -> (i32, i32) {
    %c0_i32 = arith.constant 0 : i32
    %c0_i32_0 = arith.constant 0 : i32
    %c0_i32_1 = arith.constant 0 : i32
    return %c0_i32, %c0_i32_0 : i32, i32
  }
  func.func @transform_3(%arg0: i32, %arg1: i32) -> (i32, i32) {
    %c0_i32 = arith.constant 0 : i32
    %c0_i32_0 = arith.constant 0 : i32
    %c0_i32_1 = arith.constant 0 : i32
    return %c0_i32, %c0_i32_0 : i32, i32
  }
  func.func @transform_4(%arg0: i32, %arg1: i32) -> (i32, i32) {
    %c0_i32 = arith.constant 0 : i32
    %c0_i32_0 = arith.constant 0 : i32
    %c0_i32_1 = arith.constant 0 : i32
    return %c0_i32, %c0_i32_0 : i32, i32
  }
  func.func @transform_5(%arg0: i32, %arg1: i32) -> (i32, i32, i32) {
    %c0_i32 = arith.constant 0 : i32
    %c0_i32_0 = arith.constant 0 : i32
    return %arg0, %c0_i32, %arg1 : i32, i32, i32
  }
}

</mosaic_0001>

<bundles_post_ra>
// kernel: tpu_custom_call.1
= control target key start
LH: loop header
LB: loop body
LE: loop exit
PB: predicated region body
PF: predicated region fallthrough
CT: control target
= control target key end

     0   :  { %10 = vsyncpa [#allocation3], 0  ;;  %s11674_s0 = inlined_call_operand.vmem [shape: f32[2,512,8], index: 0, kind: input, shape index: {}]   ;;  %s11675_s1 = inlined_call_operand.vmem [shape: f32[2,512,8], index: 1, kind: input, shape index: {}]   ;;  %s11676_s2 = inlined_call_operand.vmem [shape: bf16[1024,512], index: 2, kind: input, shape index: {}]   ;;  %s11677_s3 = inlined_call_operand.hbm [shape: bf16[1024,512], index: 3, kind: input, shape index: {}]   ;;  %s11678_s4 = inlined_call_operand.hbm [shape: bf16[256,1024], index: 4, kind: input, shape index: {}]   ;;  %s11679_s5 = inlined_call_operand.vmem [shape: f32[2,256,8], index: 5, kind: output, shape index: {}]  }
   0x1   :  { %11 = vsyncpa [#allocation5], 0  ;;  %s9442_s18 = smov 0   ;;  %s9444_s19 = smov 0  }
   0x2   :  { %s9446_s20 = smov 0  }
   0x3 LB: > { %s7395_s21 = sadd.s32 4294967295, %s9403_s20   ;;  %s29_s22 = sadd.s32 1, %s9399_s19  ;;  %s9403_s20 = sphi %s9446_s20, %s17_s20   ;;  %s9399_s19 = sphi %s9444_s19, %s11903_s19   ;;  %s9395_s18 = sphi %s9442_s18, %s11902_s18  }
   0x4   : > { %p31_p0 = scmp.ge.s32.totalorder %s29_s22, 2  ;;  %p7397_p1 = scmp.ge.s32.totalorder %s9403_s20, 1 }
   0x5   : > { %p181_p2 = scmp.lt.s32.totalorder %s9403_s20, 3  ;;  %p9467_p4 = scmp.eq.s32.totalorder %s7395_s21, 0 }
   0x6   : > { %s11905_s22 = smov (%p31_p0, %s29_s22), 0  ;;  %s9405_s25 = smov [#allocation2]  }
   0x7   : > { %p9463_p3 = pnand %p7397_p1, %p181_p2  ;;  %s196_s26 = sshll.u32 %s9405_s25, 4  ;;  %s197_s26 = int_to_ptr.vmem [resolvable:$true] %s196_s26 }
   0x8   : > { %s9406_s28 = smov [#allocation4]   ;;  %s9332_s30 = scalar_lea.vmem %s197_s26, 32768 }
   0x9   : > { %p8511_p5 = pneg %p9463_p3  ;;  %s209_s29 = sshll.u32 %s9406_s28, 4  ;;  %s210_s29 = int_to_ptr.vmem [resolvable:$true] %s209_s29 }
   0xa   : > { %p9333_p8 = scmp.ne.s32.totalorder %s197_s26, %s9332_s30  ;;  %p9340_p11 = scmp.lt.s32.totalorder %s197_s26, %s197_s26 }
   0xb   : > { %p9475_p6 = pnand %p9467_p4, %p8511_p5  ;;  %p9341_p12 = scmp.lt.s32.totalorder %s9332_s30, %s9332_s30 }
   0xd   : > { %p9323_p7 = pneg %p9475_p6  ;;  %p9342_p13 = por %p9341_p12, %p9340_p11 }
   0xf   : > { %p9335_p9 = pnand %p9333_p8, %p9323_p7 }
  0x11   : > { %p9336_p10 = pneg %p9335_p9 }
  0x13   : > { %p9343_p0 = pnand %p9342_p13, %p9336_p10 }
  0x15   : > { %9346 = shalt.err (!%p9343_p0)
}
  0x16   : > { %s9407_s6 = smov 256   ;;  %s9408_s7 = smov 16  }
  0x17   : > { %8514 = dma.hbm_to_vmem [thread:$0]  (!%p9475_p6), %s11677_s3, 32768, %s197_s26, [#allocation3], %s9407_s6, %s9407_s6, %s9408_s7  }
  0x18   : > { %s9358_s10 = scalar_lea.vmem %s210_s29, 16384  ;;  %p9366_p8 = scmp.lt.s32.totalorder %s210_s29, %s210_s29 }
  0x19   : > { %p9359_p1 = scmp.ne.s32.totalorder %s210_s29, %s9358_s10  ;;  %p9367_p9 = scmp.lt.s32.totalorder %s9358_s10, %s9358_s10 }
  0x1b   : > { %p9361_p2 = pnand %p9359_p1, %p9323_p7  ;;  %p9368_p11 = por %p9367_p9, %p9366_p8 }
  0x1d   : > { %p9362_p5 = pneg %p9361_p2 }
  0x1f   : > { %p9369_p10 = pnand %p9368_p11, %p9362_p5 }
  0x21   : > { %9372 = shalt.err (!%p9369_p10)
}
  0x22   : > { %s9409_s11 = smov 512   ;;  %s9410_s12 = smov 32  }
  0x23   : > { %8517 = dma.hbm_to_vmem [thread:$0]  (!%p9475_p6), %s11678_s4, 16384, %s210_s29, [#allocation5], %s9409_s11, %s9409_s11, %s9410_s12  }
  0x24   : > { %247 = sbr.rel (%p9463_p3) target bundleno = 1690 (0x69a), region = 40 }
  0x29   : > { %9386 = dma.done.wait (%p9467_p4), [#allocation3], 32768  }
  0x2a   : > { %9388 = vsyncadd (%p9467_p4), [#allocation3], 4294934528 }
  0x2b   : > { %9390 = dma.done.wait (%p9467_p4), [#allocation5], 16384  }
  0x2c   : > { %9392 = vsyncadd (%p9467_p4), [#allocation5], 4294950912  ;;  %p293_p7 = scmp.lt.s32.totalorder %s9395_s18, 1  ;;  %v9411_v0 = vmov 0   ;;  %v8555_v42 = vld [vmem:[#allocation2 + $0x4] ss:$16 sps:$4 sm:$0xff]  }
  0x2d   : > { %2302 = vmatprep.subr.bf16.mxu0 %v9411_v0  ;;  %2847 = vmatprep.subr.bf16.mxu1 %v9411_v0  ;;  %v8558_v45 = vld [vmem:[#allocation2 + $0xc] ss:$16 sps:$4 sm:$0xff]   ;;  %vm7238_vm0 = vcmask 64512  }
  0x2e   : > { %s11907_s18 = smov (!%p293_p7, %s9395_s18), 1  ;;  %2334 = vmatprep.mubr.bf16.mxu0 %v8555_v42  ;;  %2879 = vmatprep.mubr.bf16.mxu1 %v8558_v45  ;;  %v8565_v42 = vld [vmem:[#allocation2 + $0x44] ss:$16 sps:$4 sm:$0xff]   ;;  %v8570_v45 = vld [vmem:[#allocation2 + $0x48] ss:$16 sps:$4 sm:$0xff]  }
  0x2f   : > { %s8052_s15 = sshll.u32 %s11907_s18, 9  ;;  %s8054_s9 = sshll.u32 %s11907_s18, 8 }
  0x30   : > { %s9519_s21 = scalar_lea.vmem %s11675_s1, %s8052_s15  ;;  %s9638_s25 = scalar_lea.vmem %s11674_s0, %s8052_s15 }
  0x31   : > { %v428_v1 = vld [vmem:[%s9519_s21 + $0x70] sm:$0xff]  ;;  %v429_v2 = vld [vmem:[%s9519_s21 + $0x78] sm:$0xff]  ;;  %v426_v6 = vld [vmem:[%s9519_s21 + $0x60] sm:$0xff]  ;;  %s11499_s12 = scalar_lea.vmem %s11679_s5, %s8054_s9 }
  0x32   : > { %v460_v3 = vld [vmem:[%s9519_s21 + $0x170] sm:$0xff]  ;;  %v485_v4 = vpack.c.bf16 %v429_v2, %v428_v1  ;;  %v461_v5 = vld [vmem:[%s9519_s21 + $0x178] sm:$0xff]  ;;  %v427_v7 = vld [vmem:[%s9519_s21 + $0x68] sm:$0xff] }
  0x33   : > { %v501_v8 = vpack.c.bf16 %v461_v5, %v460_v3  ;;  %v458_v9 = vld [vmem:[%s9519_s21 + $0x160] sm:$0xff]  ;;  %v459_v10 = vld [vmem:[%s9519_s21 + $0x168] sm:$0xff]  ;;  %v484_v11 = vpack.c.bf16 %v427_v7, %v426_v6  ;;  %v424_v13 = vld [vmem:[%s9519_s21 + $0x50] sm:$0xff] }
  0x34   : > { %2303 = vmatpush1.bf16.msra.mxu0 %v485_v4  ;;  %v500_v12 = vpack.c.bf16 %v459_v10, %v458_v9  ;;  %v425_v14 = vld [vmem:[%s9519_s21 + $0x58] sm:$0xff]  ;;  %v456_v15 = vld [vmem:[%s9519_s21 + $0x150] sm:$0xff]  ;;  %v422_v19 = vld [vmem:[%s9519_s21 + $0x40] sm:$0xff] }
  0x35   : > { %2848 = vmatpush1.bf16.msra.mxu1 %v501_v8  ;;  %2304 = vmatprep.subr.bf16.mxu0 %v9411_v0  ;;  %v457_v16 = vld [vmem:[%s9519_s21 + $0x158] sm:$0xff]  ;;  %v483_v17 = vpack.c.bf16 %v425_v14, %v424_v13  ;;  %v423_v20 = vld [vmem:[%s9519_s21 + $0x48] sm:$0xff]  ;;  %v454_v21 = vld [vmem:[%s9519_s21 + $0x140] sm:$0xff] }
  0x36   : > { %2849 = vmatprep.subr.bf16.mxu1 %v9411_v0  ;;  %v499_v18 = vpack.c.bf16 %v457_v16, %v456_v15  ;;  %v455_v22 = vld [vmem:[%s9519_s21 + $0x148] sm:$0xff]  ;;  %v482_v23 = vpack.c.bf16 %v423_v20, %v422_v19  ;;  %v420_v25 = vld [vmem:[%s9519_s21 + $0x30] sm:$0xff]  ;;  %v421_v26 = vld [vmem:[%s9519_s21 + $0x38] sm:$0xff] }
  0x37   : > { %v498_v24 = vpack.c.bf16 %v455_v22, %v454_v21  ;;  %v452_v27 = vld [vmem:[%s9519_s21 + $0x130] sm:$0xff]  ;;  %v453_v28 = vld [vmem:[%s9519_s21 + $0x138] sm:$0xff]  ;;  %v481_v29 = vpack.c.bf16 %v421_v26, %v420_v25  ;;  %v418_v31 = vld [vmem:[%s9519_s21 + $0x20] sm:$0xff] }
  0x38   : > { %2305 = vmatpush1.bf16.msra.mxu0 %v484_v11  ;;  %v497_v30 = vpack.c.bf16 %v453_v28, %v452_v27  ;;  %v419_v32 = vld [vmem:[%s9519_s21 + $0x28] sm:$0xff]  ;;  %v450_v33 = vld [vmem:[%s9519_s21 + $0x120] sm:$0xff]  ;;  %v416_v37 = vld [vmem:[%s9519_s21 + $0x10] sm:$0xff] }
  0x39   : > { %2850 = vmatpush1.bf16.msra.mxu1 %v500_v12  ;;  %2306 = vmatprep.subr.bf16.mxu0 %v9411_v0  ;;  %v451_v34 = vld [vmem:[%s9519_s21 + $0x128] sm:$0xff]  ;;  %v480_v35 = vpack.c.bf16 %v419_v32, %v418_v31  ;;  %v417_v38 = vld [vmem:[%s9519_s21 + $0x18] sm:$0xff]  ;;  %v448_v39 = vld [vmem:[%s9519_s21 + $0x110] sm:$0xff] }
  0x3a   : > { %2851 = vmatprep.subr.bf16.mxu1 %v9411_v0  ;;  %v496_v36 = vpack.c.bf16 %v451_v34, %v450_v33  ;;  %v449_v40 = vld [vmem:[%s9519_s21 + $0x118] sm:$0xff]  ;;  %v414_v41 = vld [vmem:[%s9519_s21] sm:$0xff]  ;;  %v479_v43 = vpack.c.bf16 %v417_v38, %v416_v37  ;;  %v415_v44 = vld [vmem:[%s9519_s21 + $0x8] sm:$0xff] }
  0x3b   : > { %v495_v46 = vpack.c.bf16 %v449_v40, %v448_v39  ;;  %v446_v47 = vld [vmem:[%s9519_s21 + $0x100] sm:$0xff]  ;;  %v447_v48 = vld [vmem:[%s9519_s21 + $0x108] sm:$0xff]  ;;  %v478_v49 = vpack.c.bf16 %v415_v44, %v414_v41  ;;  %v444_v50 = vld [vmem:[%s9519_s21 + $0xf0] sm:$0xff] }
  0x3c   : > { %2307 = vmatpush1.bf16.msra.mxu0 %v483_v17  ;;  %v494_v51 = vpack.c.bf16 %v447_v48, %v446_v47  ;;  %v445_v52 = vld [vmem:[%s9519_s21 + $0xf8] sm:$0xff]  ;;  %v476_v53 = vld [vmem:[%s9519_s21 + $0x1f0] sm:$0xff]  ;;  %v442_v56 = vld [vmem:[%s9519_s21 + $0xe0] sm:$0xff] }
  0x3d   : > { %2852 = vmatpush1.bf16.msra.mxu1 %v499_v18  ;;  %2308 = vmatprep.subr.bf16.mxu0 %v9411_v0  ;;  %v477_v54 = vld [vmem:[%s9519_s21 + $0x1f8] sm:$0xff]  ;;  %v493_v55 = vpack.c.bf16 %v445_v52, %v444_v50  ;;  %v443_v57 = vld [vmem:[%s9519_s21 + $0xe8] sm:$0xff]  ;;  %v474_v59 = vld [vmem:[%s9519_s21 + $0x1e0] sm:$0xff] }
  0x3e   : > { %2853 = vmatprep.subr.bf16.mxu1 %v9411_v0  ;;  %v509_v58 = vpack.c.bf16 %v477_v54, %v476_v53  ;;  %v475_v60 = vld [vmem:[%s9519_s21 + $0x1e8] sm:$0xff]  ;;  %v492_v61 = vpack.c.bf16 %v443_v57, %v442_v56  ;;  %v440_v62 = vld [vmem:[%s9519_s21 + $0xd0] sm:$0xff]  ;;  %v441_v1 = vld [vmem:[%s9519_s21 + $0xd8] sm:$0xff] }
  0x3f   : > { %v508_v63 = vpack.c.bf16 %v475_v60, %v474_v59  ;;  %v472_v2 = vld [vmem:[%s9519_s21 + $0x1d0] sm:$0xff]  ;;  %v473_v3 = vld [vmem:[%s9519_s21 + $0x1d8] sm:$0xff]  ;;  %v491_v4 = vpack.c.bf16 %v441_v1, %v440_v62  ;;  %v438_v5 = vld [vmem:[%s9519_s21 + $0xc0] sm:$0xff] }
  0x40   : > { %2309 = vmatpush1.bf16.msra.mxu0 %v482_v23  ;;  %v439_v6 = vld [vmem:[%s9519_s21 + $0xc8] sm:$0xff]  ;;  %v507_v7 = vpack.c.bf16 %v473_v3, %v472_v2  ;;  %v470_v8 = vld [vmem:[%s9519_s21 + $0x1c0] sm:$0xff]  ;;  %v436_v11 = vld [vmem:[%s9519_s21 + $0xb0] sm:$0xff] }
  0x41   : > { %2854 = vmatpush1.bf16.msra.mxu1 %v498_v24  ;;  %2310 = vmatprep.subr.bf16.mxu0 %v9411_v0  ;;  %v471_v9 = vld [vmem:[%s9519_s21 + $0x1c8] sm:$0xff]  ;;  %v490_v10 = vpack.c.bf16 %v439_v6, %v438_v5  ;;  %v437_v13 = vld [vmem:[%s9519_s21 + $0xb8] sm:$0xff]  ;;  %v468_v14 = vld [vmem:[%s9519_s21 + $0x1b0] sm:$0xff] }
  0x42   : > { %2855 = vmatprep.subr.bf16.mxu1 %v9411_v0  ;;  %v506_v12 = vpack.c.bf16 %v471_v9, %v470_v8  ;;  %v469_v15 = vld [vmem:[%s9519_s21 + $0x1b8] sm:$0xff]  ;;  %v489_v16 = vpack.c.bf16 %v437_v13, %v436_v11  ;;  %v434_v17 = vld [vmem:[%s9519_s21 + $0xa0] sm:$0xff]  ;;  %v435_v18 = vld [vmem:[%s9519_s21 + $0xa8] sm:$0xff] }
  0x43   : > { %v505_v19 = vpack.c.bf16 %v469_v15, %v468_v14  ;;  %v466_v20 = vld [vmem:[%s9519_s21 + $0x1a0] sm:$0xff]  ;;  %v467_v21 = vld [vmem:[%s9519_s21 + $0x1a8] sm:$0xff]  ;;  %v488_v22 = vpack.c.bf16 %v435_v18, %v434_v17  ;;  %v432_v23 = vld [vmem:[%s9519_s21 + $0x90] sm:$0xff] }
  0x44   : > { %2311 = vmatpush1.bf16.msra.mxu0 %v481_v29  ;;  %v504_v24 = vpack.c.bf16 %v467_v21, %v466_v20  ;;  %v433_v25 = vld [vmem:[%s9519_s21 + $0x98] sm:$0xff]  ;;  %v464_v26 = vld [vmem:[%s9519_s21 + $0x190] sm:$0xff]  ;;  %v430_v29 = vld [vmem:[%s9519_s21 + $0x80] sm:$0xff] }
  0x45   : > { %2856 = vmatpush1.bf16.msra.mxu1 %v497_v30  ;;  %2312 = vmatprep.subr.bf16.mxu0 %v9411_v0  ;;  %v465_v27 = vld [vmem:[%s9519_s21 + $0x198] sm:$0xff]  ;;  %v487_v28 = vpack.c.bf16 %v433_v25, %v432_v23  ;;  %v431_v30 = vld [vmem:[%s9519_s21 + $0x88] sm:$0xff]  ;;  %v462_v32 = vld [vmem:[%s9519_s21 + $0x180] sm:$0xff] }
  0x46   : > { %2857 = vmatprep.subr.bf16.mxu1 %v9411_v0  ;;  %v503_v31 = vpack.c.bf16 %v465_v27, %v464_v26  ;;  %v463_v33 = vld [vmem:[%s9519_s21 + $0x188] sm:$0xff]  ;;  %v486_v34 = vpack.c.bf16 %v431_v30, %v430_v29  ;;  %v8559_v38 = vld [vmem:[#allocation2 + $0x24] ss:$16 sps:$4 sm:$0xff]   ;;  %v8563_v40 = vld [vmem:[#allocation2 + $0x20] ss:$16 sps:$4 sm:$0xff]  }
  0x47   : > { %v8556_v37 = vld [vmem:[#allocation2 + $0x8] ss:$16 sps:$4 sm:$0xff]   ;;  %v8561_v39 = vld [vmem:[#allocation2 + $0x2c] ss:$16 sps:$4 sm:$0xff]   ;;  %v8569_v44 = vld [vmem:[#allocation2 + $0x40] ss:$16 sps:$4 sm:$0xff]  }
  0x48   : > { %2313 = vmatpush1.bf16.msra.mxu0 %v480_v35  ;;  %v502_v35 = vpack.c.bf16 %v463_v33, %v462_v32  ;;  %v8564_v41 = vld [vmem:[#allocation2 + $0x28] ss:$16 sps:$4 sm:$0xff]   ;;  %v8573_v47 = vld [vmem:[#allocation2 + $0x6c] ss:$16 sps:$4 sm:$0xff]   ;;  %v8575_v48 = vld [vmem:[#allocation2 + $0x60] ss:$16 sps:$4 sm:$0xff]  }
  0x49   : > { %2858 = vmatpush1.bf16.msra.mxu1 %v496_v36  ;;  %2314 = vmatprep.subr.bf16.mxu0 %v9411_v0  ;;  %v8553_v36 = vld [vmem:[#allocation2] ss:$16 sps:$4 sm:$0xff]   ;;  %v8577_v50 = vld [vmem:[#allocation2 + $0x84] ss:$16 sps:$4 sm:$0xff]   ;;  %v8582_v53 = vld [vmem:[#allocation2 + $0x88] ss:$16 sps:$4 sm:$0xff]  }
  0x4a   : > { %2859 = vmatprep.subr.bf16.mxu1 %v9411_v0  ;;  %v8581_v52 = vld [vmem:[#allocation2 + $0x80] ss:$16 sps:$4 sm:$0xff]   ;;  %v8583_v54 = vld [vmem:[#allocation2 + $0xa4] ss:$16 sps:$4 sm:$0xff]   ;;  %v8588_v57 = vld [vmem:[#allocation2 + $0xa8] ss:$16 sps:$4 sm:$0xff]  }
  0x4b   : > { %v8587_v56 = vld [vmem:[#allocation2 + $0xa0] ss:$16 sps:$4 sm:$0xff]   ;;  %v8591_v59 = vld [vmem:[#allocation2 + $0xcc] ss:$16 sps:$4 sm:$0xff]   ;;  %v8595_v62 = vld [vmem:[#allocation2 + $0xe4] ss:$16 sps:$4 sm:$0xff]  }
  0x4c   : > { %2315 = vmatpush1.bf16.msra.mxu0 %v479_v43  ;;  %v8567_v43 = vld [vmem:[#allocation2 + $0x4c] ss:$16 sps:$4 sm:$0xff]   ;;  %v8593_v60 = vld [vmem:[#allocation2 + $0xc0] ss:$16 sps:$4 sm:$0xff]   ;;  %v8600_v2 = vld [vmem:[#allocation2 + $0xe8] ss:$16 sps:$4 sm:$0xff]  }
  0x4d   : > { %2860 = vmatpush1.bf16.msra.mxu1 %v495_v46  ;;  %2316 = vmatprep.subr.bf16.mxu0 %v9411_v0  ;;  %v8571_v46 = vld [vmem:[#allocation2 + $0x64] ss:$16 sps:$4 sm:$0xff]   ;;  %v8599_v1 = vld [vmem:[#allocation2 + $0xe0] ss:$16 sps:$4 sm:$0xff]   ;;  %v8606_v6 = vld [vmem:[#allocation2 + $0x108] ss:$16 sps:$4 sm:$0xff]  }
  0x4e   : > { %2861 = vmatprep.subr.bf16.mxu1 %v9411_v0  ;;  %v8601_v3 = vld [vmem:[#allocation2 + $0x104] ss:$16 sps:$4 sm:$0xff]   ;;  %v8605_v5 = vld [vmem:[#allocation2 + $0x100] ss:$16 sps:$4 sm:$0xff]   ;;  %v8609_v8 = vld [vmem:[#allocation2 + $0x12c] ss:$16 sps:$4 sm:$0xff]  }
  0x4f   : > { %v8611_v9 = vld [vmem:[#allocation2 + $0x120] ss:$16 sps:$4 sm:$0xff]   ;;  %v8613_v11 = vld [vmem:[#allocation2 + $0x144] ss:$16 sps:$4 sm:$0xff]   ;;  %v8618_v14 = vld [vmem:[#allocation2 + $0x148] ss:$16 sps:$4 sm:$0xff]  }
  0x50   : > { %2317 = vmatpush1.bf16.msra.mxu0 %v478_v49  ;;  %v8576_v49 = vld [vmem:[#allocation2 + $0x68] ss:$16 sps:$4 sm:$0xff]   ;;  %v8617_v13 = vld [vmem:[#allocation2 + $0x140] ss:$16 sps:$4 sm:$0xff]   ;;  %v8619_v15 = vld [vmem:[#allocation2 + $0x164] ss:$16 sps:$4 sm:$0xff]  }
  0x51   : > { %2862 = vmatpush1.bf16.msra.mxu1 %v494_v51  ;;  %2318 = vmatprep.subr.bf16.mxu0 %v9411_v0  ;;  %v8579_v51 = vld [vmem:[#allocation2 + $0x8c] ss:$16 sps:$4 sm:$0xff]   ;;  %v8623_v17 = vld [vmem:[#allocation2 + $0x160] ss:$16 sps:$4 sm:$0xff]   ;;  %v8624_v18 = vld [vmem:[#allocation2 + $0x168] ss:$16 sps:$4 sm:$0xff]  }
  0x52   : > { %2863 = vmatprep.subr.bf16.mxu1 %v9411_v0  ;;  %v8627_v20 = vld [vmem:[#allocation2 + $0x18c] ss:$16 sps:$4 sm:$0xff]   ;;  %v8629_v21 = vld [vmem:[#allocation2 + $0x180] ss:$16 sps:$4 sm:$0xff]   ;;  %v8631_v23 = vld [vmem:[#allocation2 + $0x1a4] ss:$16 sps:$4 sm:$0xff]  }
  0x53   : > { %v8635_v25 = vld [vmem:[#allocation2 + $0x1a0] ss:$16 sps:$4 sm:$0xff]   ;;  %v8636_v26 = vld [vmem:[#allocation2 + $0x1a8] ss:$16 sps:$4 sm:$0xff]   ;;  %v8637_v27 = vld [vmem:[#allocation2 + $0x1c4] ss:$16 sps:$4 sm:$0xff]  }
  0x54   : > { %2319 = vmatpush2.bf16.msra.mxu0 %v493_v55  ;;  %v8585_v55 = vld [vmem:[#allocation2 + $0xac] ss:$16 sps:$4 sm:$0xff]   ;;  %v8641_v29 = vld [vmem:[#allocation2 + $0x1c0] ss:$16 sps:$4 sm:$0xff]   ;;  %v8642_v30 = vld [vmem:[#allocation2 + $0x1c8] ss:$16 sps:$4 sm:$0xff]  }
  0x55   : > { %2864 = vmatpush2.bf16.msra.mxu1 %v509_v58  ;;  %2320 = vmatprep.subr.bf16.mxu0 %v9411_v0  ;;  %v8589_v58 = vld [vmem:[#allocation2 + $0xc4] ss:$16 sps:$4 sm:$0xff]   ;;  %v8645_v32 = vld [vmem:[#allocation2 + $0x1ec] ss:$16 sps:$4 sm:$0xff]   ;;  %v8647_v33 = vld [vmem:[#allocation2 + $0x1e0] ss:$16 sps:$4 sm:$0xff]  }
  0x56   : > { %2865 = vmatprep.subr.bf16.mxu1 %v9411_v0 }
  0x58   : > { %2321 = vmatpush2.bf16.msra.mxu0 %v492_v61  ;;  %v8594_v61 = vld [vmem:[#allocation2 + $0xc8] ss:$16 sps:$4 sm:$0xff]  }
  0x59   : > { %2866 = vmatpush2.bf16.msra.mxu1 %v508_v63  ;;  %2322 = vmatprep.subr.bf16.mxu0 %v9411_v0  ;;  %v8597_v63 = vld [vmem:[#allocation2 + $0xec] ss:$16 sps:$4 sm:$0xff]  }
  0x5a   : > { %2867 = vmatprep.subr.bf16.mxu1 %v9411_v0 }
  0x5c   : > { %2323 = vmatpush2.bf16.msra.mxu0 %v491_v4  ;;  %v8603_v4 = vld [vmem:[#allocation2 + $0x10c] ss:$16 sps:$4 sm:$0xff]  }
  0x5d   : > { %2868 = vmatpush2.bf16.msra.mxu1 %v507_v7  ;;  %2324 = vmatprep.subr.bf16.mxu0 %v9411_v0  ;;  %v8607_v7 = vld [vmem:[#allocation2 + $0x124] ss:$16 sps:$4 sm:$0xff]  }
  0x5e   : > { %2869 = vmatprep.subr.bf16.mxu1 %v9411_v0 }
  0x60   : > { %2325 = vmatpush2.bf16.msra.mxu0 %v490_v10  ;;  %v8612_v10 = vld [vmem:[#allocation2 + $0x128] ss:$16 sps:$4 sm:$0xff]  }
  0x61   : > { %2870 = vmatpush2.bf16.msra.mxu1 %v506_v12  ;;  %2326 = vmatprep.subr.bf16.mxu0 %v9411_v0  ;;  %v8615_v12 = vld [vmem:[#allocation2 + $0x14c] ss:$16 sps:$4 sm:$0xff]  }
  0x62   : > { %2871 = vmatprep.subr.bf16.mxu1 %v9411_v0 }
  0x64   : > { %2327 = vmatpush2.bf16.msra.mxu0 %v489_v16  ;;  %v8621_v16 = vld [vmem:[#allocation2 + $0x16c] ss:$16 sps:$4 sm:$0xff]  }
  0x65   : > { %2872 = vmatpush2.bf16.msra.mxu1 %v505_v19  ;;  %2328 = vmatprep.subr.bf16.mxu0 %v9411_v0  ;;  %v8625_v19 = vld [vmem:[#allocation2 + $0x184] ss:$16 sps:$4 sm:$0xff]  }
  0x66   : > { %2873 = vmatprep.subr.bf16.mxu1 %v9411_v0 }
  0x68   : > { %2329 = vmatpush2.bf16.msra.mxu0 %v488_v22  ;;  %v8630_v22 = vld [vmem:[#allocation2 + $0x188] ss:$16 sps:$4 sm:$0xff]  }
  0x69   : > { %2874 = vmatpush2.bf16.msra.mxu1 %v504_v24  ;;  %2330 = vmatprep.subr.bf16.mxu0 %v9411_v0  ;;  %v8633_v24 = vld [vmem:[#allocation2 + $0x1ac] ss:$16 sps:$4 sm:$0xff]  }
  0x6a   : > { %2875 = vmatprep.subr.bf16.mxu1 %v9411_v0 }
  0x6c   : > { %2331 = vmatpush2.bf16.msra.mxu0 %v487_v28  ;;  %v8639_v28 = vld [vmem:[#allocation2 + $0x1cc] ss:$16 sps:$4 sm:$0xff]  }
  0x6d   : > { %2876 = vmatpush2.bf16.msra.mxu1 %v503_v31  ;;  %2332 = vmatprep.subr.bf16.mxu0 %v9411_v0  ;;  %v8643_v31 = vld [vmem:[#allocation2 + $0x1e4] ss:$16 sps:$4 sm:$0xff]  }
  0x6e   : > { %2877 = vmatprep.subr.bf16.mxu1 %v9411_v0 }
  0x70   : > { %2333 = vmatpush2.bf16.msra.mxu0 %v486_v34  ;;  %v8648_v34 = vld [vmem:[#allocation2 + $0x1e8] ss:$16 sps:$4 sm:$0xff]  }
  0x71   : > { %2878 = vmatpush2.bf16.msra.mxu1 %v502_v35  ;;  %4672 = vmatprep.subr.bf16.mxu0 %v9411_v0  ;;  %v8649_v35 = vld [vmem:[#allocation2 + $0x204] ss:$16 sps:$4 sm:$0xff]  }
  0x72   : > { %5217 = vmatprep.subr.bf16.mxu1 %v9411_v0 }
  0x73   : > { %2335 = vmatmul.mubr.bf16.vlgmr.msra.gmra.mxu0 %v8553_v36  ;;  %v8651_v36 = vld [vmem:[#allocation2 + $0x20c] ss:$16 sps:$4 sm:$0xff]  }
  0x74   : > { %2880 = vmatmul.mubr.bf16.vlgmr.msra.gmra.mxu1 %v8556_v37  ;;  %2342 = vmatprep.mubr.bf16.mxu0 %v8559_v38  ;;  %v8653_v37 = vld [vmem:[#allocation2 + $0x200] ss:$16 sps:$4 sm:$0xff]   ;;  %v8654_v38 = vld [vmem:[#allocation2 + $0x208] ss:$16 sps:$4 sm:$0xff]  }
  0x75   : > { %2887 = vmatprep.mubr.bf16.mxu1 %v8561_v39  ;;  %v8655_v39 = vld [vmem:[#allocation2 + $0x224] ss:$16 sps:$4 sm:$0xff]  }
  0x7b   : > { %2343 = vmatmul.mubr.bf16.gmra.mxu0 %v8563_v40  ;;  %v8657_v40 = vld [vmem:[#allocation2 + $0x22c] ss:$16 sps:$4 sm:$0xff]  }
  0x7c   : > { %2888 = vmatmul.mubr.bf16.gmra.mxu1 %v8564_v41  ;;  %2350 = vmatprep.mubr.bf16.mxu0 %v8565_v42  ;;  %v8659_v41 = vld [vmem:[#allocation2 + $0x220] ss:$16 sps:$4 sm:$0xff]   ;;  %v8660_v42 = vld [vmem:[#allocation2 + $0x228] ss:$16 sps:$4 sm:$0xff]  }
  0x7d   : > { %2895 = vmatprep.mubr.bf16.mxu1 %v8567_v43  ;;  %v8661_v43 = vld [vmem:[#allocation2 + $0x244] ss:$16 sps:$4 sm:$0xff]  }
  0x83   : > { %2351 = vmatmul.mubr.bf16.gmra.mxu0 %v8569_v44  ;;  %v8663_v44 = vld [vmem:[#allocation2 + $0x24c] ss:$16 sps:$4 sm:$0xff]  }
  0x84   : > { %2896 = vmatmul.mubr.bf16.gmra.mxu1 %v8570_v45  ;;  %2358 = vmatprep.mubr.bf16.mxu0 %v8571_v46  ;;  %v8665_v45 = vld [vmem:[#allocation2 + $0x240] ss:$16 sps:$4 sm:$0xff]   ;;  %v8666_v46 = vld [vmem:[#allocation2 + $0x248] ss:$16 sps:$4 sm:$0xff]  }
  0x85   : > { %2903 = vmatprep.mubr.bf16.mxu1 %v8573_v47  ;;  %v8667_v47 = vld [vmem:[#allocation2 + $0x264] ss:$16 sps:$4 sm:$0xff]  }
  0x8b   : > { %2359 = vmatmul.mubr.bf16.gmra.mxu0 %v8575_v48  ;;  %v8669_v48 = vld [vmem:[#allocation2 + $0x26c] ss:$16 sps:$4 sm:$0xff]  }
  0x8c   : > { %2904 = vmatmul.mubr.bf16.gmra.mxu1 %v8576_v49  ;;  %2366 = vmatprep.mubr.bf16.mxu0 %v8577_v50  ;;  %v8671_v49 = vld [vmem:[#allocation2 + $0x260] ss:$16 sps:$4 sm:$0xff]   ;;  %v8672_v50 = vld [vmem:[#allocation2 + $0x268] ss:$16 sps:$4 sm:$0xff]  }
  0x8d   : > { %2911 = vmatprep.mubr.bf16.mxu1 %v8579_v51  ;;  %v8673_v51 = vld [vmem:[#allocation2 + $0x284] ss:$16 sps:$4 sm:$0xff]  }
  0x93   : > { %2367 = vmatmul.mubr.bf16.gmra.mxu0 %v8581_v52  ;;  %v8675_v52 = vld [vmem:[#allocation2 + $0x28c] ss:$16 sps:$4 sm:$0xff]  }
  0x94   : > { %2912 = vmatmul.mubr.bf16.gmra.mxu1 %v8582_v53  ;;  %2374 = vmatprep.mubr.bf16.mxu0 %v8583_v54  ;;  %v8677_v53 = vld [vmem:[#allocation2 + $0x280] ss:$16 sps:$4 sm:$0xff]   ;;  %v8678_v54 = vld [vmem:[#allocation2 + $0x288] ss:$16 sps:$4 sm:$0xff]  }
  0x95   : > { %2919 = vmatprep.mubr.bf16.mxu1 %v8585_v55  ;;  %v8679_v55 = vld [vmem:[#allocation2 + $0x2a4] ss:$16 sps:$4 sm:$0xff]  }
  0x9b   : > { %2375 = vmatmul.mubr.bf16.gmra.mxu0 %v8587_v56  ;;  %v8681_v56 = vld [vmem:[#allocation2 + $0x2ac] ss:$16 sps:$4 sm:$0xff]  }
  0x9c   : > { %2920 = vmatmul.mubr.bf16.gmra.mxu1 %v8588_v57  ;;  %2382 = vmatprep.mubr.bf16.mxu0 %v8589_v58  ;;  %v8683_v57 = vld [vmem:[#allocation2 + $0x2a0] ss:$16 sps:$4 sm:$0xff]   ;;  %v8684_v58 = vld [vmem:[#allocation2 + $0x2a8] ss:$16 sps:$4 sm:$0xff]  }
  0x9d   : > { %2927 = vmatprep.mubr.bf16.mxu1 %v8591_v59  ;;  %v8685_v59 = vld [vmem:[#allocation2 + $0x2c4] ss:$16 sps:$4 sm:$0xff]  }
  0xa3   : > { %2383 = vmatmul.mubr.bf16.gmra.mxu0 %v8593_v60  ;;  %v8687_v60 = vld [vmem:[#allocation2 + $0x2cc] ss:$16 sps:$4 sm:$0xff]  }
  0xa4   : > { %2928 = vmatmul.mubr.bf16.gmra.mxu1 %v8594_v61  ;;  %2390 = vmatprep.mubr.bf16.mxu0 %v8595_v62  ;;  %v8689_v61 = vld [vmem:[#allocation2 + $0x2c0] ss:$16 sps:$4 sm:$0xff]   ;;  %v8690_v62 = vld [vmem:[#allocation2 + $0x2c8] ss:$16 sps:$4 sm:$0xff]  }
  0xa5   : > { %2935 = vmatprep.mubr.bf16.mxu1 %v8597_v63  ;;  %v8691_v63 = vld [vmem:[#allocation2 + $0x2e4] ss:$16 sps:$4 sm:$0xff]  }
  0xab   : > { %2391 = vmatmul.mubr.bf16.gmra.mxu0 %v8599_v1  ;;  %v8693_v1 = vld [vmem:[#allocation2 + $0x2ec] ss:$16 sps:$4 sm:$0xff]  }
  0xac   : > { %2936 = vmatmul.mubr.bf16.gmra.mxu1 %v8600_v2  ;;  %2398 = vmatprep.mubr.bf16.mxu0 %v8601_v3  ;;  %v8695_v2 = vld [vmem:[#allocation2 + $0x2e0] ss:$16 sps:$4 sm:$0xff]   ;;  %v8696_v3 = vld [vmem:[#allocation2 + $0x2e8] ss:$16 sps:$4 sm:$0xff]  }
  0xad   : > { %2943 = vmatprep.mubr.bf16.mxu1 %v8603_v4  ;;  %v8697_v4 = vld [vmem:[#allocation2 + $0x304] ss:$16 sps:$4 sm:$0xff]  }
  0xb3   : > { %2399 = vmatmul.mubr.bf16.gmra.mxu0 %v8605_v5  ;;  %v8699_v5 = vld [vmem:[#allocation2 + $0x30c] ss:$16 sps:$4 sm:$0xff]  }
  0xb4   : > { %2944 = vmatmul.mubr.bf16.gmra.mxu1 %v8606_v6  ;;  %2406 = vmatprep.mubr.bf16.mxu0 %v8607_v7  ;;  %v8701_v6 = vld [vmem:[#allocation2 + $0x300] ss:$16 sps:$4 sm:$0xff]   ;;  %v8702_v7 = vld [vmem:[#allocation2 + $0x308] ss:$16 sps:$4 sm:$0xff]  }
  0xb5   : > { %2951 = vmatprep.mubr.bf16.mxu1 %v8609_v8  ;;  %v8703_v8 = vld [vmem:[#allocation2 + $0x324] ss:$16 sps:$4 sm:$0xff]  }
  0xbb   : > { %2407 = vmatmul.mubr.bf16.gmra.mxu0 %v8611_v9  ;;  %v8705_v9 = vld [vmem:[#allocation2 + $0x32c] ss:$16 sps:$4 sm:$0xff]  }
  0xbc   : > { %2952 = vmatmul.mubr.bf16.gmra.mxu1 %v8612_v10  ;;  %2414 = vmatprep.mubr.bf16.mxu0 %v8613_v11 }
  0xbd   : > { %2959 = vmatprep.mubr.bf16.mxu1 %v8615_v12 }
  0xc3   : > { %2415 = vmatmul.mubr.bf16.gmra.mxu0 %v8617_v13 }
  0xc4   : > { %2960 = vmatmul.mubr.bf16.gmra.mxu1 %v8618_v14  ;;  %2422 = vmatprep.mubr.bf16.mxu0 %v8619_v15 }
  0xc5   : > { %2967 = vmatprep.mubr.bf16.mxu1 %v8621_v16  ;;  %v8707_v16 = vld [vmem:[#allocation2 + $0x320] ss:$16 sps:$4 sm:$0xff]  }
  0xcb   : > { %2423 = vmatmul.mubr.bf16.gmra.mxu0 %v8623_v17 }
  0xcc   : > { %2968 = vmatmul.mubr.bf16.gmra.mxu1 %v8624_v18  ;;  %2430 = vmatprep.mubr.bf16.mxu0 %v8625_v19  ;;  %v8708_v18 = vld [vmem:[#allocation2 + $0x328] ss:$16 sps:$4 sm:$0xff]   ;;  %v8709_v19 = vld [vmem:[#allocation2 + $0x344] ss:$16 sps:$4 sm:$0xff]  }
  0xcd   : > { %2975 = vmatprep.mubr.bf16.mxu1 %v8627_v20 }
  0xd3   : > { %2431 = vmatmul.mubr.bf16.gmra.mxu0 %v8629_v21 }
  0xd4   : > { %2976 = vmatmul.mubr.bf16.gmra.mxu1 %v8630_v22  ;;  %2438 = vmatprep.mubr.bf16.mxu0 %v8631_v23  ;;  %v8711_v22 = vld [vmem:[#allocation2 + $0x34c] ss:$16 sps:$4 sm:$0xff]  }
  0xd5   : > { %2983 = vmatprep.mubr.bf16.mxu1 %v8633_v24 }
  0xdb   : > { %2439 = vmatmul.mubr.bf16.gmra.mxu0 %v8635_v25 }
  0xdc   : > { %2984 = vmatmul.mubr.bf16.gmra.mxu1 %v8636_v26  ;;  %2446 = vmatprep.mubr.bf16.mxu0 %v8637_v27 }
  0xdd   : > { %2991 = vmatprep.mubr.bf16.mxu1 %v8639_v28 }
  0xe3   : > { %2447 = vmatmul.mubr.bf16.gmra.mxu0 %v8641_v29 }
  0xe4   : > { %2992 = vmatmul.mubr.bf16.gmra.mxu1 %v8642_v30  ;;  %2454 = vmatprep.mubr.bf16.mxu0 %v8643_v31  ;;  %v8713_v30 = vld [vmem:[#allocation2 + $0x340] ss:$16 sps:$4 sm:$0xff]  }
  0xe5   : > { %2999 = vmatprep.mubr.bf16.mxu1 %v8645_v32  ;;  %v8714_v32 = vld [vmem:[#allocation2 + $0x348] ss:$16 sps:$4 sm:$0xff]  }
  0xeb   : > { %2455 = vmatmul.mubr.bf16.gmra.mxu0 %v8647_v33  ;;  %v8715_v33 = vld [vmem:[#allocation2 + $0x364] ss:$16 sps:$4 sm:$0xff]  }
  0xec   : > { %3000 = vmatmul.mubr.bf16.gmra.mxu1 %v8648_v34  ;;  %2462 = vmatprep.mubr.bf16.mxu0 %v8649_v35 }
  0xed   : > { %3007 = vmatprep.mubr.bf16.mxu1 %v8651_v36  ;;  %v8717_v36 = vld [vmem:[#allocation2 + $0x36c] ss:$16 sps:$4 sm:$0xff]  }
  0xf3   : > { %2463 = vmatmul.mubr.bf16.gmra.mxu0 %v8653_v37 }
  0xf4   : > { %3008 = vmatmul.mubr.bf16.gmra.mxu1 %v8654_v38  ;;  %2470 = vmatprep.mubr.bf16.mxu0 %v8655_v39 }
  0xf5   : > { %3015 = vmatprep.mubr.bf16.mxu1 %v8657_v40 }
  0xfb   : > { %2471 = vmatmul.mubr.bf16.gmra.mxu0 %v8659_v41 }
  0xfc   : > { %3016 = vmatmul.mubr.bf16.gmra.mxu1 %v8660_v42  ;;  %2478 = vmatprep.mubr.bf16.mxu0 %v8661_v43 }
  0xfd   : > { %3023 = vmatprep.mubr.bf16.mxu1 %v8663_v44  ;;  %v8719_v44 = vld [vmem:[#allocation2 + $0x360] ss:$16 sps:$4 sm:$0xff]  }
 0x103   : > { %2479 = vmatmul.mubr.bf16.gmra.mxu0 %v8665_v45 }
 0x104   : > { %3024 = vmatmul.mubr.bf16.gmra.mxu1 %v8666_v46  ;;  %2486 = vmatprep.mubr.bf16.mxu0 %v8667_v47  ;;  %v8720_v46 = vld [vmem:[#allocation2 + $0x368] ss:$16 sps:$4 sm:$0xff]   ;;  %v8723_v47 = vld [vmem:[#allocation2 + $0x384] ss:$16 sps:$4 sm:$0xff]  }
 0x105   : > { %3031 = vmatprep.mubr.bf16.mxu1 %v8669_v48 }
 0x10b   : > { %2487 = vmatmul.mubr.bf16.gmra.mxu0 %v8671_v49 }
 0x10c   : > { %3032 = vmatmul.mubr.bf16.gmra.mxu1 %v8672_v50  ;;  %2494 = vmatprep.mubr.bf16.mxu0 %v8673_v51  ;;  %v8726_v50 = vld [vmem:[#allocation2 + $0x38c] ss:$16 sps:$4 sm:$0xff]  }
 0x10d   : > { %3039 = vmatprep.mubr.bf16.mxu1 %v8675_v52 }
 0x113   : > { %2495 = vmatmul.mubr.bf16.gmra.mxu0 %v8677_v53 }
 0x114   : > { %3040 = vmatmul.mubr.bf16.gmra.mxu1 %v8678_v54  ;;  %2502 = vmatprep.mubr.bf16.mxu0 %v8679_v55 }
 0x115   : > { %3047 = vmatprep.mubr.bf16.mxu1 %v8681_v56 }
 0x11b   : > { %2503 = vmatmul.mubr.bf16.gmra.mxu0 %v8683_v57 }
 0x11c   : > { %3048 = vmatmul.mubr.bf16.gmra.mxu1 %v8684_v58  ;;  %2510 = vmatprep.mubr.bf16.mxu0 %v8685_v59  ;;  %v8721_v58 = vld [vmem:[#allocation2 + $0x380] ss:$16 sps:$4 sm:$0xff]  }
 0x11d   : > { %3055 = vmatprep.mubr.bf16.mxu1 %v8687_v60  ;;  %v8724_v60 = vld [vmem:[#allocation2 + $0x388] ss:$16 sps:$4 sm:$0xff]  }
 0x123   : > { %2511 = vmatmul.mubr.bf16.gmra.mxu0 %v8689_v61  ;;  %v8729_v61 = vld [vmem:[#allocation2 + $0x3a4] ss:$16 sps:$4 sm:$0xff]  }
 0x124   : > { %3056 = vmatmul.mubr.bf16.gmra.mxu1 %v8690_v62  ;;  %2518 = vmatprep.mubr.bf16.mxu0 %v8691_v63 }
 0x125   : > { %3063 = vmatprep.mubr.bf16.mxu1 %v8693_v1  ;;  %v8732_v1 = vld [vmem:[#allocation2 + $0x3ac] ss:$16 sps:$4 sm:$0xff]  }
 0x12b   : > { %2519 = vmatmul.mubr.bf16.gmra.mxu0 %v8695_v2 }
 0x12c   : > { %3064 = vmatmul.mubr.bf16.gmra.mxu1 %v8696_v3  ;;  %2526 = vmatprep.mubr.bf16.mxu0 %v8697_v4 }
 0x12d   : > { %3071 = vmatprep.mubr.bf16.mxu1 %v8699_v5 }
 0x133   : > { %v2336_v10 = vpop.f32.mrf.mxu0  ;;  %2527 = vmatmul.mubr.bf16.gmra.mxu0 %v8701_v6 }
 0x134   : > { %v2881_v11 = vpop.f32.mrf.mxu1  ;;  %3072 = vmatmul.mubr.bf16.gmra.mxu1 %v8702_v7  ;;  %2534 = vmatprep.mubr.bf16.mxu0 %v8703_v8  ;;  %v332_v7 = vld [vmem:[%s9638_s25 + $0x70] sm:$0xff]  ;;  %v333_v8 = vld [vmem:[%s9638_s25 + $0x78] sm:$0xff] }
 0x135   : > { %v9617_v12 = vadd.f32 %v2881_v11, %v2336_v10  ;;  %v2338_v13 = vpop.f32.mrf.mxu0  ;;  %3079 = vmatprep.mubr.bf16.mxu1 %v8705_v9  ;;  %v389_v10 = vpack.c.bf16 %v333_v8, %v332_v7  ;;  %v364_v11 = vld [vmem:[%s9638_s25 + $0x170] sm:$0xff] }
 0x136   : > { %v2883_v14 = vpop.f32.mrf.mxu1  ;;  %v365_v13 = vld [vmem:[%s9638_s25 + $0x178] sm:$0xff] }
 0x137   : > { %v2339_v15 = vpop.f32.mrf.mxu0  ;;  %4673 = vmatpush1.bf16.msra.mxu0 %v389_v10 }
 0x138   : > { %v2884_v17 = vpop.f32.mrf.mxu1  ;;  %4674 = vmatprep.subr.bf16.mxu0 %v9411_v0 }
 0x139   : > { %v9619_v20 = vadd.f32 %v2884_v17, %v2339_v15  ;;  %v2341_v21 = vpop.f32.mrf.mxu0  ;;  %v8727_v15 = vld [vmem:[#allocation2 + $0x3a0] ss:$16 sps:$4 sm:$0xff]  }
 0x13a   : > { %v2886_v23 = vpop.f32.mrf.mxu1 }
 0x13b   : > { %v2344_v24 = vpop.f32.mrf.mxu0  ;;  %2535 = vmatmul.mubr.bf16.gmra.mxu0 %v8707_v16  ;;  %v405_v16 = vpack.c.bf16 %v365_v13, %v364_v11  ;;  %v8738_v23 = vld [vmem:[#allocation2 + $0x3cc] ss:$16 sps:$4 sm:$0xff]  }
 0x13c   : > { %v2889_v25 = vpop.f32.mrf.mxu1  ;;  %3080 = vmatmul.mubr.bf16.gmra.mxu1 %v8708_v18  ;;  %2542 = vmatprep.mubr.bf16.mxu0 %v8709_v19  ;;  %v8730_v18 = vld [vmem:[#allocation2 + $0x3a8] ss:$16 sps:$4 sm:$0xff]   ;;  %v8735_v19 = vld [vmem:[#allocation2 + $0x3c4] ss:$16 sps:$4 sm:$0xff]  }
 0x13d   : > { %v9621_v26 = vadd.f32 %v2889_v25, %v2344_v24  ;;  %v2346_v27 = vpop.f32.mrf.mxu0  ;;  %3087 = vmatprep.mubr.bf16.mxu1 %v8711_v22  ;;  %5218 = vmatpush1.bf16.msra.mxu1 %v405_v16  ;;  %v330_v16 = vld [vmem:[%s9638_s25 + $0x60] sm:$0xff] }
 0x13e   : > { %v2891_v28 = vpop.f32.mrf.mxu1  ;;  %5219 = vmatprep.subr.bf16.mxu1 %v9411_v0 }
 0x13f   : > { %v2347_v29 = vpop.f32.mrf.mxu0 }
 0x140   : > { %v2892_v31 = vpop.f32.mrf.mxu1 }
 0x141   : > { %v9623_v34 = vadd.f32 %v2892_v31, %v2347_v29  ;;  %v2349_v35 = vpop.f32.mrf.mxu0 }
 0x142   : > { %v2894_v37 = vpop.f32.mrf.mxu1  ;;  %v8736_v35 = vld [vmem:[#allocation2 + $0x3c8] ss:$16 sps:$4 sm:$0xff]  }
 0x143   : > { %v2352_v38 = vpop.f32.mrf.mxu0  ;;  %2543 = vmatmul.mubr.bf16.gmra.mxu0 %v8713_v30 }
 0x144   : > { %v2897_v39 = vpop.f32.mrf.mxu1  ;;  %3088 = vmatmul.mubr.bf16.gmra.mxu1 %v8714_v32  ;;  %2550 = vmatprep.mubr.bf16.mxu0 %v8715_v33  ;;  %v8733_v32 = vld [vmem:[#allocation2 + $0x3c0] ss:$16 sps:$4 sm:$0xff]  }
 0x145   : > { %v9625_v40 = vadd.f32 %v2897_v39, %v2352_v38  ;;  %v2354_v41 = vpop.f32.mrf.mxu0  ;;  %3095 = vmatprep.mubr.bf16.mxu1 %v8717_v36  ;;  %v8741_v36 = vld [vmem:[#allocation2 + $0x3e4] ss:$16 sps:$4 sm:$0xff]   ;;  %v8744_v39 = vld [vmem:[#allocation2 + $0x3ec] ss:$16 sps:$4 sm:$0xff]  }
 0x146   : > { %v2899_v42 = vpop.f32.mrf.mxu1 }
 0x147   : > { %v2355_v43 = vpop.f32.mrf.mxu0 }
 0x148   : > { %v2900_v45 = vpop.f32.mrf.mxu1 }
 0x149   : > { %v9627_v48 = vadd.f32 %v2900_v45, %v2355_v43  ;;  %v2357_v49 = vpop.f32.mrf.mxu0 }
 0x14a   : > { %v2902_v51 = vpop.f32.mrf.mxu1  ;;  %v8739_v49 = vld [vmem:[#allocation2 + $0x3e0] ss:$16 sps:$4 sm:$0xff]  }
 0x14b   : > { %v2360_v52 = vpop.f32.mrf.mxu0  ;;  %2551 = vmatmul.mubr.bf16.gmra.mxu0 %v8719_v44  ;;  %v8742_v51 = vld [vmem:[#allocation2 + $0x3e8] ss:$16 sps:$4 sm:$0xff]  }
 0x14c   : > { %v2905_v53 = vpop.f32.mrf.mxu1  ;;  %3096 = vmatmul.mubr.bf16.gmra.mxu1 %v8720_v46  ;;  %2558 = vmatprep.mubr.bf16.mxu0 %v8723_v47 }
 0x14d   : > { %v9629_v54 = vadd.f32 %v2905_v53, %v2360_v52  ;;  %v2362_v55 = vpop.f32.mrf.mxu0  ;;  %3103 = vmatprep.mubr.bf16.mxu1 %v8726_v50  ;;  %v8747_v52 = vld [vmem:[#allocation2 + $0x404] ss:$16 sps:$4 sm:$0xff]  }
 0x14e   : > { %v2907_v56 = vpop.f32.mrf.mxu1 }
 0x14f   : > { %v2363_v57 = vpop.f32.mrf.mxu0  ;;  %v8750_v56 = vld [vmem:[#allocation2 + $0x40c] ss:$16 sps:$4 sm:$0xff]  }
 0x150   : > { %v2908_v59 = vpop.f32.mrf.mxu1 }
 0x151   : > { %v9631_v62 = vadd.f32 %v2908_v59, %v2363_v57  ;;  %v2365_v63 = vpop.f32.mrf.mxu0 }
 0x152   : > { %v2910_v2 = vpop.f32.mrf.mxu1 }
 0x153   : > { %v2368_v3 = vpop.f32.mrf.mxu0  ;;  %2559 = vmatmul.mubr.bf16.gmra.mxu0 %v8721_v58  ;;  %v8745_v2 = vld [vmem:[#allocation2 + $0x400] ss:$16 sps:$4 sm:$0xff]  }
 0x154   : > { %v2913_v4 = vpop.f32.mrf.mxu1  ;;  %3104 = vmatmul.mubr.bf16.gmra.mxu1 %v8724_v60  ;;  %2566 = vmatprep.mubr.bf16.mxu0 %v8729_v61 }
 0x155   : > { %v9640_v5 = vadd.f32 %v2913_v4, %v2368_v3  ;;  %v2370_v6 = vpop.f32.mrf.mxu0  ;;  %3111 = vmatprep.mubr.bf16.mxu1 %v8732_v1  ;;  %v8748_v4 = vld [vmem:[#allocation2 + $0x408] ss:$16 sps:$4 sm:$0xff]  }
 0x156   : > { %v2915_v9 = vpop.f32.mrf.mxu1  ;;  %v8753_v6 = vld [vmem:[#allocation2 + $0x424] ss:$16 sps:$4 sm:$0xff]  }
 0x157   : > { %v2371_v14 = vpop.f32.mrf.mxu0  ;;  %v8756_v9 = vld [vmem:[#allocation2 + $0x42c] ss:$16 sps:$4 sm:$0xff]  }
 0x158   : > { %v2916_v17 = vpop.f32.mrf.mxu1 }
 0x159   : > { %v9646_v21 = vadd.f32 %v2916_v17, %v2371_v14  ;;  %v2373_v22 = vpop.f32.mrf.mxu0  ;;  %v331_v17 = vld [vmem:[%s9638_s25 + $0x68] sm:$0xff] }
 0x15a   : > { %v2918_v24 = vpop.f32.mrf.mxu1  ;;  %v362_v22 = vld [vmem:[%s9638_s25 + $0x160] sm:$0xff] }
 0x15b   : > { %v2376_v25 = vpop.f32.mrf.mxu0  ;;  %2567 = vmatmul.mubr.bf16.gmra.mxu0 %v8727_v15 }
 0x15c   : > { %v2921_v27 = vpop.f32.mrf.mxu1  ;;  %3112 = vmatmul.mubr.bf16.gmra.mxu1 %v8730_v18  ;;  %2574 = vmatprep.mubr.bf16.mxu0 %v8735_v19  ;;  %v388_v19 = vpack.c.bf16 %v331_v17, %v330_v16 }
 0x15d   : > { %v9650_v28 = vadd.f32 %v2921_v27, %v2376_v25  ;;  %v2378_v29 = vpop.f32.mrf.mxu0  ;;  %3119 = vmatprep.mubr.bf16.mxu1 %v8738_v23  ;;  %v363_v23 = vld [vmem:[%s9638_s25 + $0x168] sm:$0xff]  ;;  %v8751_v25 = vld [vmem:[#allocation2 + $0x420] ss:$16 sps:$4 sm:$0xff]  }
 0x15e   : > { %v2923_v30 = vpop.f32.mrf.mxu1  ;;  %v404_v27 = vpack.c.bf16 %v363_v23, %v362_v22  ;;  %4675 = vmatpush1.bf16.msra.mxu0 %v388_v19  ;;  %v8769_v22 = vld [vmem:[#allocation2 + $0x480] ss:$16 sps:$4 sm:$0xff]  }
 0x15f   : > { %v2379_v31 = vpop.f32.mrf.mxu0  ;;  %v8754_v30 = vld [vmem:[#allocation2 + $0x428] ss:$16 sps:$4 sm:$0xff]   ;;  %4676 = vmatprep.subr.bf16.mxu0 %v9411_v0 }
 0x160   : > { %v2924_v33 = vpop.f32.mrf.mxu1  ;;  %5220 = vmatpush1.bf16.msra.mxu1 %v404_v27 }
 0x161   : > { %v9652_v37 = vadd.f32 %v2924_v33, %v2379_v31  ;;  %v2381_v38 = vpop.f32.mrf.mxu0  ;;  %v8759_v31 = vld [vmem:[#allocation2 + $0x444] ss:$16 sps:$4 sm:$0xff]   ;;  %5221 = vmatprep.subr.bf16.mxu1 %v9411_v0 }
 0x162   : > { %v2926_v41 = vpop.f32.mrf.mxu1 }
 0x163   : > { %v2384_v42 = vpop.f32.mrf.mxu0  ;;  %2575 = vmatmul.mubr.bf16.gmra.mxu0 %v8733_v32 }
 0x164   : > { %v2929_v43 = vpop.f32.mrf.mxu1  ;;  %3120 = vmatmul.mubr.bf16.gmra.mxu1 %v8736_v35  ;;  %2582 = vmatprep.mubr.bf16.mxu0 %v8741_v36  ;;  %v8762_v35 = vld [vmem:[#allocation2 + $0x44c] ss:$16 sps:$4 sm:$0xff]  }
 0x165   : > { %v9654_v44 = vadd.f32 %v2929_v43, %v2384_v42  ;;  %v2386_v45 = vpop.f32.mrf.mxu0  ;;  %3127 = vmatprep.mubr.bf16.mxu1 %v8744_v39 }
 0x166   : > { %v2931_v46 = vpop.f32.mrf.mxu1 }
 0x167   : > { %v2387_v47 = vpop.f32.mrf.mxu0  ;;  %v8757_v46 = vld [vmem:[#allocation2 + $0x440] ss:$16 sps:$4 sm:$0xff]  }
 0x168   : > { %v2932_v50 = vpop.f32.mrf.mxu1 }
 0x169   : > { %v9656_v53 = vadd.f32 %v2932_v50, %v2387_v47  ;;  %v2389_v55 = vpop.f32.mrf.mxu0  ;;  %v8765_v50 = vld [vmem:[#allocation2 + $0x464] ss:$16 sps:$4 sm:$0xff]  }
 0x16a   : > { %v2934_v57 = vpop.f32.mrf.mxu1  ;;  %v8768_v55 = vld [vmem:[#allocation2 + $0x46c] ss:$16 sps:$4 sm:$0xff]  }
 0x16b   : > { %v2392_v58 = vpop.f32.mrf.mxu0  ;;  %2583 = vmatmul.mubr.bf16.gmra.mxu0 %v8739_v49  ;;  %v8760_v49 = vld [vmem:[#allocation2 + $0x448] ss:$16 sps:$4 sm:$0xff]  }
 0x16c   : > { %v2937_v59 = vpop.f32.mrf.mxu1  ;;  %3128 = vmatmul.mubr.bf16.gmra.mxu1 %v8742_v51  ;;  %2590 = vmatprep.mubr.bf16.mxu0 %v8747_v52 }
 0x16d   : > { %v9658_v60 = vadd.f32 %v2937_v59, %v2392_v58  ;;  %v2394_v61 = vpop.f32.mrf.mxu0  ;;  %3135 = vmatprep.mubr.bf16.mxu1 %v8750_v56 }
 0x16e   : > { %v2939_v63 = vpop.f32.mrf.mxu1 }
 0x16f   : > { %v2395_v1 = vpop.f32.mrf.mxu0 }
 0x170   : > { %v2940_v3 = vpop.f32.mrf.mxu1 }
 0x171   : > { %v9660_v7 = vadd.f32 %v2940_v3, %v2395_v1  ;;  %v2397_v8 = vpop.f32.mrf.mxu0 }
 0x172   : > { %v2942_v10 = vpop.f32.mrf.mxu1 }
 0x173   : > { %v2400_v11 = vpop.f32.mrf.mxu0  ;;  %2591 = vmatmul.mubr.bf16.gmra.mxu0 %v8745_v2  ;;  %v8763_v2 = vld [vmem:[#allocation2 + $0x460] ss:$16 sps:$4 sm:$0xff]   ;;  %v8774_v10 = vld [vmem:[#allocation2 + $0x48c] ss:$16 sps:$4 sm:$0xff]  }
 0x174   : > { %v2945_v13 = vpop.f32.mrf.mxu1  ;;  %3136 = vmatmul.mubr.bf16.gmra.mxu1 %v8748_v4  ;;  %2598 = vmatprep.mubr.bf16.mxu0 %v8753_v6  ;;  %v8766_v4 = vld [vmem:[#allocation2 + $0x468] ss:$16 sps:$4 sm:$0xff]   ;;  %v8771_v6 = vld [vmem:[#allocation2 + $0x484] ss:$16 sps:$4 sm:$0xff]  }
 0x175   : > { %v9662_v14 = vadd.f32 %v2945_v13, %v2400_v11  ;;  %v2402_v15 = vpop.f32.mrf.mxu0  ;;  %3143 = vmatprep.mubr.bf16.mxu1 %v8756_v9 }
 0x176   : > { %v2947_v18 = vpop.f32.mrf.mxu1 }
 0x177   : > { %v2403_v24 = vpop.f32.mrf.mxu0 }
 0x178   : > { %v2948_v29 = vpop.f32.mrf.mxu1 }
 0x179   : > { %v9668_v32 = vadd.f32 %v2948_v29, %v2403_v24  ;;  %v2405_v33 = vpop.f32.mrf.mxu0  ;;  %v8772_v24 = vld [vmem:[#allocation2 + $0x488] ss:$16 sps:$4 sm:$0xff]  }
 0x17a   : > { %v2950_v36 = vpop.f32.mrf.mxu1 }
 0x17b   : > { %v2408_v38 = vpop.f32.mrf.mxu0  ;;  %2599 = vmatmul.mubr.bf16.gmra.mxu0 %v8751_v25  ;;  %v8777_v25 = vld [vmem:[#allocation2 + $0x4a4] ss:$16 sps:$4 sm:$0xff]  }
 0x17c   : > { %v2953_v39 = vpop.f32.mrf.mxu1  ;;  %3144 = vmatmul.mubr.bf16.gmra.mxu1 %v8754_v30  ;;  %2606 = vmatprep.mubr.bf16.mxu0 %v8759_v31  ;;  %v8780_v30 = vld [vmem:[#allocation2 + $0x4ac] ss:$16 sps:$4 sm:$0xff]  }
 0x17d   : > { %v9672_v41 = vadd.f32 %v2953_v39, %v2408_v38  ;;  %v2410_v42 = vpop.f32.mrf.mxu0  ;;  %3151 = vmatprep.mubr.bf16.mxu1 %v8762_v35  ;;  %v328_v39 = vld [vmem:[%s9638_s25 + $0x50] sm:$0xff] }
 0x17e   : > { %v2955_v43 = vpop.f32.mrf.mxu1  ;;  %v329_v42 = vld [vmem:[%s9638_s25 + $0x58] sm:$0xff] }
 0x17f   : > { %v2411_v45 = vpop.f32.mrf.mxu0 }
 0x180   : > { %v2956_v47 = vpop.f32.mrf.mxu1 }
 0x181   : > { %v9674_v51 = vadd.f32 %v2956_v47, %v2411_v45  ;;  %v2413_v52 = vpop.f32.mrf.mxu0  ;;  %v387_v45 = vpack.c.bf16 %v329_v42, %v328_v39  ;;  %v361_v47 = vld [vmem:[%s9638_s25 + $0x158] sm:$0xff]  ;;  %v8795_v42 = vld [vmem:[#allocation2 + $0x504] ss:$16 sps:$4 sm:$0xff]  }
 0x182   : > { %v2958_v56 = vpop.f32.mrf.mxu1  ;;  %v8790_v39 = vld [vmem:[#allocation2 + $0x4e8] ss:$16 sps:$4 sm:$0xff]  }
 0x183   : > { %v2416_v57 = vpop.f32.mrf.mxu0  ;;  %2607 = vmatmul.mubr.bf16.gmra.mxu0 %v8757_v46  ;;  %v360_v46 = vld [vmem:[%s9638_s25 + $0x150] sm:$0xff]  ;;  %v8778_v56 = vld [vmem:[#allocation2 + $0x4a8] ss:$16 sps:$4 sm:$0xff]  }
 0x184   : > { %v2961_v58 = vpop.f32.mrf.mxu1  ;;  %3152 = vmatmul.mubr.bf16.gmra.mxu1 %v8760_v49  ;;  %2614 = vmatprep.mubr.bf16.mxu0 %v8765_v50  ;;  %v8775_v50 = vld [vmem:[#allocation2 + $0x4a0] ss:$16 sps:$4 sm:$0xff]   ;;  %v403_v52 = vpack.c.bf16 %v361_v47, %v360_v46  ;;  %v8798_v46 = vld [vmem:[#allocation2 + $0x50c] ss:$16 sps:$4 sm:$0xff]  }
 0x185   : > { %v9676_v59 = vadd.f32 %v2961_v58, %v2416_v57  ;;  %v2418_v61 = vpop.f32.mrf.mxu0  ;;  %3159 = vmatprep.mubr.bf16.mxu1 %v8768_v55  ;;  %v8783_v57 = vld [vmem:[#allocation2 + $0x4c4] ss:$16 sps:$4 sm:$0xff]   ;;  %4677 = vmatpush1.bf16.msra.mxu0 %v387_v45 }
 0x186   : > { %v2963_v63 = vpop.f32.mrf.mxu1  ;;  %5222 = vmatpush1.bf16.msra.mxu1 %v403_v52  ;;  %4678 = vmatprep.subr.bf16.mxu0 %v9411_v0 }
 0x187   : > { %v2419_v1 = vpop.f32.mrf.mxu0  ;;  %v8786_v63 = vld [vmem:[#allocation2 + $0x4cc] ss:$16 sps:$4 sm:$0xff]   ;;  %5223 = vmatprep.subr.bf16.mxu1 %v9411_v0 }
 0x188   : > { %v2964_v3 = vpop.f32.mrf.mxu1 }
 0x189   : > { %v9678_v8 = vadd.f32 %v2964_v3, %v2419_v1  ;;  %v2421_v9 = vpop.f32.mrf.mxu0 }
 0x18a   : > { %v2966_v11 = vpop.f32.mrf.mxu1 }
 0x18b   : > { %v2424_v13 = vpop.f32.mrf.mxu0  ;;  %2615 = vmatmul.mubr.bf16.gmra.mxu0 %v8763_v2  ;;  %v8781_v11 = vld [vmem:[#allocation2 + $0x4c0] ss:$16 sps:$4 sm:$0xff]  }
 0x18c   : > { %v2969_v15 = vpop.f32.mrf.mxu1  ;;  %3160 = vmatmul.mubr.bf16.gmra.mxu1 %v8766_v4  ;;  %2622 = vmatprep.mubr.bf16.mxu0 %v8771_v6 }
 0x18d   : > { %v9680_v16 = vadd.f32 %v2969_v15, %v2424_v13  ;;  %v2426_v17 = vpop.f32.mrf.mxu0  ;;  %3167 = vmatprep.mubr.bf16.mxu1 %v8774_v10  ;;  %v8784_v15 = vld [vmem:[#allocation2 + $0x4c8] ss:$16 sps:$4 sm:$0xff]  }
 0x18e   : > { %v2971_v18 = vpop.f32.mrf.mxu1  ;;  %v8789_v17 = vld [vmem:[#allocation2 + $0x4e4] ss:$16 sps:$4 sm:$0xff]  }
 0x18f   : > { %v2427_v19 = vpop.f32.mrf.mxu0 }
 0x190   : > { %v2972_v23 = vpop.f32.mrf.mxu1 }
 0x191   : > { %v9682_v27 = vadd.f32 %v2972_v23, %v2427_v19  ;;  %v2429_v29 = vpop.f32.mrf.mxu0 }
 0x192   : > { %v2974_v31 = vpop.f32.mrf.mxu1 }
 0x193   : > { %v2432_v33 = vpop.f32.mrf.mxu0  ;;  %2623 = vmatmul.mubr.bf16.gmra.mxu0 %v8769_v22  ;;  %v8792_v22 = vld [vmem:[#allocation2 + $0x4ec] ss:$16 sps:$4 sm:$0xff]  }
 0x194   : > { %v2977_v35 = vpop.f32.mrf.mxu1  ;;  %3168 = vmatmul.mubr.bf16.gmra.mxu1 %v8772_v24  ;;  %2630 = vmatprep.mubr.bf16.mxu0 %v8777_v25 }
 0x195   : > { %v9684_v36 = vadd.f32 %v2977_v35, %v2432_v33  ;;  %v2434_v38 = vpop.f32.mrf.mxu0  ;;  %3175 = vmatprep.mubr.bf16.mxu1 %v8780_v30  ;;  %v8787_v35 = vld [vmem:[#allocation2 + $0x4e0] ss:$16 sps:$4 sm:$0xff]  }
 0x196   : > { %v2979_v43 = vpop.f32.mrf.mxu1 }
 0x197   : > { %v2435_v49 = vpop.f32.mrf.mxu0 }
 0x198   : > { %v2980_v55 = vpop.f32.mrf.mxu1 }
 0x199   : > { %v9690_v58 = vadd.f32 %v2980_v55, %v2435_v49  ;;  %v2437_v61 = vpop.f32.mrf.mxu0 }
 0x19a   : > { %v2982_v1 = vpop.f32.mrf.mxu1  ;;  %v8793_v61 = vld [vmem:[#allocation2 + $0x500] ss:$16 sps:$4 sm:$0xff]  }
 0x19b   : > { %v2440_v2 = vpop.f32.mrf.mxu0  ;;  %2631 = vmatmul.mubr.bf16.gmra.mxu0 %v8775_v50  ;;  %v8796_v1 = vld [vmem:[#allocation2 + $0x508] ss:$16 sps:$4 sm:$0xff]  }
 0x19c   : > { %v2985_v3 = vpop.f32.mrf.mxu1  ;;  %3176 = vmatmul.mubr.bf16.gmra.mxu1 %v8778_v56  ;;  %2638 = vmatprep.mubr.bf16.mxu0 %v8783_v57 }
 0x19d   : > { %v9694_v4 = vadd.f32 %v2985_v3, %v2440_v2  ;;  %v2442_v6 = vpop.f32.mrf.mxu0  ;;  %3183 = vmatprep.mubr.bf16.mxu1 %v8786_v63  ;;  %v8801_v2 = vld [vmem:[#allocation2 + $0x524] ss:$16 sps:$4 sm:$0xff]  }
 0x19e   : > { %v2987_v9 = vpop.f32.mrf.mxu1 }
 0x19f   : > { %v2443_v10 = vpop.f32.mrf.mxu0  ;;  %v8804_v9 = vld [vmem:[#allocation2 + $0x52c] ss:$16 sps:$4 sm:$0xff]  }
 0x1a0   : > { %v2988_v13 = vpop.f32.mrf.mxu1 }
 0x1a1   : > { %v9696_v18 = vadd.f32 %v2988_v13, %v2443_v10  ;;  %v2445_v19 = vpop.f32.mrf.mxu0 }
 0x1a2   : > { %v2990_v23 = vpop.f32.mrf.mxu1  ;;  %v326_v19 = vld [vmem:[%s9638_s25 + $0x40] sm:$0xff] }
 0x1a3   : > { %v2448_v24 = vpop.f32.mrf.mxu0  ;;  %2639 = vmatmul.mubr.bf16.gmra.mxu0 %v8781_v11 }
 0x1a4   : > { %v2993_v25 = vpop.f32.mrf.mxu1  ;;  %3184 = vmatmul.mubr.bf16.gmra.mxu1 %v8784_v15  ;;  %2646 = vmatprep.mubr.bf16.mxu0 %v8789_v17 }
 0x1a5   : > { %v9698_v29 = vadd.f32 %v2993_v25, %v2448_v24  ;;  %v2450_v30 = vpop.f32.mrf.mxu0  ;;  %3191 = vmatprep.mubr.bf16.mxu1 %v8792_v22  ;;  %v327_v22 = vld [vmem:[%s9638_s25 + $0x48] sm:$0xff]  ;;  %v358_v25 = vld [vmem:[%s9638_s25 + $0x140] sm:$0xff] }
 0x1a6   : > { %v2995_v31 = vpop.f32.mrf.mxu1  ;;  %v386_v24 = vpack.c.bf16 %v327_v22, %v326_v19  ;;  %v359_v30 = vld [vmem:[%s9638_s25 + $0x148] sm:$0xff]  ;;  %v324_v19 = vld [vmem:[%s9638_s25 + $0x30] sm:$0xff] }
 0x1a7   : > { %v2451_v33 = vpop.f32.mrf.mxu0 }
 0x1a8   : > { %v2996_v38 = vpop.f32.mrf.mxu1  ;;  %4679 = vmatpush1.bf16.msra.mxu0 %v386_v24  ;;  %v356_v24 = vld [vmem:[%s9638_s25 + $0x130] sm:$0xff] }
 0x1a9   : > { %v9700_v43 = vadd.f32 %v2996_v38, %v2451_v33  ;;  %v2453_v45 = vpop.f32.mrf.mxu0  ;;  %v8799_v33 = vld [vmem:[#allocation2 + $0x520] ss:$16 sps:$4 sm:$0xff]   ;;  %4680 = vmatprep.subr.bf16.mxu0 %v9411_v0 }
 0x1aa   : > { %v2998_v47 = vpop.f32.mrf.mxu1 }
 0x1ab   : > { %v2456_v49 = vpop.f32.mrf.mxu0  ;;  %2647 = vmatmul.mubr.bf16.gmra.mxu0 %v8787_v35  ;;  %v402_v35 = vpack.c.bf16 %v359_v30, %v358_v25  ;;  %v8810_v47 = vld [vmem:[#allocation2 + $0x54c] ss:$16 sps:$4 sm:$0xff]  }
 0x1ac   : > { %v3001_v50 = vpop.f32.mrf.mxu1  ;;  %3192 = vmatmul.mubr.bf16.gmra.mxu1 %v8790_v39  ;;  %2654 = vmatprep.mubr.bf16.mxu0 %v8795_v42  ;;  %v8802_v39 = vld [vmem:[#allocation2 + $0x528] ss:$16 sps:$4 sm:$0xff]   ;;  %v8807_v42 = vld [vmem:[#allocation2 + $0x544] ss:$16 sps:$4 sm:$0xff]  }
 0x1ad   : > { %v9702_v52 = vadd.f32 %v3001_v50, %v2456_v49  ;;  %v2458_v55 = vpop.f32.mrf.mxu0  ;;  %3199 = vmatprep.mubr.bf16.mxu1 %v8798_v46  ;;  %5224 = vmatpush1.bf16.msra.mxu1 %v402_v35  ;;  %v357_v25 = vld [vmem:[%s9638_s25 + $0x138] sm:$0xff] }
 0x1ae   : > { %v3003_v56 = vpop.f32.mrf.mxu1  ;;  %5225 = vmatprep.subr.bf16.mxu1 %v9411_v0 }
 0x1af   : > { %v2459_v57 = vpop.f32.mrf.mxu0 }
 0x1b0   : > { %v3004_v63 = vpop.f32.mrf.mxu1 }
 0x1b1   : > { %v9704_v3 = vadd.f32 %v3004_v63, %v2459_v57  ;;  %v2461_v6 = vpop.f32.mrf.mxu0 }
 0x1b2   : > { %v3006_v10 = vpop.f32.mrf.mxu1  ;;  %v8808_v6 = vld [vmem:[#allocation2 + $0x548] ss:$16 sps:$4 sm:$0xff]  }
 0x1b3   : > { %v2464_v11 = vpop.f32.mrf.mxu0  ;;  %2655 = vmatmul.mubr.bf16.gmra.mxu0 %v8793_v61 }
 0x1b4   : > { %v3009_v13 = vpop.f32.mrf.mxu1  ;;  %3200 = vmatmul.mubr.bf16.gmra.mxu1 %v8796_v1  ;;  %2662 = vmatprep.mubr.bf16.mxu0 %v8801_v2  ;;  %v8805_v1 = vld [vmem:[#allocation2 + $0x540] ss:$16 sps:$4 sm:$0xff]  }
 0x1b5   : > { %v9706_v15 = vadd.f32 %v3009_v13, %v2464_v11  ;;  %v2466_v17 = vpop.f32.mrf.mxu0  ;;  %3207 = vmatprep.mubr.bf16.mxu1 %v8804_v9  ;;  %v8813_v9 = vld [vmem:[#allocation2 + $0x564] ss:$16 sps:$4 sm:$0xff]   ;;  %v8816_v13 = vld [vmem:[#allocation2 + $0x56c] ss:$16 sps:$4 sm:$0xff]  }
 0x1b6   : > { %v3011_v23 = vpop.f32.mrf.mxu1 }
 0x1b7   : > { %v2467_v31 = vpop.f32.mrf.mxu0  ;;  %v325_v23 = vld [vmem:[%s9638_s25 + $0x38] sm:$0xff] }
 0x1b8   : > { %v3012_v38 = vpop.f32.mrf.mxu1 }
 0x1b9   : > { %v9712_v45 = vadd.f32 %v3012_v38, %v2467_v31  ;;  %v2469_v46 = vpop.f32.mrf.mxu0  ;;  %v385_v31 = vpack.c.bf16 %v325_v23, %v324_v19  ;;  %v352_v23 = vld [vmem:[%s9638_s25 + $0x110] sm:$0xff] }
 0x1ba   : > { %v3014_v49 = vpop.f32.mrf.mxu1  ;;  %v323_v46 = vld [vmem:[%s9638_s25 + $0x28] sm:$0xff] }
 0x1bb   : > { %v2472_v50 = vpop.f32.mrf.mxu0  ;;  %2663 = vmatmul.mubr.bf16.gmra.mxu0 %v8799_v33  ;;  %v401_v33 = vpack.c.bf16 %v357_v25, %v356_v24  ;;  %v353_v24 = vld [vmem:[%s9638_s25 + $0x118] sm:$0xff] }
 0x1bc   : > { %v3017_v55 = vpop.f32.mrf.mxu1  ;;  %3208 = vmatmul.mubr.bf16.gmra.mxu1 %v8802_v39  ;;  %2670 = vmatprep.mubr.bf16.mxu0 %v8807_v42  ;;  %v322_v42 = vld [vmem:[%s9638_s25 + $0x20] sm:$0xff] }
 0x1bd   : > { %v9716_v56 = vadd.f32 %v3017_v55, %v2472_v50  ;;  %v2474_v57 = vpop.f32.mrf.mxu0  ;;  %3215 = vmatprep.mubr.bf16.mxu1 %v8810_v47  ;;  %4681 = vmatpush1.bf16.msra.mxu0 %v385_v31  ;;  %v354_v47 = vld [vmem:[%s9638_s25 + $0x120] sm:$0xff]  ;;  %v384_v55 = vpack.c.bf16 %v323_v46, %v322_v42  ;;  %v399_v31 = vpack.c.bf16 %v353_v24, %v352_v23  ;;  %v319_v46 = vld [vmem:[%s9638_s25 + $0x8] sm:$0xff]  ;;  %v349_v23 = vld [vmem:[%s9638_s25 + $0xf8] sm:$0xff] }
 0x1be   : > { %v3019_v61 = vpop.f32.mrf.mxu1  ;;  %5226 = vmatpush1.bf16.msra.mxu1 %v401_v33  ;;  %v8811_v50 = vld [vmem:[#allocation2 + $0x560] ss:$16 sps:$4 sm:$0xff]   ;;  %4682 = vmatprep.subr.bf16.mxu0 %v9411_v0  ;;  %v355_v57 = vld [vmem:[%s9638_s25 + $0x128] sm:$0xff] }
 0x1bf   : > { %v2475_v63 = vpop.f32.mrf.mxu0  ;;  %5227 = vmatprep.subr.bf16.mxu1 %v9411_v0  ;;  %v318_v42 = vld [vmem:[%s9638_s25] sm:$0xff]  ;;  %v380_v24 = vld [vmem:[%s9638_s25 + $0x1f0] sm:$0xff] }
 0x1c0   : > { %v3020_v2 = vpop.f32.mrf.mxu1 }
 0x1c1   : > { %v9718_v10 = vadd.f32 %v3020_v2, %v2475_v63  ;;  %v2477_v11 = vpop.f32.mrf.mxu0  ;;  %v8814_v63 = vld [vmem:[#allocation2 + $0x568] ss:$16 sps:$4 sm:$0xff]   ;;  %v400_v2 = vpack.c.bf16 %v355_v57, %v354_v47  ;;  %4683 = vmatpush1.bf16.msra.mxu0 %v384_v55  ;;  %v350_v47 = vld [vmem:[%s9638_s25 + $0x100] sm:$0xff]  ;;  %v382_v55 = vpack.c.bf16 %v319_v46, %v318_v42 }
 0x1c2   : > { %v3022_v17 = vpop.f32.mrf.mxu1  ;;  %v8822_v11 = vld [vmem:[#allocation2 + $0x58c] ss:$16 sps:$4 sm:$0xff]   ;;  %4684 = vmatprep.subr.bf16.mxu0 %v9411_v0 }
 0x1c3   : > { %v2480_v22 = vpop.f32.mrf.mxu0  ;;  %2671 = vmatmul.mubr.bf16.gmra.mxu0 %v8805_v1  ;;  %v8819_v1 = vld [vmem:[#allocation2 + $0x584] ss:$16 sps:$4 sm:$0xff]   ;;  %5228 = vmatpush1.bf16.msra.mxu1 %v400_v2  ;;  %v351_v57 = vld [vmem:[%s9638_s25 + $0x108] sm:$0xff] }
 0x1c4   : > { %v3025_v30 = vpop.f32.mrf.mxu1  ;;  %3216 = vmatmul.mubr.bf16.gmra.mxu1 %v8808_v6  ;;  %2678 = vmatprep.mubr.bf16.mxu0 %v8813_v9  ;;  %v320_v17 = vld [vmem:[%s9638_s25 + $0x10] sm:$0xff]  ;;  %v398_v2 = vpack.c.bf16 %v351_v57, %v350_v47  ;;  %v346_v47 = vld [vmem:[%s9638_s25 + $0xe0] sm:$0xff] }
 0x1c5   : > { %v9724_v35 = vadd.f32 %v3025_v30, %v2480_v22  ;;  %v2482_v38 = vpop.f32.mrf.mxu0  ;;  %3223 = vmatprep.mubr.bf16.mxu1 %v8816_v13  ;;  %v321_v22 = vld [vmem:[%s9638_s25 + $0x18] sm:$0xff]  ;;  %5229 = vmatprep.subr.bf16.mxu1 %v9411_v0  ;;  %v8823_v57 = vld [vmem:[#allocation2 + $0x5a0] ss:$16 sps:$4 sm:$0xff]  }
 0x1c6   : > { %v3027_v39 = vpop.f32.mrf.mxu1  ;;  %v383_v30 = vpack.c.bf16 %v321_v22, %v320_v17 }
 0x1c7   : > { %v2483_v49 = vpop.f32.mrf.mxu0  ;;  %5230 = vmatpush1.bf16.msra.mxu1 %v399_v31 }
 0x1c8   : > { %v3028_v61 = vpop.f32.mrf.mxu1  ;;  %4685 = vmatpush1.bf16.msra.mxu0 %v383_v30  ;;  %5231 = vmatprep.subr.bf16.mxu1 %v9411_v0 }
 0x1c9   : > { %v9732_v6 = vadd.f32 %v3028_v61, %v2483_v49  ;;  %v2485_v9 = vpop.f32.mrf.mxu0  ;;  %4686 = vmatprep.subr.bf16.mxu0 %v9411_v0 }
 0x1ca   : > { %v3030_v13 = vpop.f32.mrf.mxu1 }
 0x1cb   : > { %v2488_v19 = vpop.f32.mrf.mxu0  ;;  %2679 = vmatmul.mubr.bf16.gmra.mxu0 %v8811_v50  ;;  %v8817_v50 = vld [vmem:[#allocation2 + $0x580] ss:$16 sps:$4 sm:$0xff]   ;;  %v8828_v13 = vld [vmem:[#allocation2 + $0x5ac] ss:$16 sps:$4 sm:$0xff]   ;;  %5232 = vmatpush1.bf16.msra.mxu1 %v398_v2  ;;  %v8826_v2 = vld [vmem:[#allocation2 + $0x5a8] ss:$16 sps:$4 sm:$0xff]  }
 0x1cc   : > { %v3033_v25 = vpop.f32.mrf.mxu1  ;;  %3224 = vmatmul.mubr.bf16.gmra.mxu1 %v8814_v63  ;;  %2686 = vmatprep.mubr.bf16.mxu0 %v8819_v1  ;;  %v8820_v63 = vld [vmem:[#allocation2 + $0x588] ss:$16 sps:$4 sm:$0xff]   ;;  %v8825_v1 = vld [vmem:[#allocation2 + $0x5a4] ss:$16 sps:$4 sm:$0xff]  }
 0x1cd   : > { %v9739_v33 = vadd.f32 %v3033_v25, %v2488_v19  ;;  %v2490_v38 = vpop.f32.mrf.mxu0  ;;  %3231 = vmatprep.mubr.bf16.mxu1 %v8822_v11  ;;  %4687 = vmatpush1.bf16.msra.mxu0 %v382_v55  ;;  %v348_v19 = vld [vmem:[%s9638_s25 + $0xf0] sm:$0xff]  ;;  %v381_v25 = vld [vmem:[%s9638_s25 + $0x1f8] sm:$0xff] }
 0x1ce   : > { %v3035_v39 = vpop.f32.mrf.mxu1  ;;  %4688 = vmatprep.subr.bf16.mxu0 %v9411_v0  ;;  %v397_v31 = vpack.c.bf16 %v349_v23, %v348_v19  ;;  %v413_v38 = vpack.c.bf16 %v381_v25, %v380_v24  ;;  %5233 = vmatprep.subr.bf16.mxu1 %v9411_v0  ;;  %v344_v24 = vld [vmem:[%s9638_s25 + $0xd0] sm:$0xff] }
 0x1cf   : > { %v2491_v49 = vpop.f32.mrf.mxu0 }
 0x1d0   : > { %v3036_v61 = vpop.f32.mrf.mxu1  ;;  %5234 = vmatpush2.bf16.msra.mxu1 %v413_v38  ;;  %v377_v38 = vld [vmem:[%s9638_s25 + $0x1d8] sm:$0xff] }
 0x1d1   : > { %v9748_v9 = vadd.f32 %v3036_v61, %v2491_v49  ;;  %v2493_v11 = vpop.f32.mrf.mxu0  ;;  %4689 = vmatpush2.bf16.msra.mxu0 %v397_v31  ;;  %v347_v49 = vld [vmem:[%s9638_s25 + $0xe8] sm:$0xff]  ;;  %5235 = vmatprep.subr.bf16.mxu1 %v9411_v0  ;;  %v376_v31 = vld [vmem:[%s9638_s25 + $0x1d0] sm:$0xff] }
 0x1d2   : > { %v3038_v17 = vpop.f32.mrf.mxu1  ;;  %4690 = vmatprep.subr.bf16.mxu0 %v9411_v0  ;;  %v396_v61 = vpack.c.bf16 %v347_v49, %v346_v47  ;;  %v8831_v11 = vld [vmem:[#allocation2 + $0x5c4] ss:$16 sps:$4 sm:$0xff]   ;;  %v411_v47 = vpack.c.bf16 %v377_v38, %v376_v31  ;;  %v8840_v31 = vld [vmem:[#allocation2 + $0x5ec] ss:$16 sps:$4 sm:$0xff]  }
 0x1d3   : > { %v2496_v22 = vpop.f32.mrf.mxu0  ;;  %2687 = vmatmul.mubr.bf16.gmra.mxu0 %v8817_v50  ;;  %v378_v50 = vld [vmem:[%s9638_s25 + $0x1e0] sm:$0xff] }
 0x1d4   : > { %v3041_v30 = vpop.f32.mrf.mxu1  ;;  %3232 = vmatmul.mubr.bf16.gmra.mxu1 %v8820_v63  ;;  %2694 = vmatprep.mubr.bf16.mxu0 %v8825_v1  ;;  %v379_v63 = vld [vmem:[%s9638_s25 + $0x1e8] sm:$0xff] }
 0x1d5   : > { %v9755_v39 = vadd.f32 %v3041_v30, %v2496_v22  ;;  %v2498_v42 = vpop.f32.mrf.mxu0  ;;  %3239 = vmatprep.mubr.bf16.mxu1 %v8828_v13  ;;  %v412_v13 = vpack.c.bf16 %v379_v63, %v378_v50  ;;  %v8834_v22 = vld [vmem:[#allocation2 + $0x5cc] ss:$16 sps:$4 sm:$0xff]   ;;  %4691 = vmatpush2.bf16.msra.mxu0 %v396_v61  ;;  %v374_v63 = vld [vmem:[%s9638_s25 + $0x1c0] sm:$0xff] }
 0x1d6   : > { %v3043_v46 = vpop.f32.mrf.mxu1  ;;  %4692 = vmatprep.subr.bf16.mxu0 %v9411_v0  ;;  %v345_v30 = vld [vmem:[%s9638_s25 + $0xd8] sm:$0xff]  ;;  %v343_v61 = vld [vmem:[%s9638_s25 + $0xc8] sm:$0xff] }
 0x1d7   : > { %v2499_v55 = vpop.f32.mrf.mxu0  ;;  %5236 = vmatpush2.bf16.msra.mxu1 %v412_v13  ;;  %v395_v46 = vpack.c.bf16 %v345_v30, %v344_v24  ;;  %v8829_v13 = vld [vmem:[#allocation2 + $0x5c0] ss:$16 sps:$4 sm:$0xff]  }
 0x1d8   : > { %v3044_v1 = vpop.f32.mrf.mxu1  ;;  %5237 = vmatprep.subr.bf16.mxu1 %v9411_v0 }
 0x1d9   : > { %v9764_v17 = vadd.f32 %v3044_v1, %v2499_v55  ;;  %v2501_v19 = vpop.f32.mrf.mxu0  ;;  %4693 = vmatpush2.bf16.msra.mxu0 %v395_v46 }
 0x1da   : > { %v3046_v23 = vpop.f32.mrf.mxu1  ;;  %4694 = vmatprep.subr.bf16.mxu0 %v9411_v0 }
 0x1db   : > { %v2504_v25 = vpop.f32.mrf.mxu0  ;;  %2695 = vmatmul.mubr.bf16.gmra.mxu0 %v8823_v57  ;;  %5238 = vmatpush2.bf16.msra.mxu1 %v411_v47  ;;  %v342_v57 = vld [vmem:[%s9638_s25 + $0xc0] sm:$0xff]  ;;  %v341_v47 = vld [vmem:[%s9638_s25 + $0xb8] sm:$0xff] }
 0x1dc   : > { %v3049_v42 = vpop.f32.mrf.mxu1  ;;  %3240 = vmatmul.mubr.bf16.gmra.mxu1 %v8826_v2  ;;  %2702 = vmatprep.mubr.bf16.mxu0 %v8831_v11  ;;  %v394_v2 = vpack.c.bf16 %v343_v61, %v342_v57  ;;  %v375_v11 = vld [vmem:[%s9638_s25 + $0x1c8] sm:$0xff]  ;;  %v8837_v23 = vld [vmem:[#allocation2 + $0x5e4] ss:$16 sps:$4 sm:$0xff]  }
 0x1dd   : > { %v9771_v49 = vadd.f32 %v3049_v42, %v2504_v25  ;;  %v2506_v50 = vpop.f32.mrf.mxu0  ;;  %3247 = vmatprep.mubr.bf16.mxu1 %v8834_v22  ;;  %5239 = vmatprep.subr.bf16.mxu1 %v9411_v0  ;;  %v8832_v22 = vld [vmem:[#allocation2 + $0x5c8] ss:$16 sps:$4 sm:$0xff]   ;;  %v410_v24 = vpack.c.bf16 %v375_v11, %v374_v63  ;;  %v340_v42 = vld [vmem:[%s9638_s25 + $0xb0] sm:$0xff]  ;;  %v338_v11 = vld [vmem:[%s9638_s25 + $0xa0] sm:$0xff] }
 0x1de   : > { %v3051_v55 = vpop.f32.mrf.mxu1  ;;  %4695 = vmatpush2.bf16.msra.mxu0 %v394_v2  ;;  %v372_v50 = vld [vmem:[%s9638_s25 + $0x1b0] sm:$0xff]  ;;  %v393_v61 = vpack.c.bf16 %v341_v47, %v340_v42  ;;  %v8838_v42 = vld [vmem:[#allocation2 + $0x5e8] ss:$16 sps:$4 sm:$0xff]  }
 0x1df   : > { %v2507_v1 = vpop.f32.mrf.mxu0  ;;  %5240 = vmatpush2.bf16.msra.mxu1 %v410_v24  ;;  %4696 = vmatprep.subr.bf16.mxu0 %v9411_v0  ;;  %v373_v55 = vld [vmem:[%s9638_s25 + $0x1b8] sm:$0xff]  ;;  %v370_v24 = vld [vmem:[%s9638_s25 + $0x1a0] sm:$0xff] }
 0x1e0   : > { %v3052_v19 = vpop.f32.mrf.mxu1  ;;  %v409_v63 = vpack.c.bf16 %v373_v55, %v372_v50  ;;  %5241 = vmatprep.subr.bf16.mxu1 %v9411_v0 }
 0x1e1   : > { %v9780_v25 = vadd.f32 %v3052_v19, %v2507_v1  ;;  %v2509_v30 = vpop.f32.mrf.mxu0  ;;  %v339_v19 = vld [vmem:[%s9638_s25 + $0xa8] sm:$0xff] }
 0x1e2   : > { %v3054_v38 = vpop.f32.mrf.mxu1  ;;  %4697 = vmatpush2.bf16.msra.mxu0 %v393_v61 }
 0x1e3   : > { %v2512_v46 = vpop.f32.mrf.mxu0  ;;  %2703 = vmatmul.mubr.bf16.gmra.mxu0 %v8829_v13  ;;  %5242 = vmatpush2.bf16.msra.mxu1 %v409_v63  ;;  %v8835_v38 = vld [vmem:[#allocation2 + $0x5e0] ss:$16 sps:$4 sm:$0xff]  }
 0x1e4   : > { %v3057_v57 = vpop.f32.mrf.mxu1  ;;  %3248 = vmatmul.mubr.bf16.gmra.mxu1 %v8832_v22  ;;  %2710 = vmatprep.mubr.bf16.mxu0 %v8837_v23  ;;  %v392_v22 = vpack.c.bf16 %v339_v19, %v338_v11  ;;  %v371_v23 = vld [vmem:[%s9638_s25 + $0x1a8] sm:$0xff]  ;;  %v336_v63 = vld [vmem:[%s9638_s25 + $0x90] sm:$0xff]  ;;  %v369_v19 = vld [vmem:[%s9638_s25 + $0x198] sm:$0xff] }
 0x1e5   : > { %v9787_v1 = vadd.f32 %v3057_v57, %v2512_v46  ;;  %v2514_v2 = vpop.f32.mrf.mxu0  ;;  %3255 = vmatprep.mubr.bf16.mxu1 %v8840_v31  ;;  %4698 = vmatprep.subr.bf16.mxu0 %v9411_v0  ;;  %v8843_v46 = vld [vmem:[#allocation2 + $0x604] ss:$16 sps:$4 sm:$0xff]   ;;  %v408_v47 = vpack.c.bf16 %v371_v23, %v370_v24  ;;  %v8846_v57 = vld [vmem:[#allocation2 + $0x60c] ss:$16 sps:$4 sm:$0xff]  }
 0x1e6   : > { %v3059_v13 = vpop.f32.mrf.mxu1  ;;  %5243 = vmatprep.subr.bf16.mxu1 %v9411_v0  ;;  %4699 = vmatpush2.bf16.msra.mxu0 %v392_v22  ;;  %v368_v11 = vld [vmem:[%s9638_s25 + $0x190] sm:$0xff] }
 0x1e7   : > { %11683 = vst [vmem:[#allocation8_spill] sm:$0xff] %v9787_v1  ;;  %v2515_v30 = vpop.f32.mrf.mxu0  ;;  %5244 = vmatpush2.bf16.msra.mxu1 %v408_v47  ;;  %4700 = vmatprep.subr.bf16.mxu0 %v9411_v0  ;;  %v337_v13 = vld [vmem:[%s9638_s25 + $0x98] sm:$0xff]  ;;  %v335_v47 = vld [vmem:[%s9638_s25 + $0x88] sm:$0xff] }
 0x1e8   : > { %v3060_v31 = vpop.f32.mrf.mxu1  ;;  %v391_v24 = vpack.c.bf16 %v337_v13, %v336_v63  ;;  %5245 = vmatprep.subr.bf16.mxu1 %v9411_v0  ;;  %v8844_v63 = vld [vmem:[#allocation2 + $0x608] ss:$16 sps:$4 sm:$0xff]  }
 0x1e9   : > { %v9796_v50 = vadd.f32 %v3060_v31, %v2515_v30  ;;  %v2517_v55 = vpop.f32.mrf.mxu0  ;;  %v407_v30 = vpack.c.bf16 %v369_v19, %v368_v11  ;;  %v334_v31 = vld [vmem:[%s9638_s25 + $0x80] sm:$0xff]  ;;  %v8852_v19 = vld [vmem:[#allocation2 + $0x62c] ss:$16 sps:$4 sm:$0xff]  }
 0x1ea   : > { %v3062_v61 = vpop.f32.mrf.mxu1  ;;  %4701 = vmatpush2.bf16.msra.mxu0 %v391_v24  ;;  %v366_v55 = vld [vmem:[%s9638_s25 + $0x180] sm:$0xff] }
 0x1eb   : > { %11684 = vst [vmem:[#allocation9_spill] sm:$0xff] %v9796_v50  ;;  %v2520_v2 = vpop.f32.mrf.mxu0  ;;  %2711 = vmatmul.mubr.bf16.gmra.mxu0 %v8835_v38  ;;  %5246 = vmatpush2.bf16.msra.mxu1 %v407_v30  ;;  %v8841_v50 = vld [vmem:[#allocation2 + $0x600] ss:$16 sps:$4 sm:$0xff]  }
 0x1ec   : > { %v3065_v1 = vpop.f32.mrf.mxu1  ;;  %3256 = vmatmul.mubr.bf16.gmra.mxu1 %v8838_v42  ;;  %2718 = vmatprep.mubr.bf16.mxu0 %v8843_v46  ;;  %v390_v42 = vpack.c.bf16 %v335_v47, %v334_v31  ;;  %v367_v46 = vld [vmem:[%s9638_s25 + $0x188] sm:$0xff] }
 0x1ed   : > { %v9803_v23 = vadd.f32 %v3065_v1, %v2520_v2  ;;  %v2522_v22 = vpop.f32.mrf.mxu0  ;;  %3263 = vmatprep.mubr.bf16.mxu1 %v8846_v57  ;;  %4702 = vmatprep.subr.bf16.mxu0 %v9411_v0  ;;  %v8849_v2 = vld [vmem:[#allocation2 + $0x624] ss:$16 sps:$4 sm:$0xff]   ;;  %v406_v57 = vpack.c.bf16 %v367_v46, %v366_v55 }
 0x1ee   : > { %v3067_v38 = vpop.f32.mrf.mxu1  ;;  %5247 = vmatprep.subr.bf16.mxu1 %v9411_v0  ;;  %4703 = vmatpush2.bf16.msra.mxu0 %v390_v42  ;;  %v8855_v46 = vld [vmem:[#allocation2 + $0x644] ss:$16 sps:$4 sm:$0xff]   ;;  %v8858_v42 = vld [vmem:[#allocation2 + $0x64c] ss:$16 sps:$4 sm:$0xff]  }
 0x1ef   : > { %11685 = vst [vmem:[#allocation10_spill] sm:$0xff] %v9803_v23  ;;  %v2523_v61 = vpop.f32.mrf.mxu0  ;;  %5248 = vmatpush2.bf16.msra.mxu1 %v406_v57  ;;  %v8847_v23 = vld [vmem:[#allocation2 + $0x620] ss:$16 sps:$4 sm:$0xff]  }
 0x1f0   : > { %v3068_v1 = vpop.f32.mrf.mxu1 }
 0x1f1   : > { %v9812_v13 = vadd.f32 %v3068_v1, %v2523_v61  ;;  %v2525_v11 = vpop.f32.mrf.mxu0  ;;  %v8850_v61 = vld [vmem:[#allocation2 + $0x628] ss:$16 sps:$4 sm:$0xff]  }
 0x1f2   : > { %v3070_v24 = vpop.f32.mrf.mxu1 }
 0x1f3   : > { %v2528_v30 = vpop.f32.mrf.mxu0  ;;  %2719 = vmatmul.mubr.bf16.gmra.mxu0 %v8841_v50 }
 0x1f4   : > { %v3073_v22 = vpop.f32.mrf.mxu1  ;;  %3264 = vmatmul.mubr.bf16.gmra.mxu1 %v8844_v63  ;;  %2726 = vmatprep.mubr.bf16.mxu0 %v8849_v2 }
 0x1f5   : > { %v9814_v38 = vadd.f32 %v3073_v22, %v2528_v30  ;;  %v2530_v0 = vpop.f32.mrf.mxu0  ;;  %3271 = vmatprep.mubr.bf16.mxu1 %v8852_v19  ;;  %v8853_v22 = vld [vmem:[#allocation2 + $0x640] ss:$16 sps:$4 sm:$0xff]  }
 0x1f6   : > { %v3075_v31 = vpop.f32.mrf.mxu1 }
 0x1f7   : > { %11686 = vst [vmem:[#allocation11_spill] sm:$0xff] %v9814_v38  ;;  %v2531_v47 = vpop.f32.mrf.mxu0  ;;  %v8856_v31 = vld [vmem:[#allocation2 + $0x648] ss:$16 sps:$4 sm:$0xff]   ;;  %v8861_v38 = vld [vmem:[#allocation2 + $0x664] ss:$16 sps:$4 sm:$0xff]  }
 0x1f8   : > { %v3076_v55 = vpop.f32.mrf.mxu1 }
 0x1f9   : > { %v9816_v1 = vadd.f32 %v3076_v55, %v2531_v47  ;;  %v2533_v11 = vpop.f32.mrf.mxu0 }
 0x1fa   : > { %v3078_v57 = vpop.f32.mrf.mxu1  ;;  %v8864_v11 = vld [vmem:[#allocation2 + $0x66c] ss:$16 sps:$4 sm:$0xff]  }
 0x1fb   : > { %11687 = vst [vmem:[#allocation12_spill] sm:$0xff] %v9816_v1  ;;  %v2536_v24 = vpop.f32.mrf.mxu0  ;;  %2727 = vmatmul.mubr.bf16.gmra.mxu0 %v8847_v23 }
 0x1fc   : > { %v3081_v50 = vpop.f32.mrf.mxu1  ;;  %3272 = vmatmul.mubr.bf16.gmra.mxu1 %v8850_v61  ;;  %2734 = vmatprep.mubr.bf16.mxu0 %v8855_v46 }
 0x1fd   : > { %v9818_v63 = vadd.f32 %v3081_v50, %v2536_v24  ;;  %v2538_v2 = vpop.f32.mrf.mxu0  ;;  %3279 = vmatprep.mubr.bf16.mxu1 %v8858_v42  ;;  %v8859_v50 = vld [vmem:[#allocation2 + $0x660] ss:$16 sps:$4 sm:$0xff]  }
 0x1fe   : > { %v3083_v19 = vpop.f32.mrf.mxu1 }
 0x1ff   : > { %11688 = vst [vmem:[#allocation13_spill] sm:$0xff] %v9818_v63  ;;  %v2539_v30 = vpop.f32.mrf.mxu0  ;;  %v8862_v19 = vld [vmem:[#allocation2 + $0x668] ss:$16 sps:$4 sm:$0xff]   ;;  %v8867_v63 = vld [vmem:[#allocation2 + $0x684] ss:$16 sps:$4 sm:$0xff]  }
 0x200   : > { %v3084_v0 = vpop.f32.mrf.mxu1 }
 0x201   : > { %v9820_v47 = vadd.f32 %v3084_v0, %v2539_v30  ;;  %v2541_v55 = vpop.f32.mrf.mxu0 }
 0x202   : > { %v3086_v57 = vpop.f32.mrf.mxu1  ;;  %v8870_v55 = vld [vmem:[#allocation2 + $0x68c] ss:$16 sps:$4 sm:$0xff]  }
 0x203   : > { %11689 = vst [vmem:[#allocation14_spill] sm:$0xff] %v9820_v47  ;;  %v2544_v1 = vpop.f32.mrf.mxu0  ;;  %2735 = vmatmul.mubr.bf16.gmra.mxu0 %v8853_v22 }
 0x204   : > { %v3089_v23 = vpop.f32.mrf.mxu1  ;;  %3280 = vmatmul.mubr.bf16.gmra.mxu1 %v8856_v31  ;;  %2742 = vmatprep.mubr.bf16.mxu0 %v8861_v38 }
 0x205   : > { %v9822_v61 = vadd.f32 %v3089_v23, %v2544_v1  ;;  %v2546_v46 = vpop.f32.mrf.mxu0  ;;  %3287 = vmatprep.mubr.bf16.mxu1 %v8864_v11  ;;  %v8865_v23 = vld [vmem:[#allocation2 + $0x680] ss:$16 sps:$4 sm:$0xff]  }
 0x206   : > { %v3091_v42 = vpop.f32.mrf.mxu1 }
 0x207   : > { %11690 = vst [vmem:[#allocation15_spill] sm:$0xff] %v9822_v61  ;;  %v2547_v24 = vpop.f32.mrf.mxu0  ;;  %v8868_v42 = vld [vmem:[#allocation2 + $0x688] ss:$16 sps:$4 sm:$0xff]   ;;  %v8873_v61 = vld [vmem:[#allocation2 + $0x6a4] ss:$16 sps:$4 sm:$0xff]  }
 0x208   : > { %v3092_v2 = vpop.f32.mrf.mxu1 }
 0x209   : > { %v9824_v30 = vadd.f32 %v3092_v2, %v2547_v24  ;;  %v2549_v0 = vpop.f32.mrf.mxu0 }
 0x20a   : > { %v3094_v57 = vpop.f32.mrf.mxu1  ;;  %v8876_v0 = vld [vmem:[#allocation2 + $0x6ac] ss:$16 sps:$4 sm:$0xff]  }
 0x20b   : > { %11691 = vst [vmem:[#allocation16_spill] sm:$0xff] %v9824_v30  ;;  %v2552_v47 = vpop.f32.mrf.mxu0  ;;  %2743 = vmatmul.mubr.bf16.gmra.mxu0 %v8859_v50 }
 0x20c   : > { %v3097_v22 = vpop.f32.mrf.mxu1  ;;  %3288 = vmatmul.mubr.bf16.gmra.mxu1 %v8862_v19  ;;  %2750 = vmatprep.mubr.bf16.mxu0 %v8867_v63 }
 0x20d   : > { %v9826_v38 = vadd.f32 %v3097_v22, %v2552_v47  ;;  %v2554_v1 = vpop.f32.mrf.mxu0  ;;  %3295 = vmatprep.mubr.bf16.mxu1 %v8870_v55  ;;  %v8871_v22 = vld [vmem:[#allocation2 + $0x6a0] ss:$16 sps:$4 sm:$0xff]  }
 0x20e   : > { %v3099_v31 = vpop.f32.mrf.mxu1 }
 0x20f   : > { %11692 = vst [vmem:[#allocation17_spill] sm:$0xff] %v9826_v38  ;;  %v2555_v11 = vpop.f32.mrf.mxu0  ;;  %v8874_v31 = vld [vmem:[#allocation2 + $0x6a8] ss:$16 sps:$4 sm:$0xff]   ;;  %v8879_v38 = vld [vmem:[#allocation2 + $0x6c4] ss:$16 sps:$4 sm:$0xff]  }
 0x210   : > { %v3100_v46 = vpop.f32.mrf.mxu1 }
 0x211   : > { %v9828_v24 = vadd.f32 %v3100_v46, %v2555_v11  ;;  %v2557_v2 = vpop.f32.mrf.mxu0 }
 0x212   : > { %v3102_v57 = vpop.f32.mrf.mxu1  ;;  %v8882_v2 = vld [vmem:[#allocation2 + $0x6cc] ss:$16 sps:$4 sm:$0xff]  }
 0x213   : > { %11693 = vst [vmem:[#allocation18_spill] sm:$0xff] %v9828_v24  ;;  %v2560_v30 = vpop.f32.mrf.mxu0  ;;  %2751 = vmatmul.mubr.bf16.gmra.mxu0 %v8865_v23 }
 0x214   : > { %v3105_v50 = vpop.f32.mrf.mxu1  ;;  %3296 = vmatmul.mubr.bf16.gmra.mxu1 %v8868_v42  ;;  %2758 = vmatprep.mubr.bf16.mxu0 %v8873_v61 }
 0x215   : > { %v9830_v63 = vadd.f32 %v3105_v50, %v2560_v30  ;;  %v2562_v47 = vpop.f32.mrf.mxu0  ;;  %3303 = vmatprep.mubr.bf16.mxu1 %v8876_v0  ;;  %v8877_v50 = vld [vmem:[#allocation2 + $0x6c0] ss:$16 sps:$4 sm:$0xff]  }
 0x216   : > { %v3107_v19 = vpop.f32.mrf.mxu1 }
 0x217   : > { %11694 = vst [vmem:[#allocation19_spill] sm:$0xff] %v9830_v63  ;;  %v2563_v55 = vpop.f32.mrf.mxu0  ;;  %v8880_v19 = vld [vmem:[#allocation2 + $0x6c8] ss:$16 sps:$4 sm:$0xff]   ;;  %v8885_v63 = vld [vmem:[#allocation2 + $0x6e4] ss:$16 sps:$4 sm:$0xff]  }
 0x218   : > { %v3108_v1 = vpop.f32.mrf.mxu1 }
 0x219   : > { %v9832_v11 = vadd.f32 %v3108_v1, %v2563_v55  ;;  %v2565_v46 = vpop.f32.mrf.mxu0 }
 0x21a   : > { %v3110_v57 = vpop.f32.mrf.mxu1  ;;  %v8888_v46 = vld [vmem:[#allocation2 + $0x6ec] ss:$16 sps:$4 sm:$0xff]  }
 0x21b   : > { %11695 = vst [vmem:[#allocation20_spill] sm:$0xff] %v9832_v11  ;;  %v2568_v24 = vpop.f32.mrf.mxu0  ;;  %2759 = vmatmul.mubr.bf16.gmra.mxu0 %v8871_v22 }
 0x21c   : > { %v3113_v23 = vpop.f32.mrf.mxu1  ;;  %3304 = vmatmul.mubr.bf16.gmra.mxu1 %v8874_v31  ;;  %2766 = vmatprep.mubr.bf16.mxu0 %v8879_v38 }
 0x21d   : > { %v9834_v61 = vadd.f32 %v3113_v23, %v2568_v24  ;;  %v2570_v30 = vpop.f32.mrf.mxu0  ;;  %3311 = vmatprep.mubr.bf16.mxu1 %v8882_v2  ;;  %v8883_v23 = vld [vmem:[#allocation2 + $0x6e0] ss:$16 sps:$4 sm:$0xff]  }
 0x21e   : > { %v3115_v42 = vpop.f32.mrf.mxu1 }
 0x21f   : > { %11696 = vst [vmem:[#allocation21_spill] sm:$0xff] %v9834_v61  ;;  %v2571_v0 = vpop.f32.mrf.mxu0  ;;  %v8886_v42 = vld [vmem:[#allocation2 + $0x6e8] ss:$16 sps:$4 sm:$0xff]   ;;  %v8891_v61 = vld [vmem:[#allocation2 + $0x704] ss:$16 sps:$4 sm:$0xff]  }
 0x220   : > { %v3116_v47 = vpop.f32.mrf.mxu1 }
 0x221   : > { %v9836_v55 = vadd.f32 %v3116_v47, %v2571_v0  ;;  %v2573_v1 = vpop.f32.mrf.mxu0 }
 0x222   : > { %v3118_v57 = vpop.f32.mrf.mxu1  ;;  %v8894_v1 = vld [vmem:[#allocation2 + $0x70c] ss:$16 sps:$4 sm:$0xff]  }
 0x223   : > { %11697 = vst [vmem:[#allocation22_spill] sm:$0xff] %v9836_v55  ;;  %v2576_v11 = vpop.f32.mrf.mxu0  ;;  %2767 = vmatmul.mubr.bf16.gmra.mxu0 %v8877_v50 }
 0x224   : > { %v3121_v22 = vpop.f32.mrf.mxu1  ;;  %3312 = vmatmul.mubr.bf16.gmra.mxu1 %v8880_v19  ;;  %2774 = vmatprep.mubr.bf16.mxu0 %v8885_v63 }
 0x225   : > { %v9838_v38 = vadd.f32 %v3121_v22, %v2576_v11  ;;  %v2578_v24 = vpop.f32.mrf.mxu0  ;;  %3319 = vmatprep.mubr.bf16.mxu1 %v8888_v46  ;;  %v8889_v22 = vld [vmem:[#allocation2 + $0x700] ss:$16 sps:$4 sm:$0xff]  }
 0x226   : > { %v3123_v31 = vpop.f32.mrf.mxu1 }
 0x227   : > { %11698 = vst [vmem:[#allocation23_spill] sm:$0xff] %v9838_v38  ;;  %v2579_v2 = vpop.f32.mrf.mxu0  ;;  %v8892_v31 = vld [vmem:[#allocation2 + $0x708] ss:$16 sps:$4 sm:$0xff]   ;;  %v8897_v38 = vld [vmem:[#allocation2 + $0x724] ss:$16 sps:$4 sm:$0xff]  }
 0x228   : > { %v3124_v30 = vpop.f32.mrf.mxu1 }
 0x229   : > { %v9840_v0 = vadd.f32 %v3124_v30, %v2579_v2  ;;  %v2581_v47 = vpop.f32.mrf.mxu0 }
 0x22a   : > { %v3126_v57 = vpop.f32.mrf.mxu1  ;;  %v8900_v47 = vld [vmem:[#allocation2 + $0x72c] ss:$16 sps:$4 sm:$0xff]  }
 0x22b   : > { %11699 = vst [vmem:[#allocation24_spill] sm:$0xff] %v9840_v0  ;;  %v2584_v55 = vpop.f32.mrf.mxu0  ;;  %2775 = vmatmul.mubr.bf16.gmra.mxu0 %v8883_v23 }
 0x22c   : > { %v3129_v50 = vpop.f32.mrf.mxu1  ;;  %3320 = vmatmul.mubr.bf16.gmra.mxu1 %v8886_v42  ;;  %2782 = vmatprep.mubr.bf16.mxu0 %v8891_v61 }
 0x22d   : > { %v9842_v63 = vadd.f32 %v3129_v50, %v2584_v55  ;;  %v2586_v11 = vpop.f32.mrf.mxu0  ;;  %3327 = vmatprep.mubr.bf16.mxu1 %v8894_v1  ;;  %v8895_v50 = vld [vmem:[#allocation2 + $0x720] ss:$16 sps:$4 sm:$0xff]  }
 0x22e   : > { %v3131_v19 = vpop.f32.mrf.mxu1 }
 0x22f   : > { %11700 = vst [vmem:[#allocation25_spill] sm:$0xff] %v9842_v63  ;;  %v2587_v46 = vpop.f32.mrf.mxu0  ;;  %v8898_v19 = vld [vmem:[#allocation2 + $0x728] ss:$16 sps:$4 sm:$0xff]   ;;  %v8903_v63 = vld [vmem:[#allocation2 + $0x744] ss:$16 sps:$4 sm:$0xff]  }
 0x230   : > { %v3132_v24 = vpop.f32.mrf.mxu1 }
 0x231   : > { %v9844_v2 = vadd.f32 %v3132_v24, %v2587_v46  ;;  %v2589_v30 = vpop.f32.mrf.mxu0 }
 0x232   : > { %v3134_v57 = vpop.f32.mrf.mxu1  ;;  %v8906_v30 = vld [vmem:[#allocation2 + $0x74c] ss:$16 sps:$4 sm:$0xff]  }
 0x233   : > { %11701 = vst [vmem:[#allocation26_spill] sm:$0xff] %v9844_v2  ;;  %v2592_v0 = vpop.f32.mrf.mxu0  ;;  %2783 = vmatmul.mubr.bf16.gmra.mxu0 %v8889_v22 }
 0x234   : > { %v3137_v23 = vpop.f32.mrf.mxu1  ;;  %3328 = vmatmul.mubr.bf16.gmra.mxu1 %v8892_v31  ;;  %2790 = vmatprep.mubr.bf16.mxu0 %v8897_v38 }
 0x235   : > { %v9846_v61 = vadd.f32 %v3137_v23, %v2592_v0  ;;  %v2594_v55 = vpop.f32.mrf.mxu0  ;;  %3335 = vmatprep.mubr.bf16.mxu1 %v8900_v47  ;;  %v8901_v23 = vld [vmem:[#allocation2 + $0x740] ss:$16 sps:$4 sm:$0xff]  }
 0x236   : > { %v3139_v42 = vpop.f32.mrf.mxu1 }
 0x237   : > { %11702 = vst [vmem:[#allocation27_spill] sm:$0xff] %v9846_v61  ;;  %v2595_v1 = vpop.f32.mrf.mxu0  ;;  %v8904_v42 = vld [vmem:[#allocation2 + $0x748] ss:$16 sps:$4 sm:$0xff]   ;;  %v8909_v61 = vld [vmem:[#allocation2 + $0x764] ss:$16 sps:$4 sm:$0xff]  }
 0x238   : > { %v3140_v11 = vpop.f32.mrf.mxu1 }
 0x239   : > { %v9848_v46 = vadd.f32 %v3140_v11, %v2595_v1  ;;  %v2597_v24 = vpop.f32.mrf.mxu0 }
 0x23a   : > { %v3142_v57 = vpop.f32.mrf.mxu1  ;;  %v8912_v24 = vld [vmem:[#allocation2 + $0x76c] ss:$16 sps:$4 sm:$0xff]  }
 0x23b   : > { %11703 = vst [vmem:[#allocation28_spill] sm:$0xff] %v9848_v46  ;;  %v2600_v2 = vpop.f32.mrf.mxu0  ;;  %2791 = vmatmul.mubr.bf16.gmra.mxu0 %v8895_v50 }
 0x23c   : > { %v3145_v22 = vpop.f32.mrf.mxu1  ;;  %3336 = vmatmul.mubr.bf16.gmra.mxu1 %v8898_v19  ;;  %2798 = vmatprep.mubr.bf16.mxu0 %v8903_v63 }
 0x23d   : > { %v9850_v38 = vadd.f32 %v3145_v22, %v2600_v2  ;;  %v2602_v0 = vpop.f32.mrf.mxu0  ;;  %3343 = vmatprep.mubr.bf16.mxu1 %v8906_v30  ;;  %v8907_v22 = vld [vmem:[#allocation2 + $0x760] ss:$16 sps:$4 sm:$0xff]  }
 0x23e   : > { %v3147_v31 = vpop.f32.mrf.mxu1 }
 0x23f   : > { %11704 = vst [vmem:[#allocation29_spill] sm:$0xff] %v9850_v38  ;;  %v2603_v47 = vpop.f32.mrf.mxu0  ;;  %v8910_v31 = vld [vmem:[#allocation2 + $0x768] ss:$16 sps:$4 sm:$0xff]   ;;  %v8915_v38 = vld [vmem:[#allocation2 + $0x784] ss:$16 sps:$4 sm:$0xff]  }
 0x240   : > { %v3148_v55 = vpop.f32.mrf.mxu1 }
 0x241   : > { %v9852_v1 = vadd.f32 %v3148_v55, %v2603_v47  ;;  %v2605_v11 = vpop.f32.mrf.mxu0 }
 0x242   : > { %v3150_v57 = vpop.f32.mrf.mxu1  ;;  %v8918_v11 = vld [vmem:[#allocation2 + $0x78c] ss:$16 sps:$4 sm:$0xff]  }
 0x243   : > { %11705 = vst [vmem:[#allocation30_spill] sm:$0xff] %v9852_v1  ;;  %v2608_v46 = vpop.f32.mrf.mxu0  ;;  %2799 = vmatmul.mubr.bf16.gmra.mxu0 %v8901_v23 }
 0x244   : > { %v3153_v50 = vpop.f32.mrf.mxu1  ;;  %3344 = vmatmul.mubr.bf16.gmra.mxu1 %v8904_v42  ;;  %2806 = vmatprep.mubr.bf16.mxu0 %v8909_v61 }
 0x245   : > { %v9854_v63 = vadd.f32 %v3153_v50, %v2608_v46  ;;  %v2610_v2 = vpop.f32.mrf.mxu0  ;;  %3351 = vmatprep.mubr.bf16.mxu1 %v8912_v24  ;;  %v8913_v50 = vld [vmem:[#allocation2 + $0x780] ss:$16 sps:$4 sm:$0xff]  }
 0x246   : > { %v3155_v19 = vpop.f32.mrf.mxu1 }
 0x247   : > { %11706 = vst [vmem:[#allocation31_spill] sm:$0xff] %v9854_v63  ;;  %v2611_v30 = vpop.f32.mrf.mxu0  ;;  %v8916_v19 = vld [vmem:[#allocation2 + $0x788] ss:$16 sps:$4 sm:$0xff]   ;;  %v8921_v63 = vld [vmem:[#allocation2 + $0x7a4] ss:$16 sps:$4 sm:$0xff]  }
 0x248   : > { %v3156_v0 = vpop.f32.mrf.mxu1 }
 0x249   : > { %v9856_v47 = vadd.f32 %v3156_v0, %v2611_v30  ;;  %v2613_v55 = vpop.f32.mrf.mxu0 }
 0x24a   : > { %v3158_v57 = vpop.f32.mrf.mxu1  ;;  %v8924_v55 = vld [vmem:[#allocation2 + $0x7ac] ss:$16 sps:$4 sm:$0xff]  }
 0x24b   : > { %11707 = vst [vmem:[#allocation32_spill] sm:$0xff] %v9856_v47  ;;  %v2616_v1 = vpop.f32.mrf.mxu0  ;;  %2807 = vmatmul.mubr.bf16.gmra.mxu0 %v8907_v22 }
 0x24c   : > { %v3161_v23 = vpop.f32.mrf.mxu1  ;;  %3352 = vmatmul.mubr.bf16.gmra.mxu1 %v8910_v31  ;;  %2814 = vmatprep.mubr.bf16.mxu0 %v8915_v38 }
 0x24d   : > { %v9858_v61 = vadd.f32 %v3161_v23, %v2616_v1  ;;  %v2618_v46 = vpop.f32.mrf.mxu0  ;;  %3359 = vmatprep.mubr.bf16.mxu1 %v8918_v11  ;;  %v8919_v23 = vld [vmem:[#allocation2 + $0x7a0] ss:$16 sps:$4 sm:$0xff]  }
 0x24e   : > { %v3163_v42 = vpop.f32.mrf.mxu1 }
 0x24f   : > { %11708 = vst [vmem:[#allocation33_spill] sm:$0xff] %v9858_v61  ;;  %v2619_v24 = vpop.f32.mrf.mxu0  ;;  %v8922_v42 = vld [vmem:[#allocation2 + $0x7a8] ss:$16 sps:$4 sm:$0xff]   ;;  %v8927_v61 = vld [vmem:[#allocation2 + $0x7c4] ss:$16 sps:$4 sm:$0xff]  }
 0x250   : > { %v3164_v2 = vpop.f32.mrf.mxu1 }
 0x251   : > { %v9860_v30 = vadd.f32 %v3164_v2, %v2619_v24  ;;  %v2621_v0 = vpop.f32.mrf.mxu0 }
 0x252   : > { %v3166_v57 = vpop.f32.mrf.mxu1  ;;  %v8930_v0 = vld [vmem:[#allocation2 + $0x7cc] ss:$16 sps:$4 sm:$0xff]  }
 0x253   : > { %11709 = vst [vmem:[#allocation34_spill] sm:$0xff] %v9860_v30  ;;  %v2624_v47 = vpop.f32.mrf.mxu0  ;;  %2815 = vmatmul.mubr.bf16.gmra.mxu0 %v8913_v50 }
 0x254   : > { %v3169_v22 = vpop.f32.mrf.mxu1  ;;  %3360 = vmatmul.mubr.bf16.gmra.mxu1 %v8916_v19  ;;  %2822 = vmatprep.mubr.bf16.mxu0 %v8921_v63 }
 0x255   : > { %v9862_v38 = vadd.f32 %v3169_v22, %v2624_v47  ;;  %v2626_v1 = vpop.f32.mrf.mxu0  ;;  %3367 = vmatprep.mubr.bf16.mxu1 %v8924_v55  ;;  %v8925_v22 = vld [vmem:[#allocation2 + $0x7c0] ss:$16 sps:$4 sm:$0xff]  }
 0x256   : > { %v3171_v31 = vpop.f32.mrf.mxu1 }
 0x257   : > { %11710 = vst [vmem:[#allocation35_spill] sm:$0xff] %v9862_v38  ;;  %v2627_v11 = vpop.f32.mrf.mxu0  ;;  %v8928_v31 = vld [vmem:[#allocation2 + $0x7c8] ss:$16 sps:$4 sm:$0xff]   ;;  %v8933_v38 = vld [vmem:[#allocation2 + $0x7e4] ss:$16 sps:$4 sm:$0xff]  }
 0x258   : > { %v3172_v46 = vpop.f32.mrf.mxu1 }
 0x259   : > { %v9864_v24 = vadd.f32 %v3172_v46, %v2627_v11  ;;  %v2629_v2 = vpop.f32.mrf.mxu0 }
 0x25a   : > { %v3174_v57 = vpop.f32.mrf.mxu1  ;;  %v8936_v2 = vld [vmem:[#allocation2 + $0x7ec] ss:$16 sps:$4 sm:$0xff]  }
 0x25b   : > { %11711 = vst [vmem:[#allocation36_spill] sm:$0xff] %v9864_v24  ;;  %v2632_v30 = vpop.f32.mrf.mxu0  ;;  %2823 = vmatmul.mubr.bf16.gmra.mxu0 %v8919_v23 }
 0x25c   : > { %v3177_v50 = vpop.f32.mrf.mxu1  ;;  %3368 = vmatmul.mubr.bf16.gmra.mxu1 %v8922_v42  ;;  %2830 = vmatprep.mubr.bf16.mxu0 %v8927_v61 }
 0x25d   : > { %v9866_v63 = vadd.f32 %v3177_v50, %v2632_v30  ;;  %v2634_v47 = vpop.f32.mrf.mxu0  ;;  %3375 = vmatprep.mubr.bf16.mxu1 %v8930_v0  ;;  %v8931_v50 = vld [vmem:[#allocation2 + $0x7e0] ss:$16 sps:$4 sm:$0xff]  }
 0x25e   : > { %v3179_v19 = vpop.f32.mrf.mxu1 }
 0x25f   : > { %v2635_v55 = vpop.f32.mrf.mxu0  ;;  %v8934_v19 = vld [vmem:[#allocation2 + $0x7e8] ss:$16 sps:$4 sm:$0xff]  }
 0x260   : > { %v3180_v1 = vpop.f32.mrf.mxu1 }
 0x261   : > { %v9868_v11 = vadd.f32 %v3180_v1, %v2635_v55  ;;  %v2637_v46 = vpop.f32.mrf.mxu0  ;;  %v8939_v55 = vld [vmem:[%s11676_s2 + $0x4] ss:$16 sps:$4 sm:$0xff]  }
 0x262   : > { %v3182_v57 = vpop.f32.mrf.mxu1 }
 0x263   : > { %v2640_v24 = vpop.f32.mrf.mxu0  ;;  %2831 = vmatmul.mubr.bf16.gmra.mxu0 %v8925_v22 }
 0x264   : > { %v3185_v23 = vpop.f32.mrf.mxu1  ;;  %3376 = vmatmul.mubr.bf16.gmra.mxu1 %v8928_v31  ;;  %2838 = vmatprep.mubr.bf16.mxu0 %v8933_v38  ;;  %v8942_v38 = vld [vmem:[%s11676_s2 + $0xc] ss:$16 sps:$4 sm:$0xff]  }
 0x265   : > { %v9870_v61 = vadd.f32 %v3185_v23, %v2640_v24  ;;  %v2642_v30 = vpop.f32.mrf.mxu0  ;;  %3383 = vmatprep.mubr.bf16.mxu1 %v8936_v2 }
 0x266   : > { %v3187_v42 = vpop.f32.mrf.mxu1 }
 0x267   : > { %11712 = vst [vmem:[#allocation37_spill] sm:$0xff] %v9870_v61  ;;  %v2643_v0 = vpop.f32.mrf.mxu0  ;;  %v8937_v42 = vld [vmem:[%s11676_s2] ss:$16 sps:$4 sm:$0xff]  }
 0x268   : > { %v3188_v47 = vpop.f32.mrf.mxu1 }
 0x269   : > { %v9875_v1 = vadd.f32 %v3188_v47, %v2643_v0  ;;  %v2645_v46 = vpop.f32.mrf.mxu0  ;;  %v8940_v47 = vld [vmem:[%s11676_s2 + $0x8] ss:$16 sps:$4 sm:$0xff]  }
 0x26a   : > { %v3190_v24 = vpop.f32.mrf.mxu1  ;;  %v8948_v46 = vld [vmem:[%s11676_s2 + $0x2c] ss:$16 sps:$4 sm:$0xff]  }
 0x26b   : > { %11713 = vst [vmem:[#allocation38_spill] sm:$0xff] %v9875_v1  ;;  %v2648_v22 = vpop.f32.mrf.mxu0  ;;  %2839 = vmatmul.mubr.bf16.gmra.mxu0 %v8931_v50  ;;  %v8945_v50 = vld [vmem:[%s11676_s2 + $0x24] ss:$16 sps:$4 sm:$0xff]  }
 0x26c   : > { %v3193_v31 = vpop.f32.mrf.mxu1  ;;  %3384 = vmatmul.mubr.bf16.gmra.mxu1 %v8934_v19  ;;  %4704 = vmatprep.mubr.bf16.mxu0 %v8939_v55 }
 0x26d   : > { %v9880_v2 = vadd.f32 %v3193_v31, %v2648_v22  ;;  %v2650_v57 = vpop.f32.mrf.mxu0  ;;  %5249 = vmatprep.mubr.bf16.mxu1 %v8942_v38 }
 0x26e   : > { %v3195_v23 = vpop.f32.mrf.mxu1 }
 0x26f   : > { %11714 = vst [vmem:[#allocation39_spill] sm:$0xff] %v9880_v2  ;;  %v2651_v30 = vpop.f32.mrf.mxu0 }
 0x270   : > { %v3196_v0 = vpop.f32.mrf.mxu1 }
 0x271   : > { %v9891_v19 = vadd.f32 %v3196_v0, %v2651_v30  ;;  %v2653_v55 = vpop.f32.mrf.mxu0  ;;  %v8943_v30 = vld [vmem:[%s11676_s2 + $0x20] ss:$16 sps:$4 sm:$0xff]  }
 0x272   : > { %v3198_v38 = vpop.f32.mrf.mxu1  ;;  %v8946_v55 = vld [vmem:[%s11676_s2 + $0x28] ss:$16 sps:$4 sm:$0xff]  }
 0x273   : > { %11715 = vst [vmem:[#allocation40_spill] sm:$0xff] %v9891_v19  ;;  %v2656_v24 = vpop.f32.mrf.mxu0  ;;  %4705 = vmatmul.mubr.bf16.vlgmr.msra.gmra.mxu0 %v8937_v42  ;;  %v8951_v42 = vld [vmem:[%s11676_s2 + $0x44] ss:$16 sps:$4 sm:$0xff]  }
 0x274   : > { %v3201_v22 = vpop.f32.mrf.mxu1  ;;  %5250 = vmatmul.mubr.bf16.vlgmr.msra.gmra.mxu1 %v8940_v47  ;;  %4712 = vmatprep.mubr.bf16.mxu0 %v8945_v50 }
 0x275   : > { %v9896_v31 = vadd.f32 %v3201_v22, %v2656_v24  ;;  %v2658_v57 = vpop.f32.mrf.mxu0  ;;  %5257 = vmatprep.mubr.bf16.mxu1 %v8948_v46  ;;  %v8954_v46 = vld [vmem:[%s11676_s2 + $0x4c] ss:$16 sps:$4 sm:$0xff]  }
 0x276   : > { %v3203_v23 = vpop.f32.mrf.mxu1 }
 0x277   : > { %11716 = vst [vmem:[#allocation41_spill] sm:$0xff] %v9896_v31  ;;  %v2659_v2 = vpop.f32.mrf.mxu0 }
 0x278   : > { %v3204_v0 = vpop.f32.mrf.mxu1 }
 0x279   : > { %v9907_v47 = vadd.f32 %v3204_v0, %v2659_v2  ;;  %v2661_v50 = vpop.f32.mrf.mxu0  ;;  %v8949_v2 = vld [vmem:[%s11676_s2 + $0x40] ss:$16 sps:$4 sm:$0xff]  }
 0x27a   : > { %v3206_v38 = vpop.f32.mrf.mxu1  ;;  %v8952_v50 = vld [vmem:[%s11676_s2 + $0x48] ss:$16 sps:$4 sm:$0xff]  }
 0x27b   : > { %11717 = vst [vmem:[#allocation42_spill] sm:$0xff] %v9907_v47  ;;  %v2664_v24 = vpop.f32.mrf.mxu0  ;;  %4713 = vmatmul.mubr.bf16.gmra.mxu0 %v8943_v30  ;;  %v8957_v30 = vld [vmem:[%s11676_s2 + $0x64] ss:$16 sps:$4 sm:$0xff]  }
 0x27c   : > { %v3209_v22 = vpop.f32.mrf.mxu1  ;;  %5258 = vmatmul.mubr.bf16.gmra.mxu1 %v8946_v55  ;;  %4720 = vmatprep.mubr.bf16.mxu0 %v8951_v42 }
 0x27d   : > { %v9912_v57 = vadd.f32 %v3209_v22, %v2664_v24  ;;  %v2666_v23 = vpop.f32.mrf.mxu0  ;;  %5265 = vmatprep.mubr.bf16.mxu1 %v8954_v46 }
 0x27e   : > { %v3211_v31 = vpop.f32.mrf.mxu1 }
 0x27f   : > { %11718 = vst [vmem:[#allocation43_spill] sm:$0xff] %v9912_v57  ;;  %v2667_v19 = vpop.f32.mrf.mxu0  ;;  %v8960_v31 = vld [vmem:[%s11676_s2 + $0x6c] ss:$16 sps:$4 sm:$0xff]  }
 0x280   : > { %v3212_v0 = vpop.f32.mrf.mxu1 }
 0x281   : > { %v9923_v55 = vadd.f32 %v3212_v0, %v2667_v19  ;;  %v2669_v42 = vpop.f32.mrf.mxu0  ;;  %v8955_v19 = vld [vmem:[%s11676_s2 + $0x60] ss:$16 sps:$4 sm:$0xff]  }
 0x282   : > { %v3214_v46 = vpop.f32.mrf.mxu1  ;;  %v8958_v42 = vld [vmem:[%s11676_s2 + $0x68] ss:$16 sps:$4 sm:$0xff]  }
 0x283   : > { %11719 = vst [vmem:[#allocation44_spill] sm:$0xff] %v9923_v55  ;;  %v2672_v38 = vpop.f32.mrf.mxu0  ;;  %4721 = vmatmul.mubr.bf16.gmra.mxu0 %v8949_v2  ;;  %v8963_v2 = vld [vmem:[%s11676_s2 + $0x84] ss:$16 sps:$4 sm:$0xff]  }
 0x284   : > { %v3217_v24 = vpop.f32.mrf.mxu1  ;;  %5266 = vmatmul.mubr.bf16.gmra.mxu1 %v8952_v50  ;;  %4728 = vmatprep.mubr.bf16.mxu0 %v8957_v30 }
 0x285   : > { %v9928_v22 = vadd.f32 %v3217_v24, %v2672_v38  ;;  %v2674_v23 = vpop.f32.mrf.mxu0  ;;  %5273 = vmatprep.mubr.bf16.mxu1 %v8960_v31 }
 0x286   : > { %v3219_v57 = vpop.f32.mrf.mxu1 }
 0x287   : > { %11720 = vst [vmem:[#allocation45_spill] sm:$0xff] %v9928_v22  ;;  %v2675_v47 = vpop.f32.mrf.mxu0  ;;  %v8966_v57 = vld [vmem:[%s11676_s2 + $0x8c] ss:$16 sps:$4 sm:$0xff]  }
 0x288   : > { %v3220_v0 = vpop.f32.mrf.mxu1 }
 0x289   : > { %v9939_v50 = vadd.f32 %v3220_v0, %v2675_v47  ;;  %v2677_v30 = vpop.f32.mrf.mxu0  ;;  %v8961_v47 = vld [vmem:[%s11676_s2 + $0x80] ss:$16 sps:$4 sm:$0xff]  }
 0x28a   : > { %v3222_v31 = vpop.f32.mrf.mxu1  ;;  %v8964_v30 = vld [vmem:[%s11676_s2 + $0x88] ss:$16 sps:$4 sm:$0xff]  }
 0x28b   : > { %11721 = vst [vmem:[#allocation46_spill] sm:$0xff] %v9939_v50  ;;  %v2680_v46 = vpop.f32.mrf.mxu0  ;;  %4729 = vmatmul.mubr.bf16.gmra.mxu0 %v8955_v19  ;;  %v8969_v19 = vld [vmem:[%s11676_s2 + $0xa4] ss:$16 sps:$4 sm:$0xff]  }
 0x28c   : > { %v3225_v38 = vpop.f32.mrf.mxu1  ;;  %5274 = vmatmul.mubr.bf16.gmra.mxu1 %v8958_v42  ;;  %4736 = vmatprep.mubr.bf16.mxu0 %v8963_v2 }
 0x28d   : > { %v9944_v24 = vadd.f32 %v3225_v38, %v2680_v46  ;;  %v2682_v23 = vpop.f32.mrf.mxu0  ;;  %5281 = vmatprep.mubr.bf16.mxu1 %v8966_v57 }
 0x28e   : > { %v3227_v22 = vpop.f32.mrf.mxu1 }
 0x28f   : > { %11722 = vst [vmem:[#allocation47_spill] sm:$0xff] %v9944_v24  ;;  %v2683_v55 = vpop.f32.mrf.mxu0  ;;  %v8972_v22 = vld [vmem:[%s11676_s2 + $0xac] ss:$16 sps:$4 sm:$0xff]  }
 0x290   : > { %v3228_v0 = vpop.f32.mrf.mxu1 }
 0x291   : > { %v9955_v42 = vadd.f32 %v3228_v0, %v2683_v55  ;;  %v2685_v2 = vpop.f32.mrf.mxu0  ;;  %v8967_v55 = vld [vmem:[%s11676_s2 + $0xa0] ss:$16 sps:$4 sm:$0xff]  }
 0x292   : > { %v3230_v57 = vpop.f32.mrf.mxu1  ;;  %v8970_v2 = vld [vmem:[%s11676_s2 + $0xa8] ss:$16 sps:$4 sm:$0xff]  }
 0x293   : > { %11723 = vst [vmem:[#allocation48_spill] sm:$0xff] %v9955_v42  ;;  %v2688_v31 = vpop.f32.mrf.mxu0  ;;  %4737 = vmatmul.mubr.bf16.gmra.mxu0 %v8961_v47  ;;  %v8975_v47 = vld [vmem:[%s11676_s2 + $0xc4] ss:$16 sps:$4 sm:$0xff]  }
 0x294   : > { %v3233_v46 = vpop.f32.mrf.mxu1  ;;  %5282 = vmatmul.mubr.bf16.gmra.mxu1 %v8964_v30  ;;  %4744 = vmatprep.mubr.bf16.mxu0 %v8969_v19 }
 0x295   : > { %v9960_v38 = vadd.f32 %v3233_v46, %v2688_v31  ;;  %v2690_v23 = vpop.f32.mrf.mxu0  ;;  %5289 = vmatprep.mubr.bf16.mxu1 %v8972_v22 }
 0x296   : > { %v3235_v24 = vpop.f32.mrf.mxu1 }
 0x297   : > { %11724 = vst [vmem:[#allocation49_spill] sm:$0xff] %v9960_v38  ;;  %v2691_v50 = vpop.f32.mrf.mxu0  ;;  %v8978_v24 = vld [vmem:[%s11676_s2 + $0xcc] ss:$16 sps:$4 sm:$0xff]  }
 0x298   : > { %v3236_v0 = vpop.f32.mrf.mxu1 }
 0x299   : > { %v9971_v30 = vadd.f32 %v3236_v0, %v2691_v50  ;;  %v2693_v19 = vpop.f32.mrf.mxu0  ;;  %v8973_v50 = vld [vmem:[%s11676_s2 + $0xc0] ss:$16 sps:$4 sm:$0xff]  }
 0x29a   : > { %v3238_v22 = vpop.f32.mrf.mxu1  ;;  %v8976_v19 = vld [vmem:[%s11676_s2 + $0xc8] ss:$16 sps:$4 sm:$0xff]  }
 0x29b   : > { %11725 = vst [vmem:[#allocation50_spill] sm:$0xff] %v9971_v30  ;;  %v2696_v57 = vpop.f32.mrf.mxu0  ;;  %4745 = vmatmul.mubr.bf16.gmra.mxu0 %v8967_v55  ;;  %v8981_v55 = vld [vmem:[%s11676_s2 + $0xe4] ss:$16 sps:$4 sm:$0xff]  }
 0x29c   : > { %v3241_v31 = vpop.f32.mrf.mxu1  ;;  %5290 = vmatmul.mubr.bf16.gmra.mxu1 %v8970_v2  ;;  %4752 = vmatprep.mubr.bf16.mxu0 %v8975_v47 }
 0x29d   : > { %v9976_v46 = vadd.f32 %v3241_v31, %v2696_v57  ;;  %v2698_v23 = vpop.f32.mrf.mxu0  ;;  %5297 = vmatprep.mubr.bf16.mxu1 %v8978_v24 }
 0x29e   : > { %v3243_v38 = vpop.f32.mrf.mxu1 }
 0x29f   : > { %11726 = vst [vmem:[#allocation51_spill] sm:$0xff] %v9976_v46  ;;  %v2699_v42 = vpop.f32.mrf.mxu0  ;;  %v8984_v38 = vld [vmem:[%s11676_s2 + $0xec] ss:$16 sps:$4 sm:$0xff]  }
 0x2a0   : > { %v3244_v0 = vpop.f32.mrf.mxu1 }
 0x2a1   : > { %v9987_v2 = vadd.f32 %v3244_v0, %v2699_v42  ;;  %v2701_v47 = vpop.f32.mrf.mxu0  ;;  %v8979_v42 = vld [vmem:[%s11676_s2 + $0xe0] ss:$16 sps:$4 sm:$0xff]  }
 0x2a2   : > { %v3246_v24 = vpop.f32.mrf.mxu1  ;;  %v8982_v47 = vld [vmem:[%s11676_s2 + $0xe8] ss:$16 sps:$4 sm:$0xff]  }
 0x2a3   : > { %11727 = vst [vmem:[#allocation52_spill] sm:$0xff] %v9987_v2  ;;  %v2704_v22 = vpop.f32.mrf.mxu0  ;;  %4753 = vmatmul.mubr.bf16.gmra.mxu0 %v8973_v50  ;;  %v8987_v50 = vld [vmem:[%s11676_s2 + $0x104] ss:$16 sps:$4 sm:$0xff]  }
 0x2a4   : > { %v3249_v57 = vpop.f32.mrf.mxu1  ;;  %5298 = vmatmul.mubr.bf16.gmra.mxu1 %v8976_v19  ;;  %4760 = vmatprep.mubr.bf16.mxu0 %v8981_v55 }
 0x2a5   : > { %v9992_v31 = vadd.f32 %v3249_v57, %v2704_v22  ;;  %v2706_v23 = vpop.f32.mrf.mxu0  ;;  %5305 = vmatprep.mubr.bf16.mxu1 %v8984_v38 }
 0x2a6   : > { %v3251_v46 = vpop.f32.mrf.mxu1 }
 0x2a7   : > { %11728 = vst [vmem:[#allocation53_spill] sm:$0xff] %v9992_v31  ;;  %v2707_v30 = vpop.f32.mrf.mxu0  ;;  %v8990_v46 = vld [vmem:[%s11676_s2 + $0x10c] ss:$16 sps:$4 sm:$0xff]  }
 0x2a8   : > { %v3252_v0 = vpop.f32.mrf.mxu1 }
 0x2a9   : > { %v10003_v19 = vadd.f32 %v3252_v0, %v2707_v30  ;;  %v2709_v55 = vpop.f32.mrf.mxu0  ;;  %v8985_v30 = vld [vmem:[%s11676_s2 + $0x100] ss:$16 sps:$4 sm:$0xff]  }
 0x2aa   : > { %v3254_v38 = vpop.f32.mrf.mxu1  ;;  %v8988_v55 = vld [vmem:[%s11676_s2 + $0x108] ss:$16 sps:$4 sm:$0xff]  }
 0x2ab   : > { %11729 = vst [vmem:[#allocation54_spill] sm:$0xff] %v10003_v19  ;;  %v2712_v24 = vpop.f32.mrf.mxu0  ;;  %4761 = vmatmul.mubr.bf16.gmra.mxu0 %v8979_v42  ;;  %v8993_v42 = vld [vmem:[%s11676_s2 + $0x124] ss:$16 sps:$4 sm:$0xff]  }
 0x2ac   : > { %v3257_v22 = vpop.f32.mrf.mxu1  ;;  %5306 = vmatmul.mubr.bf16.gmra.mxu1 %v8982_v47  ;;  %4768 = vmatprep.mubr.bf16.mxu0 %v8987_v50 }
 0x2ad   : > { %v10008_v57 = vadd.f32 %v3257_v22, %v2712_v24  ;;  %v2714_v23 = vpop.f32.mrf.mxu0  ;;  %5313 = vmatprep.mubr.bf16.mxu1 %v8990_v46 }
 0x2ae   : > { %v3259_v31 = vpop.f32.mrf.mxu1 }
 0x2af   : > { %11730 = vst [vmem:[#allocation55_spill] sm:$0xff] %v10008_v57  ;;  %v2715_v2 = vpop.f32.mrf.mxu0  ;;  %v8996_v31 = vld [vmem:[%s11676_s2 + $0x12c] ss:$16 sps:$4 sm:$0xff]  }
 0x2b0   : > { %v3260_v0 = vpop.f32.mrf.mxu1 }
 0x2b1   : > { %v10019_v47 = vadd.f32 %v3260_v0, %v2715_v2  ;;  %v2717_v50 = vpop.f32.mrf.mxu0  ;;  %v8991_v2 = vld [vmem:[%s11676_s2 + $0x120] ss:$16 sps:$4 sm:$0xff]  }
 0x2b2   : > { %v3262_v46 = vpop.f32.mrf.mxu1  ;;  %v8994_v50 = vld [vmem:[%s11676_s2 + $0x128] ss:$16 sps:$4 sm:$0xff]  }
 0x2b3   : > { %11731 = vst [vmem:[#allocation56_spill] sm:$0xff] %v10019_v47  ;;  %v2720_v38 = vpop.f32.mrf.mxu0  ;;  %4769 = vmatmul.mubr.bf16.gmra.mxu0 %v8985_v30  ;;  %v8999_v30 = vld [vmem:[%s11676_s2 + $0x144] ss:$16 sps:$4 sm:$0xff]  }
 0x2b4   : > { %v3265_v24 = vpop.f32.mrf.mxu1  ;;  %5314 = vmatmul.mubr.bf16.gmra.mxu1 %v8988_v55  ;;  %4776 = vmatprep.mubr.bf16.mxu0 %v8993_v42 }
 0x2b5   : > { %v10024_v22 = vadd.f32 %v3265_v24, %v2720_v38  ;;  %v2722_v23 = vpop.f32.mrf.mxu0  ;;  %5321 = vmatprep.mubr.bf16.mxu1 %v8996_v31 }
 0x2b6   : > { %v3267_v57 = vpop.f32.mrf.mxu1 }
 0x2b7   : > { %11732 = vst [vmem:[#allocation57_spill] sm:$0xff] %v10024_v22  ;;  %v2723_v19 = vpop.f32.mrf.mxu0  ;;  %v9002_v57 = vld [vmem:[%s11676_s2 + $0x14c] ss:$16 sps:$4 sm:$0xff]  }
 0x2b8   : > { %v3268_v0 = vpop.f32.mrf.mxu1 }
 0x2b9   : > { %v10035_v55 = vadd.f32 %v3268_v0, %v2723_v19  ;;  %v2725_v42 = vpop.f32.mrf.mxu0  ;;  %v8997_v19 = vld [vmem:[%s11676_s2 + $0x140] ss:$16 sps:$4 sm:$0xff]  }
 0x2ba   : > { %v3270_v31 = vpop.f32.mrf.mxu1  ;;  %v9000_v42 = vld [vmem:[%s11676_s2 + $0x148] ss:$16 sps:$4 sm:$0xff]  }
 0x2bb   : > { %11733 = vst [vmem:[#allocation58_spill] sm:$0xff] %v10035_v55  ;;  %v2728_v46 = vpop.f32.mrf.mxu0  ;;  %4777 = vmatmul.mubr.bf16.gmra.mxu0 %v8991_v2  ;;  %v9005_v2 = vld [vmem:[%s11676_s2 + $0x164] ss:$16 sps:$4 sm:$0xff]  }
 0x2bc   : > { %v3273_v38 = vpop.f32.mrf.mxu1  ;;  %5322 = vmatmul.mubr.bf16.gmra.mxu1 %v8994_v50  ;;  %4784 = vmatprep.mubr.bf16.mxu0 %v8999_v30 }
 0x2bd   : > { %v10040_v24 = vadd.f32 %v3273_v38, %v2728_v46  ;;  %v2730_v23 = vpop.f32.mrf.mxu0  ;;  %5329 = vmatprep.mubr.bf16.mxu1 %v9002_v57 }
 0x2be   : > { %v3275_v22 = vpop.f32.mrf.mxu1 }
 0x2bf   : > { %11734 = vst [vmem:[#allocation59_spill] sm:$0xff] %v10040_v24  ;;  %v2731_v47 = vpop.f32.mrf.mxu0  ;;  %v9008_v22 = vld [vmem:[%s11676_s2 + $0x16c] ss:$16 sps:$4 sm:$0xff]  }
 0x2c0   : > { %v3276_v0 = vpop.f32.mrf.mxu1 }
 0x2c1   : > { %v10051_v50 = vadd.f32 %v3276_v0, %v2731_v47  ;;  %v2733_v30 = vpop.f32.mrf.mxu0  ;;  %v9003_v47 = vld [vmem:[%s11676_s2 + $0x160] ss:$16 sps:$4 sm:$0xff]  }
 0x2c2   : > { %v3278_v57 = vpop.f32.mrf.mxu1  ;;  %v9006_v30 = vld [vmem:[%s11676_s2 + $0x168] ss:$16 sps:$4 sm:$0xff]  }
 0x2c3   : > { %11735 = vst [vmem:[#allocation60_spill] sm:$0xff] %v10051_v50  ;;  %v2736_v31 = vpop.f32.mrf.mxu0  ;;  %4785 = vmatmul.mubr.bf16.gmra.mxu0 %v8997_v19  ;;  %v9011_v19 = vld [vmem:[%s11676_s2 + $0x184] ss:$16 sps:$4 sm:$0xff]  }
 0x2c4   : > { %v3281_v46 = vpop.f32.mrf.mxu1  ;;  %5330 = vmatmul.mubr.bf16.gmra.mxu1 %v9000_v42  ;;  %4792 = vmatprep.mubr.bf16.mxu0 %v9005_v2 }
 0x2c5   : > { %v10056_v38 = vadd.f32 %v3281_v46, %v2736_v31  ;;  %v2738_v23 = vpop.f32.mrf.mxu0  ;;  %5337 = vmatprep.mubr.bf16.mxu1 %v9008_v22 }
 0x2c6   : > { %v3283_v24 = vpop.f32.mrf.mxu1 }
 0x2c7   : > { %11736 = vst [vmem:[#allocation61_spill] sm:$0xff] %v10056_v38  ;;  %v2739_v55 = vpop.f32.mrf.mxu0  ;;  %v9014_v24 = vld [vmem:[%s11676_s2 + $0x18c] ss:$16 sps:$4 sm:$0xff]  }
 0x2c8   : > { %v3284_v0 = vpop.f32.mrf.mxu1 }
 0x2c9   : > { %v10067_v42 = vadd.f32 %v3284_v0, %v2739_v55  ;;  %v2741_v2 = vpop.f32.mrf.mxu0  ;;  %v9009_v55 = vld [vmem:[%s11676_s2 + $0x180] ss:$16 sps:$4 sm:$0xff]  }
 0x2ca   : > { %v3286_v22 = vpop.f32.mrf.mxu1  ;;  %v9012_v2 = vld [vmem:[%s11676_s2 + $0x188] ss:$16 sps:$4 sm:$0xff]  }
 0x2cb   : > { %11737 = vst [vmem:[#allocation62_spill] sm:$0xff] %v10067_v42  ;;  %v2744_v57 = vpop.f32.mrf.mxu0  ;;  %4793 = vmatmul.mubr.bf16.gmra.mxu0 %v9003_v47  ;;  %v9017_v47 = vld [vmem:[%s11676_s2 + $0x1a4] ss:$16 sps:$4 sm:$0xff]  }
 0x2cc   : > { %v3289_v31 = vpop.f32.mrf.mxu1  ;;  %5338 = vmatmul.mubr.bf16.gmra.mxu1 %v9006_v30  ;;  %4800 = vmatprep.mubr.bf16.mxu0 %v9011_v19 }
 0x2cd   : > { %v10072_v46 = vadd.f32 %v3289_v31, %v2744_v57  ;;  %v2746_v23 = vpop.f32.mrf.mxu0  ;;  %5345 = vmatprep.mubr.bf16.mxu1 %v9014_v24 }
 0x2ce   : > { %v3291_v38 = vpop.f32.mrf.mxu1 }
 0x2cf   : > { %11738 = vst [vmem:[#allocation63_spill] sm:$0xff] %v10072_v46  ;;  %v2747_v50 = vpop.f32.mrf.mxu0  ;;  %v9020_v38 = vld [vmem:[%s11676_s2 + $0x1ac] ss:$16 sps:$4 sm:$0xff]  }
 0x2d0   : > { %v3292_v0 = vpop.f32.mrf.mxu1 }
 0x2d1   : > { %v10083_v30 = vadd.f32 %v3292_v0, %v2747_v50  ;;  %v2749_v19 = vpop.f32.mrf.mxu0  ;;  %v9015_v50 = vld [vmem:[%s11676_s2 + $0x1a0] ss:$16 sps:$4 sm:$0xff]  }
 0x2d2   : > { %v3294_v24 = vpop.f32.mrf.mxu1  ;;  %v9018_v19 = vld [vmem:[%s11676_s2 + $0x1a8] ss:$16 sps:$4 sm:$0xff]  }
 0x2d3   : > { %11739 = vst [vmem:[#allocation64_spill] sm:$0xff] %v10083_v30  ;;  %v2752_v22 = vpop.f32.mrf.mxu0  ;;  %4801 = vmatmul.mubr.bf16.gmra.mxu0 %v9009_v55  ;;  %v9023_v55 = vld [vmem:[%s11676_s2 + $0x1c4] ss:$16 sps:$4 sm:$0xff]  }
 0x2d4   : > { %v3297_v57 = vpop.f32.mrf.mxu1  ;;  %5346 = vmatmul.mubr.bf16.gmra.mxu1 %v9012_v2  ;;  %4808 = vmatprep.mubr.bf16.mxu0 %v9017_v47 }
 0x2d5   : > { %v10088_v31 = vadd.f32 %v3297_v57, %v2752_v22  ;;  %v2754_v23 = vpop.f32.mrf.mxu0  ;;  %5353 = vmatprep.mubr.bf16.mxu1 %v9020_v38 }
 0x2d6   : > { %v3299_v46 = vpop.f32.mrf.mxu1 }
 0x2d7   : > { %11740 = vst [vmem:[#allocation65_spill] sm:$0xff] %v10088_v31  ;;  %v2755_v42 = vpop.f32.mrf.mxu0  ;;  %v9026_v46 = vld [vmem:[%s11676_s2 + $0x1cc] ss:$16 sps:$4 sm:$0xff]  }
 0x2d8   : > { %v3300_v0 = vpop.f32.mrf.mxu1 }
 0x2d9   : > { %v10099_v2 = vadd.f32 %v3300_v0, %v2755_v42  ;;  %v2757_v47 = vpop.f32.mrf.mxu0  ;;  %v9021_v42 = vld [vmem:[%s11676_s2 + $0x1c0] ss:$16 sps:$4 sm:$0xff]  }
 0x2da   : > { %v3302_v38 = vpop.f32.mrf.mxu1  ;;  %v9024_v47 = vld [vmem:[%s11676_s2 + $0x1c8] ss:$16 sps:$4 sm:$0xff]  }
 0x2db   : > { %11741 = vst [vmem:[#allocation66_spill] sm:$0xff] %v10099_v2  ;;  %v2760_v24 = vpop.f32.mrf.mxu0  ;;  %4809 = vmatmul.mubr.bf16.gmra.mxu0 %v9015_v50  ;;  %v9029_v50 = vld [vmem:[%s11676_s2 + $0x1e4] ss:$16 sps:$4 sm:$0xff]  }
 0x2dc   : > { %v3305_v22 = vpop.f32.mrf.mxu1  ;;  %5354 = vmatmul.mubr.bf16.gmra.mxu1 %v9018_v19  ;;  %4816 = vmatprep.mubr.bf16.mxu0 %v9023_v55 }
 0x2dd   : > { %v10104_v57 = vadd.f32 %v3305_v22, %v2760_v24  ;;  %v2762_v23 = vpop.f32.mrf.mxu0  ;;  %5361 = vmatprep.mubr.bf16.mxu1 %v9026_v46 }
 0x2de   : > { %v3307_v31 = vpop.f32.mrf.mxu1 }
 0x2df   : > { %11742 = vst [vmem:[#allocation67_spill] sm:$0xff] %v10104_v57  ;;  %v2763_v30 = vpop.f32.mrf.mxu0  ;;  %v9032_v31 = vld [vmem:[%s11676_s2 + $0x1ec] ss:$16 sps:$4 sm:$0xff]  }
 0x2e0   : > { %v3308_v0 = vpop.f32.mrf.mxu1 }
 0x2e1   : > { %v10115_v19 = vadd.f32 %v3308_v0, %v2763_v30  ;;  %v2765_v55 = vpop.f32.mrf.mxu0  ;;  %v9027_v30 = vld [vmem:[%s11676_s2 + $0x1e0] ss:$16 sps:$4 sm:$0xff]  }
 0x2e2   : > { %v3310_v46 = vpop.f32.mrf.mxu1  ;;  %v9030_v55 = vld [vmem:[%s11676_s2 + $0x1e8] ss:$16 sps:$4 sm:$0xff]  }
 0x2e3   : > { %11743 = vst [vmem:[#allocation68_spill] sm:$0xff] %v10115_v19  ;;  %v2768_v38 = vpop.f32.mrf.mxu0  ;;  %4817 = vmatmul.mubr.bf16.gmra.mxu0 %v9021_v42  ;;  %v9035_v42 = vld [vmem:[%s11676_s2 + $0x204] ss:$16 sps:$4 sm:$0xff]  }
 0x2e4   : > { %v3313_v24 = vpop.f32.mrf.mxu1  ;;  %5362 = vmatmul.mubr.bf16.gmra.mxu1 %v9024_v47  ;;  %4824 = vmatprep.mubr.bf16.mxu0 %v9029_v50 }
 0x2e5   : > { %v10120_v22 = vadd.f32 %v3313_v24, %v2768_v38  ;;  %v2770_v23 = vpop.f32.mrf.mxu0  ;;  %5369 = vmatprep.mubr.bf16.mxu1 %v9032_v31 }
 0x2e6   : > { %v3315_v57 = vpop.f32.mrf.mxu1 }
 0x2e7   : > { %11744 = vst [vmem:[#allocation69_spill] sm:$0xff] %v10120_v22  ;;  %v2771_v2 = vpop.f32.mrf.mxu0  ;;  %v9038_v57 = vld [vmem:[%s11676_s2 + $0x20c] ss:$16 sps:$4 sm:$0xff]  }
 0x2e8   : > { %v3316_v0 = vpop.f32.mrf.mxu1 }
 0x2e9   : > { %v10131_v47 = vadd.f32 %v3316_v0, %v2771_v2  ;;  %v2773_v50 = vpop.f32.mrf.mxu0  ;;  %v9033_v2 = vld [vmem:[%s11676_s2 + $0x200] ss:$16 sps:$4 sm:$0xff]  }
 0x2ea   : > { %v3318_v31 = vpop.f32.mrf.mxu1  ;;  %v9036_v50 = vld [vmem:[%s11676_s2 + $0x208] ss:$16 sps:$4 sm:$0xff]  }
 0x2eb   : > { %11745 = vst [vmem:[#allocation70_spill] sm:$0xff] %v10131_v47  ;;  %v2776_v46 = vpop.f32.mrf.mxu0  ;;  %4825 = vmatmul.mubr.bf16.gmra.mxu0 %v9027_v30  ;;  %v9041_v30 = vld [vmem:[%s11676_s2 + $0x224] ss:$16 sps:$4 sm:$0xff]  }
 0x2ec   : > { %v3321_v38 = vpop.f32.mrf.mxu1  ;;  %5370 = vmatmul.mubr.bf16.gmra.mxu1 %v9030_v55  ;;  %4832 = vmatprep.mubr.bf16.mxu0 %v9035_v42 }
 0x2ed   : > { %v10136_v24 = vadd.f32 %v3321_v38, %v2776_v46  ;;  %v2778_v23 = vpop.f32.mrf.mxu0  ;;  %5377 = vmatprep.mubr.bf16.mxu1 %v9038_v57 }
 0x2ee   : > { %v3323_v22 = vpop.f32.mrf.mxu1 }
 0x2ef   : > { %11746 = vst [vmem:[#allocation71_spill] sm:$0xff] %v10136_v24  ;;  %v2779_v19 = vpop.f32.mrf.mxu0  ;;  %v9044_v22 = vld [vmem:[%s11676_s2 + $0x22c] ss:$16 sps:$4 sm:$0xff]  }
 0x2f0   : > { %v3324_v0 = vpop.f32.mrf.mxu1 }
 0x2f1   : > { %v10147_v55 = vadd.f32 %v3324_v0, %v2779_v19  ;;  %v2781_v42 = vpop.f32.mrf.mxu0  ;;  %v9039_v19 = vld [vmem:[%s11676_s2 + $0x220] ss:$16 sps:$4 sm:$0xff]  }
 0x2f2   : > { %v3326_v57 = vpop.f32.mrf.mxu1  ;;  %v9042_v42 = vld [vmem:[%s11676_s2 + $0x228] ss:$16 sps:$4 sm:$0xff]  }
 0x2f3   : > { %11747 = vst [vmem:[#allocation72_spill] sm:$0xff] %v10147_v55  ;;  %v2784_v31 = vpop.f32.mrf.mxu0  ;;  %4833 = vmatmul.mubr.bf16.gmra.mxu0 %v9033_v2  ;;  %v9047_v2 = vld [vmem:[%s11676_s2 + $0x244] ss:$16 sps:$4 sm:$0xff]  }
 0x2f4   : > { %v3329_v46 = vpop.f32.mrf.mxu1  ;;  %5378 = vmatmul.mubr.bf16.gmra.mxu1 %v9036_v50  ;;  %4840 = vmatprep.mubr.bf16.mxu0 %v9041_v30 }
 0x2f5   : > { %v10152_v38 = vadd.f32 %v3329_v46, %v2784_v31  ;;  %v2786_v23 = vpop.f32.mrf.mxu0  ;;  %5385 = vmatprep.mubr.bf16.mxu1 %v9044_v22 }
 0x2f6   : > { %v3331_v24 = vpop.f32.mrf.mxu1 }
 0x2f7   : > { %11748 = vst [vmem:[#allocation73_spill] sm:$0xff] %v10152_v38  ;;  %v2787_v47 = vpop.f32.mrf.mxu0  ;;  %v9050_v24 = vld [vmem:[%s11676_s2 + $0x24c] ss:$16 sps:$4 sm:$0xff]  }
 0x2f8   : > { %v3332_v0 = vpop.f32.mrf.mxu1 }
 0x2f9   : > { %v10163_v50 = vadd.f32 %v3332_v0, %v2787_v47  ;;  %v2789_v30 = vpop.f32.mrf.mxu0  ;;  %v9045_v47 = vld [vmem:[%s11676_s2 + $0x240] ss:$16 sps:$4 sm:$0xff]  }
 0x2fa   : > { %v3334_v22 = vpop.f32.mrf.mxu1  ;;  %v9048_v30 = vld [vmem:[%s11676_s2 + $0x248] ss:$16 sps:$4 sm:$0xff]  }
 0x2fb   : > { %11749 = vst [vmem:[#allocation74_spill] sm:$0xff] %v10163_v50  ;;  %v2792_v57 = vpop.f32.mrf.mxu0  ;;  %4841 = vmatmul.mubr.bf16.gmra.mxu0 %v9039_v19  ;;  %v9053_v19 = vld [vmem:[%s11676_s2 + $0x264] ss:$16 sps:$4 sm:$0xff]  }
 0x2fc   : > { %v3337_v31 = vpop.f32.mrf.mxu1  ;;  %5386 = vmatmul.mubr.bf16.gmra.mxu1 %v9042_v42  ;;  %4848 = vmatprep.mubr.bf16.mxu0 %v9047_v2 }
 0x2fd   : > { %v10168_v46 = vadd.f32 %v3337_v31, %v2792_v57  ;;  %v2794_v23 = vpop.f32.mrf.mxu0  ;;  %5393 = vmatprep.mubr.bf16.mxu1 %v9050_v24 }
 0x2fe   : > { %v3339_v38 = vpop.f32.mrf.mxu1 }
 0x2ff   : > { %11750 = vst [vmem:[#allocation75_spill] sm:$0xff] %v10168_v46  ;;  %v2795_v55 = vpop.f32.mrf.mxu0  ;;  %v9056_v38 = vld [vmem:[%s11676_s2 + $0x26c] ss:$16 sps:$4 sm:$0xff]  }
 0x300   : > { %v3340_v0 = vpop.f32.mrf.mxu1 }
 0x301   : > { %v10179_v42 = vadd.f32 %v3340_v0, %v2795_v55  ;;  %v2797_v2 = vpop.f32.mrf.mxu0  ;;  %v9051_v55 = vld [vmem:[%s11676_s2 + $0x260] ss:$16 sps:$4 sm:$0xff]  }
 0x302   : > { %v3342_v24 = vpop.f32.mrf.mxu1  ;;  %v9054_v2 = vld [vmem:[%s11676_s2 + $0x268] ss:$16 sps:$4 sm:$0xff]  }
 0x303   : > { %11751 = vst [vmem:[#allocation76_spill] sm:$0xff] %v10179_v42  ;;  %v2800_v22 = vpop.f32.mrf.mxu0  ;;  %4849 = vmatmul.mubr.bf16.gmra.mxu0 %v9045_v47  ;;  %v9059_v47 = vld [vmem:[%s11676_s2 + $0x284] ss:$16 sps:$4 sm:$0xff]  }
 0x304   : > { %v3345_v57 = vpop.f32.mrf.mxu1  ;;  %5394 = vmatmul.mubr.bf16.gmra.mxu1 %v9048_v30  ;;  %4856 = vmatprep.mubr.bf16.mxu0 %v9053_v19 }
 0x305   : > { %v10184_v31 = vadd.f32 %v3345_v57, %v2800_v22  ;;  %v2802_v23 = vpop.f32.mrf.mxu0  ;;  %5401 = vmatprep.mubr.bf16.mxu1 %v9056_v38 }
 0x306   : > { %v3347_v46 = vpop.f32.mrf.mxu1 }
 0x307   : > { %11752 = vst [vmem:[#allocation77_spill] sm:$0xff] %v10184_v31  ;;  %v2803_v50 = vpop.f32.mrf.mxu0  ;;  %v9062_v46 = vld [vmem:[%s11676_s2 + $0x28c] ss:$16 sps:$4 sm:$0xff]  }
 0x308   : > { %v3348_v0 = vpop.f32.mrf.mxu1 }
 0x309   : > { %v10195_v30 = vadd.f32 %v3348_v0, %v2803_v50  ;;  %v2805_v19 = vpop.f32.mrf.mxu0  ;;  %v9057_v50 = vld [vmem:[%s11676_s2 + $0x280] ss:$16 sps:$4 sm:$0xff]  }
 0x30a   : > { %v3350_v38 = vpop.f32.mrf.mxu1  ;;  %v9060_v19 = vld [vmem:[%s11676_s2 + $0x288] ss:$16 sps:$4 sm:$0xff]  }
 0x30b   : > { %11753 = vst [vmem:[#allocation78_spill] sm:$0xff] %v10195_v30  ;;  %v2808_v24 = vpop.f32.mrf.mxu0  ;;  %4857 = vmatmul.mubr.bf16.gmra.mxu0 %v9051_v55  ;;  %v9065_v55 = vld [vmem:[%s11676_s2 + $0x2a4] ss:$16 sps:$4 sm:$0xff]  }
 0x30c   : > { %v3353_v22 = vpop.f32.mrf.mxu1  ;;  %5402 = vmatmul.mubr.bf16.gmra.mxu1 %v9054_v2  ;;  %4864 = vmatprep.mubr.bf16.mxu0 %v9059_v47 }
 0x30d   : > { %v10200_v57 = vadd.f32 %v3353_v22, %v2808_v24  ;;  %v2810_v23 = vpop.f32.mrf.mxu0  ;;  %5409 = vmatprep.mubr.bf16.mxu1 %v9062_v46 }
 0x30e   : > { %v3355_v31 = vpop.f32.mrf.mxu1 }
 0x30f   : > { %11754 = vst [vmem:[#allocation79_spill] sm:$0xff] %v10200_v57  ;;  %v2811_v42 = vpop.f32.mrf.mxu0  ;;  %v9068_v31 = vld [vmem:[%s11676_s2 + $0x2ac] ss:$16 sps:$4 sm:$0xff]  }
 0x310   : > { %v3356_v0 = vpop.f32.mrf.mxu1 }
 0x311   : > { %v10211_v2 = vadd.f32 %v3356_v0, %v2811_v42  ;;  %v2813_v47 = vpop.f32.mrf.mxu0  ;;  %v9063_v42 = vld [vmem:[%s11676_s2 + $0x2a0] ss:$16 sps:$4 sm:$0xff]  }
 0x312   : > { %v3358_v46 = vpop.f32.mrf.mxu1  ;;  %v9066_v47 = vld [vmem:[%s11676_s2 + $0x2a8] ss:$16 sps:$4 sm:$0xff]  }
 0x313   : > { %11755 = vst [vmem:[#allocation80_spill] sm:$0xff] %v10211_v2  ;;  %v2816_v38 = vpop.f32.mrf.mxu0  ;;  %4865 = vmatmul.mubr.bf16.gmra.mxu0 %v9057_v50  ;;  %v9071_v50 = vld [vmem:[%s11676_s2 + $0x2c4] ss:$16 sps:$4 sm:$0xff]  }
 0x314   : > { %v3361_v24 = vpop.f32.mrf.mxu1  ;;  %5410 = vmatmul.mubr.bf16.gmra.mxu1 %v9060_v19  ;;  %4872 = vmatprep.mubr.bf16.mxu0 %v9065_v55 }
 0x315   : > { %v10216_v22 = vadd.f32 %v3361_v24, %v2816_v38  ;;  %v2818_v23 = vpop.f32.mrf.mxu0  ;;  %5417 = vmatprep.mubr.bf16.mxu1 %v9068_v31 }
 0x316   : > { %v3363_v57 = vpop.f32.mrf.mxu1 }
 0x317   : > { %11756 = vst [vmem:[#allocation81_spill] sm:$0xff] %v10216_v22  ;;  %v2819_v30 = vpop.f32.mrf.mxu0  ;;  %v9074_v57 = vld [vmem:[%s11676_s2 + $0x2cc] ss:$16 sps:$4 sm:$0xff]  }
 0x318   : > { %v3364_v0 = vpop.f32.mrf.mxu1 }
 0x319   : > { %v10227_v19 = vadd.f32 %v3364_v0, %v2819_v30  ;;  %v2821_v55 = vpop.f32.mrf.mxu0  ;;  %v9069_v30 = vld [vmem:[%s11676_s2 + $0x2c0] ss:$16 sps:$4 sm:$0xff]  }
 0x31a   : > { %v3366_v31 = vpop.f32.mrf.mxu1  ;;  %v9072_v55 = vld [vmem:[%s11676_s2 + $0x2c8] ss:$16 sps:$4 sm:$0xff]  }
 0x31b   : > { %11757 = vst [vmem:[#allocation82_spill] sm:$0xff] %v10227_v19  ;;  %v2824_v46 = vpop.f32.mrf.mxu0  ;;  %4873 = vmatmul.mubr.bf16.gmra.mxu0 %v9063_v42  ;;  %v9077_v42 = vld [vmem:[%s11676_s2 + $0x2e4] ss:$16 sps:$4 sm:$0xff]  }
 0x31c   : > { %v3369_v38 = vpop.f32.mrf.mxu1  ;;  %5418 = vmatmul.mubr.bf16.gmra.mxu1 %v9066_v47  ;;  %4880 = vmatprep.mubr.bf16.mxu0 %v9071_v50 }
 0x31d   : > { %v10232_v24 = vadd.f32 %v3369_v38, %v2824_v46  ;;  %v2826_v23 = vpop.f32.mrf.mxu0  ;;  %5425 = vmatprep.mubr.bf16.mxu1 %v9074_v57 }
 0x31e   : > { %v3371_v22 = vpop.f32.mrf.mxu1 }
 0x31f   : > { %11758 = vst [vmem:[#allocation83_spill] sm:$0xff] %v10232_v24  ;;  %v2827_v2 = vpop.f32.mrf.mxu0  ;;  %v9080_v22 = vld [vmem:[%s11676_s2 + $0x2ec] ss:$16 sps:$4 sm:$0xff]  }
 0x320   : > { %v3372_v0 = vpop.f32.mrf.mxu1 }
 0x321   : > { %v10243_v47 = vadd.f32 %v3372_v0, %v2827_v2  ;;  %v2829_v50 = vpop.f32.mrf.mxu0  ;;  %v9075_v2 = vld [vmem:[%s11676_s2 + $0x2e0] ss:$16 sps:$4 sm:$0xff]  }
 0x322   : > { %v3374_v57 = vpop.f32.mrf.mxu1  ;;  %v9078_v50 = vld [vmem:[%s11676_s2 + $0x2e8] ss:$16 sps:$4 sm:$0xff]  }
 0x323   : > { %11759 = vst [vmem:[#allocation84_spill] sm:$0xff] %v10243_v47  ;;  %v2832_v31 = vpop.f32.mrf.mxu0  ;;  %4881 = vmatmul.mubr.bf16.gmra.mxu0 %v9069_v30  ;;  %v9083_v30 = vld [vmem:[%s11676_s2 + $0x304] ss:$16 sps:$4 sm:$0xff]  }
 0x324   : > { %v3377_v46 = vpop.f32.mrf.mxu1  ;;  %5426 = vmatmul.mubr.bf16.gmra.mxu1 %v9072_v55  ;;  %4888 = vmatprep.mubr.bf16.mxu0 %v9077_v42 }
 0x325   : > { %v10248_v38 = vadd.f32 %v3377_v46, %v2832_v31  ;;  %v2834_v23 = vpop.f32.mrf.mxu0  ;;  %5433 = vmatprep.mubr.bf16.mxu1 %v9080_v22 }
 0x326   : > { %v3379_v24 = vpop.f32.mrf.mxu1 }
 0x327   : > { %11760 = vst [vmem:[#allocation85_spill] sm:$0xff] %v10248_v38  ;;  %v2835_v19 = vpop.f32.mrf.mxu0  ;;  %v9086_v24 = vld [vmem:[%s11676_s2 + $0x30c] ss:$16 sps:$4 sm:$0xff]  }
 0x328   : > { %v3380_v0 = vpop.f32.mrf.mxu1 }
 0x329   : > { %v10259_v55 = vadd.f32 %v3380_v0, %v2835_v19  ;;  %v2837_v42 = vpop.f32.mrf.mxu0  ;;  %v9081_v19 = vld [vmem:[%s11676_s2 + $0x300] ss:$16 sps:$4 sm:$0xff]  }
 0x32a   : > { %v3382_v22 = vpop.f32.mrf.mxu1  ;;  %v9084_v42 = vld [vmem:[%s11676_s2 + $0x308] ss:$16 sps:$4 sm:$0xff]  }
 0x32b   : > { %11761 = vst [vmem:[#allocation86_spill] sm:$0xff] %v10259_v55  ;;  %v2840_v57 = vpop.f32.mrf.mxu0  ;;  %4889 = vmatmul.mubr.bf16.gmra.mxu0 %v9075_v2  ;;  %v9089_v2 = vld [vmem:[%s11676_s2 + $0x324] ss:$16 sps:$4 sm:$0xff]  }
 0x32c   : > { %v3385_v31 = vpop.f32.mrf.mxu1  ;;  %5434 = vmatmul.mubr.bf16.gmra.mxu1 %v9078_v50  ;;  %4896 = vmatprep.mubr.bf16.mxu0 %v9083_v30 }
 0x32d   : > { %v10264_v46 = vadd.f32 %v3385_v31, %v2840_v57  ;;  %v2842_v23 = vpop.f32.mrf.mxu0  ;;  %5441 = vmatprep.mubr.bf16.mxu1 %v9086_v24 }
 0x32e   : > { %v3387_v38 = vpop.f32.mrf.mxu1 }
 0x32f   : > { %11762 = vst [vmem:[#allocation87_spill] sm:$0xff] %v10264_v46  ;;  %v2843_v47 = vpop.f32.mrf.mxu0  ;;  %v9092_v38 = vld [vmem:[%s11676_s2 + $0x32c] ss:$16 sps:$4 sm:$0xff]  }
 0x330   : > { %v3388_v0 = vpop.f32.mrf.mxu1 }
 0x331   : > { %v10275_v50 = vadd.f32 %v3388_v0, %v2843_v47  ;;  %v2845_v30 = vpop.f32.mrf.mxu0  ;;  %v9087_v0 = vld [vmem:[%s11676_s2 + $0x320] ss:$16 sps:$4 sm:$0xff]  }
 0x332   : > { %v3390_v24 = vpop.f32.mrf.mxu1 }
 0x333   : > { %11763 = vst [vmem:[#allocation88_spill] sm:$0xff] %v10275_v50  ;;  %v4706_v22 = vpop.f32.mrf.mxu0  ;;  %4897 = vmatmul.mubr.bf16.gmra.mxu0 %v9081_v19  ;;  %v9095_v19 = vld [vmem:[%s11676_s2 + $0x344] ss:$16 sps:$4 sm:$0xff]  }
 0x334   : > { %v4707_v57 = vadd.f32 %v4706_v22, %v9617_v12  ;;  %v5251_v31 = vpop.f32.mrf.mxu1  ;;  %5442 = vmatmul.mubr.bf16.gmra.mxu1 %v9084_v42  ;;  %4904 = vmatprep.mubr.bf16.mxu0 %v9089_v2  ;;  %v9090_v12 = vld [vmem:[%s11676_s2 + $0x328] ss:$16 sps:$4 sm:$0xff]  }
 0x335   : > { %v4708_v23 = vpop.f32.mrf.mxu0  ;;  %5449 = vmatprep.mubr.bf16.mxu1 %v9092_v38 }
 0x336   : > { %v10281_v46 = vadd.f32 %v5251_v31, %v4707_v57  ;;  %v5253_v55 = vpop.f32.mrf.mxu1 }
 0x337   : > { %v4709_v47 = vpop.f32.mrf.mxu0  ;;  %v9098_v55 = vld [vmem:[%s11676_s2 + $0x34c] ss:$16 sps:$4 sm:$0xff]  }
 0x338   : > { %v4710_v30 = vadd.f32 %v4709_v47, %v9619_v20  ;;  %v5254_v24 = vpop.f32.mrf.mxu1 }
 0x339   : > { %v4711_v42 = vpop.f32.mrf.mxu0 }
 0x33a   : > { %v10296_v2 = vadd.f32 %v5254_v24, %v4710_v30  ;;  %v5256_v38 = vpop.f32.mrf.mxu1  ;;  %v9093_v30 = vld [vmem:[%s11676_s2 + $0x340] ss:$16 sps:$4 sm:$0xff]  }
 0x33b   : > { %v4714_v22 = vpop.f32.mrf.mxu0  ;;  %4905 = vmatmul.mubr.bf16.gmra.mxu0 %v9087_v0 }
 0x33c   : > { %v4715_v57 = vadd.f32 %v4714_v22, %v9621_v26  ;;  %v5259_v31 = vpop.f32.mrf.mxu1  ;;  %5450 = vmatmul.mubr.bf16.gmra.mxu1 %v9090_v12  ;;  %4912 = vmatprep.mubr.bf16.mxu0 %v9095_v19  ;;  %v9096_v26 = vld [vmem:[%s11676_s2 + $0x348] ss:$16 sps:$4 sm:$0xff]   ;;  %v9101_v12 = vld [vmem:[%s11676_s2 + $0x364] ss:$16 sps:$4 sm:$0xff]  }
 0x33d   : > { %v4716_v23 = vpop.f32.mrf.mxu0  ;;  %5457 = vmatprep.mubr.bf16.mxu1 %v9098_v55  ;;  %v9104_v55 = vld [vmem:[%s11676_s2 + $0x36c] ss:$16 sps:$4 sm:$0xff]  }
 0x33e   : > { %v10301_v47 = vadd.f32 %v5259_v31, %v4715_v57  ;;  %v5261_v42 = vpop.f32.mrf.mxu1 }
 0x33f   : > { %v4717_v50 = vpop.f32.mrf.mxu0 }
 0x340   : > { %v4718_v0 = vadd.f32 %v4717_v50, %v9623_v34  ;;  %v5262_v24 = vpop.f32.mrf.mxu1 }
 0x341   : > { %v4719_v19 = vpop.f32.mrf.mxu0 }
 0x342   : > { %v10316_v38 = vadd.f32 %v5262_v24, %v4718_v0  ;;  %v5264_v22 = vpop.f32.mrf.mxu1  ;;  %v9099_v0 = vld [vmem:[%s11676_s2 + $0x360] ss:$16 sps:$4 sm:$0xff]  }
 0x343   : > { %v4722_v57 = vpop.f32.mrf.mxu0  ;;  %4913 = vmatmul.mubr.bf16.gmra.mxu0 %v9093_v30 }
 0x344   : > { %v4723_v50 = vadd.f32 %v4722_v57, %v9625_v40  ;;  %v5267_v31 = vpop.f32.mrf.mxu1  ;;  %5458 = vmatmul.mubr.bf16.gmra.mxu1 %v9096_v26  ;;  %4920 = vmatprep.mubr.bf16.mxu0 %v9101_v12  ;;  %v9102_v40 = vld [vmem:[%s11676_s2 + $0x368] ss:$16 sps:$4 sm:$0xff]   ;;  %v9107_v26 = vld [vmem:[%s11676_s2 + $0x384] ss:$16 sps:$4 sm:$0xff]  }
 0x345   : > { %v4724_v23 = vpop.f32.mrf.mxu0  ;;  %5465 = vmatprep.mubr.bf16.mxu1 %v9104_v55  ;;  %v9110_v55 = vld [vmem:[%s11676_s2 + $0x38c] ss:$16 sps:$4 sm:$0xff]  }
 0x346   : > { %v10321_v42 = vadd.f32 %v5267_v31, %v4723_v50  ;;  %v5269_v19 = vpop.f32.mrf.mxu1 }
 0x347   : > { %v4725_v20 = vpop.f32.mrf.mxu0 }
 0x348   : > { %v4726_v30 = vadd.f32 %v4725_v20, %v9627_v48  ;;  %v5270_v24 = vpop.f32.mrf.mxu1 }
 0x349   : > { %v4727_v12 = vpop.f32.mrf.mxu0 }
 0x34a   : > { %v10336_v22 = vadd.f32 %v5270_v24, %v4726_v30  ;;  %v5272_v57 = vpop.f32.mrf.mxu1  ;;  %v9105_v30 = vld [vmem:[%s11676_s2 + $0x380] ss:$16 sps:$4 sm:$0xff]  }
 0x34b   : > { %v4730_v50 = vpop.f32.mrf.mxu0  ;;  %4921 = vmatmul.mubr.bf16.gmra.mxu0 %v9099_v0 }
 0x34c   : > { %v4731_v20 = vadd.f32 %v4730_v50, %v9629_v54  ;;  %v5275_v31 = vpop.f32.mrf.mxu1  ;;  %5466 = vmatmul.mubr.bf16.gmra.mxu1 %v9102_v40  ;;  %4928 = vmatprep.mubr.bf16.mxu0 %v9107_v26  ;;  %v9108_v54 = vld [vmem:[%s11676_s2 + $0x388] ss:$16 sps:$4 sm:$0xff]   ;;  %v9113_v40 = vld [vmem:[%s11676_s2 + $0x3a4] ss:$16 sps:$4 sm:$0xff]  }
 0x34d   : > { %v4732_v23 = vpop.f32.mrf.mxu0  ;;  %5473 = vmatprep.mubr.bf16.mxu1 %v9110_v55  ;;  %v9116_v55 = vld [vmem:[%s11676_s2 + $0x3ac] ss:$16 sps:$4 sm:$0xff]  }
 0x34e   : > { %v10341_v19 = vadd.f32 %v5275_v31, %v4731_v20  ;;  %v5277_v12 = vpop.f32.mrf.mxu1 }
 0x34f   : > { %v4733_v34 = vpop.f32.mrf.mxu0 }
 0x350   : > { %v4734_v0 = vadd.f32 %v4733_v34, %v9631_v62  ;;  %v5278_v24 = vpop.f32.mrf.mxu1 }
 0x351   : > { %v4735_v26 = vpop.f32.mrf.mxu0 }
 0x352   : > { %v10356_v57 = vadd.f32 %v5278_v24, %v4734_v0  ;;  %v5280_v50 = vpop.f32.mrf.mxu1  ;;  %v9111_v0 = vld [vmem:[%s11676_s2 + $0x3a0] ss:$16 sps:$4 sm:$0xff]  }
 0x353   : > { %v4738_v20 = vpop.f32.mrf.mxu0  ;;  %4929 = vmatmul.mubr.bf16.gmra.mxu0 %v9105_v30 }
 0x354   : > { %v4739_v34 = vadd.f32 %v4738_v20, %v9640_v5  ;;  %v5283_v31 = vpop.f32.mrf.mxu1  ;;  %5474 = vmatmul.mubr.bf16.gmra.mxu1 %v9108_v54  ;;  %4936 = vmatprep.mubr.bf16.mxu0 %v9113_v40  ;;  %v9114_v5 = vld [vmem:[%s11676_s2 + $0x3a8] ss:$16 sps:$4 sm:$0xff]   ;;  %v9119_v54 = vld [vmem:[%s11676_s2 + $0x3c4] ss:$16 sps:$4 sm:$0xff]  }
 0x355   : > { %v4740_v23 = vpop.f32.mrf.mxu0  ;;  %5481 = vmatprep.mubr.bf16.mxu1 %v9116_v55  ;;  %v9122_v55 = vld [vmem:[%s11676_s2 + $0x3cc] ss:$16 sps:$4 sm:$0xff]  }
 0x356   : > { %v10361_v12 = vadd.f32 %v5283_v31, %v4739_v34  ;;  %v5285_v26 = vpop.f32.mrf.mxu1 }
 0x357   : > { %v4741_v48 = vpop.f32.mrf.mxu0 }
 0x358   : > { %v4742_v30 = vadd.f32 %v4741_v48, %v9646_v21  ;;  %v5286_v24 = vpop.f32.mrf.mxu1 }
 0x359   : > { %v4743_v40 = vpop.f32.mrf.mxu0 }
 0x35a   : > { %v10376_v50 = vadd.f32 %v5286_v24, %v4742_v30  ;;  %v5288_v20 = vpop.f32.mrf.mxu1  ;;  %v9117_v30 = vld [vmem:[%s11676_s2 + $0x3c0] ss:$16 sps:$4 sm:$0xff]  }
 0x35b   : > { %v4746_v34 = vpop.f32.mrf.mxu0  ;;  %4937 = vmatmul.mubr.bf16.gmra.mxu0 %v9111_v0 }
 0x35c   : > { %v4747_v48 = vadd.f32 %v4746_v34, %v9650_v28  ;;  %v5291_v31 = vpop.f32.mrf.mxu1  ;;  %5482 = vmatmul.mubr.bf16.gmra.mxu1 %v9114_v5  ;;  %4944 = vmatprep.mubr.bf16.mxu0 %v9119_v54  ;;  %v9120_v28 = vld [vmem:[%s11676_s2 + $0x3c8] ss:$16 sps:$4 sm:$0xff]   ;;  %v9125_v5 = vld [vmem:[%s11676_s2 + $0x3e4] ss:$16 sps:$4 sm:$0xff]  }
 0x35d   : > { %v4748_v23 = vpop.f32.mrf.mxu0  ;;  %5489 = vmatprep.mubr.bf16.mxu1 %v9122_v55  ;;  %v9128_v55 = vld [vmem:[%s11676_s2 + $0x3ec] ss:$16 sps:$4 sm:$0xff]  }
 0x35e   : > { %v10381_v26 = vadd.f32 %v5291_v31, %v4747_v48  ;;  %v5293_v40 = vpop.f32.mrf.mxu1 }
 0x35f   : > { %v4749_v62 = vpop.f32.mrf.mxu0 }
 0x360   : > { %v4750_v0 = vadd.f32 %v4749_v62, %v9652_v37  ;;  %v5294_v24 = vpop.f32.mrf.mxu1 }
 0x361   : > { %v4751_v54 = vpop.f32.mrf.mxu0 }
 0x362   : > { %v10396_v20 = vadd.f32 %v5294_v24, %v4750_v0  ;;  %v5296_v34 = vpop.f32.mrf.mxu1  ;;  %v9123_v0 = vld [vmem:[%s11676_s2 + $0x3e0] ss:$16 sps:$4 sm:$0xff]  }
 0x363   : > { %v4754_v48 = vpop.f32.mrf.mxu0  ;;  %4945 = vmatmul.mubr.bf16.gmra.mxu0 %v9117_v30 }
 0x364   : > { %v4755_v62 = vadd.f32 %v4754_v48, %v9654_v44  ;;  %v5299_v31 = vpop.f32.mrf.mxu1  ;;  %5490 = vmatmul.mubr.bf16.gmra.mxu1 %v9120_v28  ;;  %4952 = vmatprep.mubr.bf16.mxu0 %v9125_v5  ;;  %v9126_v44 = vld [vmem:[%s11676_s2 + $0x3e8] ss:$16 sps:$4 sm:$0xff]   ;;  %v9131_v28 = vld [vmem:[%s11676_s2 + $0x404] ss:$16 sps:$4 sm:$0xff]  }
 0x365   : > { %v4756_v23 = vpop.f32.mrf.mxu0  ;;  %5497 = vmatprep.mubr.bf16.mxu1 %v9128_v55  ;;  %v9134_v55 = vld [vmem:[%s11676_s2 + $0x40c] ss:$16 sps:$4 sm:$0xff]  }
 0x366   : > { %v10401_v40 = vadd.f32 %v5299_v31, %v4755_v62  ;;  %v5301_v54 = vpop.f32.mrf.mxu1 }
 0x367   : > { %v4757_v21 = vpop.f32.mrf.mxu0 }
 0x368   : > { %v4758_v30 = vadd.f32 %v4757_v21, %v9656_v53  ;;  %v5302_v24 = vpop.f32.mrf.mxu1 }
 0x369   : > { %v4759_v5 = vpop.f32.mrf.mxu0 }
 0x36a   : > { %v10416_v34 = vadd.f32 %v5302_v24, %v4758_v30  ;;  %v5304_v48 = vpop.f32.mrf.mxu1  ;;  %v9129_v30 = vld [vmem:[%s11676_s2 + $0x400] ss:$16 sps:$4 sm:$0xff]  }
 0x36b   : > { %v4762_v62 = vpop.f32.mrf.mxu0  ;;  %4953 = vmatmul.mubr.bf16.gmra.mxu0 %v9123_v0 }
 0x36c   : > { %v4763_v21 = vadd.f32 %v4762_v62, %v9658_v60  ;;  %v5307_v31 = vpop.f32.mrf.mxu1  ;;  %5498 = vmatmul.mubr.bf16.gmra.mxu1 %v9126_v44  ;;  %4960 = vmatprep.mubr.bf16.mxu0 %v9131_v28  ;;  %v9132_v60 = vld [vmem:[%s11676_s2 + $0x408] ss:$16 sps:$4 sm:$0xff]   ;;  %v9137_v44 = vld [vmem:[%s11676_s2 + $0x424] ss:$16 sps:$4 sm:$0xff]  }
 0x36d   : > { %v4764_v23 = vpop.f32.mrf.mxu0  ;;  %5505 = vmatprep.mubr.bf16.mxu1 %v9134_v55  ;;  %v9140_v55 = vld [vmem:[%s11676_s2 + $0x42c] ss:$16 sps:$4 sm:$0xff]  }
 0x36e   : > { %v10421_v54 = vadd.f32 %v5307_v31, %v4763_v21  ;;  %v5309_v5 = vpop.f32.mrf.mxu1 }
 0x36f   : > { %v4765_v37 = vpop.f32.mrf.mxu0 }
 0x370   : > { %v4766_v0 = vadd.f32 %v4765_v37, %v9660_v7  ;;  %v5310_v24 = vpop.f32.mrf.mxu1 }
 0x371   : > { %v4767_v28 = vpop.f32.mrf.mxu0 }
 0x372   : > { %v10436_v48 = vadd.f32 %v5310_v24, %v4766_v0  ;;  %v5312_v62 = vpop.f32.mrf.mxu1  ;;  %v9135_v0 = vld [vmem:[%s11676_s2 + $0x420] ss:$16 sps:$4 sm:$0xff]  }
 0x373   : > { %v4770_v21 = vpop.f32.mrf.mxu0  ;;  %4961 = vmatmul.mubr.bf16.gmra.mxu0 %v9129_v30 }
 0x374   : > { %v4771_v37 = vadd.f32 %v4770_v21, %v9662_v14  ;;  %v5315_v31 = vpop.f32.mrf.mxu1  ;;  %5506 = vmatmul.mubr.bf16.gmra.mxu1 %v9132_v60  ;;  %4968 = vmatprep.mubr.bf16.mxu0 %v9137_v44  ;;  %v9138_v14 = vld [vmem:[%s11676_s2 + $0x428] ss:$16 sps:$4 sm:$0xff]   ;;  %v9143_v60 = vld [vmem:[%s11676_s2 + $0x444] ss:$16 sps:$4 sm:$0xff]  }
 0x375   : > { %v4772_v23 = vpop.f32.mrf.mxu0  ;;  %5513 = vmatprep.mubr.bf16.mxu1 %v9140_v55  ;;  %v9146_v55 = vld [vmem:[%s11676_s2 + $0x44c] ss:$16 sps:$4 sm:$0xff]  }
 0x376   : > { %v10441_v5 = vadd.f32 %v5315_v31, %v4771_v37  ;;  %v5317_v28 = vpop.f32.mrf.mxu1 }
 0x377   : > { %v4773_v53 = vpop.f32.mrf.mxu0 }
 0x378   : > { %v4774_v30 = vadd.f32 %v4773_v53, %v9668_v32  ;;  %v5318_v24 = vpop.f32.mrf.mxu1 }
 0x379   : > { %v4775_v44 = vpop.f32.mrf.mxu0 }
 0x37a   : > { %v10456_v62 = vadd.f32 %v5318_v24, %v4774_v30  ;;  %v5320_v21 = vpop.f32.mrf.mxu1  ;;  %v9141_v30 = vld [vmem:[%s11676_s2 + $0x440] ss:$16 sps:$4 sm:$0xff]  }
 0x37b   : > { %v4778_v37 = vpop.f32.mrf.mxu0  ;;  %4969 = vmatmul.mubr.bf16.gmra.mxu0 %v9135_v0 }
 0x37c   : > { %v4779_v53 = vadd.f32 %v4778_v37, %v9672_v41  ;;  %v5323_v31 = vpop.f32.mrf.mxu1  ;;  %5514 = vmatmul.mubr.bf16.gmra.mxu1 %v9138_v14  ;;  %4976 = vmatprep.mubr.bf16.mxu0 %v9143_v60  ;;  %v9144_v41 = vld [vmem:[%s11676_s2 + $0x448] ss:$16 sps:$4 sm:$0xff]   ;;  %v9149_v14 = vld [vmem:[%s11676_s2 + $0x464] ss:$16 sps:$4 sm:$0xff]  }
 0x37d   : > { %v4780_v23 = vpop.f32.mrf.mxu0  ;;  %5521 = vmatprep.mubr.bf16.mxu1 %v9146_v55  ;;  %v9152_v55 = vld [vmem:[%s11676_s2 + $0x46c] ss:$16 sps:$4 sm:$0xff]  }
 0x37e   : > { %v10461_v28 = vadd.f32 %v5323_v31, %v4779_v53  ;;  %v5325_v44 = vpop.f32.mrf.mxu1 }
 0x37f   : > { %v4781_v7 = vpop.f32.mrf.mxu0 }
 0x380   : > { %v4782_v0 = vadd.f32 %v4781_v7, %v9674_v51  ;;  %v5326_v24 = vpop.f32.mrf.mxu1 }
 0x381   : > { %v4783_v60 = vpop.f32.mrf.mxu0 }
 0x382   : > { %v10476_v21 = vadd.f32 %v5326_v24, %v4782_v0  ;;  %v5328_v37 = vpop.f32.mrf.mxu1  ;;  %v9147_v0 = vld [vmem:[%s11676_s2 + $0x460] ss:$16 sps:$4 sm:$0xff]  }
 0x383   : > { %v4786_v53 = vpop.f32.mrf.mxu0  ;;  %4977 = vmatmul.mubr.bf16.gmra.mxu0 %v9141_v30 }
 0x384   : > { %v4787_v7 = vadd.f32 %v4786_v53, %v9676_v59  ;;  %v5331_v31 = vpop.f32.mrf.mxu1  ;;  %5522 = vmatmul.mubr.bf16.gmra.mxu1 %v9144_v41  ;;  %4984 = vmatprep.mubr.bf16.mxu0 %v9149_v14  ;;  %v9150_v59 = vld [vmem:[%s11676_s2 + $0x468] ss:$16 sps:$4 sm:$0xff]   ;;  %v9155_v41 = vld [vmem:[%s11676_s2 + $0x484] ss:$16 sps:$4 sm:$0xff]  }
 0x385   : > { %v4788_v23 = vpop.f32.mrf.mxu0  ;;  %5529 = vmatprep.mubr.bf16.mxu1 %v9152_v55  ;;  %v9158_v55 = vld [vmem:[%s11676_s2 + $0x48c] ss:$16 sps:$4 sm:$0xff]  }
 0x386   : > { %v10481_v44 = vadd.f32 %v5331_v31, %v4787_v7  ;;  %v5333_v60 = vpop.f32.mrf.mxu1 }
 0x387   : > { %v4789_v32 = vpop.f32.mrf.mxu0 }
 0x388   : > { %v4790_v30 = vadd.f32 %v4789_v32, %v9678_v8  ;;  %v5334_v24 = vpop.f32.mrf.mxu1 }
 0x389   : > { %v4791_v14 = vpop.f32.mrf.mxu0 }
 0x38a   : > { %v10496_v37 = vadd.f32 %v5334_v24, %v4790_v30  ;;  %v5336_v53 = vpop.f32.mrf.mxu1  ;;  %v9153_v30 = vld [vmem:[%s11676_s2 + $0x480] ss:$16 sps:$4 sm:$0xff]  }
 0x38b   : > { %v4794_v7 = vpop.f32.mrf.mxu0  ;;  %4985 = vmatmul.mubr.bf16.gmra.mxu0 %v9147_v0  ;;  %v9156_v0 = vld [vmem:[%s11676_s2 + $0x488] ss:$16 sps:$4 sm:$0xff]  }
 0x38c   : > { %v5339_v32 = vpop.f32.mrf.mxu1  ;;  %5530 = vmatmul.mubr.bf16.gmra.mxu1 %v9150_v59  ;;  %4992 = vmatprep.mubr.bf16.mxu0 %v9155_v41  ;;  %v4795_v23 = vadd.f32 %v4794_v7, %v9680_v16  ;;  %v9161_v59 = vld [vmem:[%s11676_s2 + $0x4a4] ss:$16 sps:$4 sm:$0xff]   ;;  %v9164_v16 = vld [vmem:[%s11676_s2 + $0x4ac] ss:$16 sps:$4 sm:$0xff]  }
 0x38d   : > { %v4796_v31 = vpop.f32.mrf.mxu0  ;;  %5537 = vmatprep.mubr.bf16.mxu1 %v9158_v55 }
 0x38e   : > { %v5341_v60 = vpop.f32.mrf.mxu1  ;;  %v10514_v55 = vadd.f32 %v5339_v32, %v4795_v23  ;;  %v9159_v32 = vld [vmem:[%s11676_s2 + $0x4a0] ss:$16 sps:$4 sm:$0xff]  }
 0x38f   : > { %v4797_v14 = vpop.f32.mrf.mxu0 }
 0x390   : > { %v4798_v24 = vadd.f32 %v4797_v14, %v9682_v27  ;;  %v5342_v53 = vpop.f32.mrf.mxu1 }
 0x391   : > { %v4799_v41 = vpop.f32.mrf.mxu0 }
 0x392   : > { %v10516_v7 = vadd.f32 %v5342_v53, %v4798_v24  ;;  %v5344_v31 = vpop.f32.mrf.mxu1 }
 0x393   : > { %v4802_v27 = vpop.f32.mrf.mxu0  ;;  %4993 = vmatmul.mubr.bf16.gmra.mxu0 %v9153_v30  ;;  %v9162_v30 = vld [vmem:[%s11676_s2 + $0x4a8] ss:$16 sps:$4 sm:$0xff]  }
 0x394   : > { %v5347_v14 = vpop.f32.mrf.mxu1  ;;  %5538 = vmatmul.mubr.bf16.gmra.mxu1 %v9156_v0  ;;  %5000 = vmatprep.mubr.bf16.mxu0 %v9161_v59  ;;  %v4803_v41 = vadd.f32 %v4802_v27, %v9684_v36  ;;  %v9170_v36 = vld [vmem:[%s11676_s2 + $0x4cc] ss:$16 sps:$4 sm:$0xff]  }
 0x395   : > { %v4804_v51 = vpop.f32.mrf.mxu0  ;;  %5545 = vmatprep.mubr.bf16.mxu1 %v9164_v16 }
 0x396   : > { %v5349_v8 = vpop.f32.mrf.mxu1  ;;  %v9167_v51 = vld [vmem:[%s11676_s2 + $0x4c4] ss:$16 sps:$4 sm:$0xff]  }
 0x397   : > { %v4805_v1 = vpop.f32.mrf.mxu0  ;;  %v10534_v8 = vadd.f32 %v5347_v14, %v4803_v41  ;;  %v9165_v14 = vld [vmem:[%s11676_s2 + $0x4c0] ss:$16 sps:$4 sm:$0xff]  }
 0x398   : > { %v4806_v23 = vadd.f32 %v4805_v1, %v9690_v58  ;;  %v5350_v24 = vpop.f32.mrf.mxu1 }
 0x399   : > { %v4807_v53 = vpop.f32.mrf.mxu0 }
 0x39a   : > { %v10536_v0 = vadd.f32 %v5350_v24, %v4806_v23  ;;  %v5352_v59 = vpop.f32.mrf.mxu1  ;;  %v9173_v24 = vld [vmem:[%s11676_s2 + $0x4e4] ss:$16 sps:$4 sm:$0xff]  }
 0x39b   : > { %v4810_v58 = vpop.f32.mrf.mxu0  ;;  %5001 = vmatmul.mubr.bf16.gmra.mxu0 %v9159_v32  ;;  %v9168_v32 = vld [vmem:[%s11676_s2 + $0x4c8] ss:$16 sps:$4 sm:$0xff]  }
 0x39c   : > { %v5355_v16 = vpop.f32.mrf.mxu1  ;;  %5546 = vmatmul.mubr.bf16.gmra.mxu1 %v9162_v30  ;;  %5008 = vmatprep.mubr.bf16.mxu0 %v9167_v51  ;;  %v4811_v27 = vadd.f32 %v4810_v58, %v9694_v4  ;;  %v9176_v4 = vld [vmem:[%s11676_s2 + $0x4ec] ss:$16 sps:$4 sm:$0xff]  }
 0x39d   : > { %v4812_v31 = vpop.f32.mrf.mxu0  ;;  %5553 = vmatprep.mubr.bf16.mxu1 %v9170_v36 }
 0x39e   : > { %v5357_v53 = vpop.f32.mrf.mxu1  ;;  %v10554_v51 = vadd.f32 %v5355_v16, %v4811_v27  ;;  %v9171_v16 = vld [vmem:[%s11676_s2 + $0x4e0] ss:$16 sps:$4 sm:$0xff]  }
 0x39f   : > { %v4813_v60 = vpop.f32.mrf.mxu0 }
 0x3a0   : > { %v4814_v41 = vadd.f32 %v4813_v60, %v9696_v18  ;;  %v5358_v23 = vpop.f32.mrf.mxu1 }
 0x3a1   : > { %v4815_v30 = vpop.f32.mrf.mxu0 }
 0x3a2   : > { %v10556_v36 = vadd.f32 %v5358_v23, %v4814_v41  ;;  %v5360_v59 = vpop.f32.mrf.mxu1  ;;  %v9179_v23 = vld [vmem:[%s11676_s2 + $0x504] ss:$16 sps:$4 sm:$0xff]  }
 0x3a3   : > { %v4818_v18 = vpop.f32.mrf.mxu0  ;;  %5009 = vmatmul.mubr.bf16.gmra.mxu0 %v9165_v14  ;;  %v9174_v14 = vld [vmem:[%s11676_s2 + $0x4e8] ss:$16 sps:$4 sm:$0xff]  }
 0x3a4   : > { %v5363_v58 = vpop.f32.mrf.mxu1  ;;  %5554 = vmatmul.mubr.bf16.gmra.mxu1 %v9168_v32  ;;  %5016 = vmatprep.mubr.bf16.mxu0 %v9173_v24  ;;  %v4819_v53 = vadd.f32 %v4818_v18, %v9698_v29  ;;  %v9182_v29 = vld [vmem:[%s11676_s2 + $0x50c] ss:$16 sps:$4 sm:$0xff]  }
 0x3a5   : > { %v4820_v31 = vpop.f32.mrf.mxu0  ;;  %5561 = vmatprep.mubr.bf16.mxu1 %v9176_v4 }
 0x3a6   : > { %v5365_v30 = vpop.f32.mrf.mxu1  ;;  %v5364_v24 = vadd.f32 %v5363_v58, %v4819_v53 }
 0x3a7   : > { %v4821_v1 = vpop.f32.mrf.mxu0 }
 0x3a8   : > { %v4822_v27 = vadd.f32 %v4821_v1, %v9700_v43  ;;  %v5366_v41 = vpop.f32.mrf.mxu1 }
 0x3a9   : > { %v4823_v32 = vpop.f32.mrf.mxu0 }
 0x3aa   : > { %v5367_v4 = vadd.f32 %v5366_v41, %v4822_v27  ;;  %v5368_v59 = vpop.f32.mrf.mxu1  ;;  %v9177_v32 = vld [vmem:[%s11676_s2 + $0x500] ss:$16 sps:$4 sm:$0xff]   ;;  %v9185_v27 = vld [vmem:[%s11676_s2 + $0x524] ss:$16 sps:$4 sm:$0xff]  }
 0x3ab   : > { %v4826_v18 = vpop.f32.mrf.mxu0  ;;  %5017 = vmatmul.mubr.bf16.gmra.mxu0 %v9171_v16  ;;  %v9180_v16 = vld [vmem:[%s11676_s2 + $0x508] ss:$16 sps:$4 sm:$0xff]  }
 0x3ac   : > { %v5776_v43 = vpack.c.bf16 %v5367_v4, %v5364_v24  ;;  %v5371_v1 = vpop.f32.mrf.mxu1  ;;  %5562 = vmatmul.mubr.bf16.gmra.mxu1 %v9174_v14  ;;  %5024 = vmatprep.mubr.bf16.mxu0 %v9179_v23  ;;  %v4827_v30 = vadd.f32 %v4826_v18, %v9702_v52  ;;  %v9188_v52 = vld [vmem:[%s11676_s2 + $0x52c] ss:$16 sps:$4 sm:$0xff]  }
 0x3ad   : > { %v4828_v31 = vpop.f32.mrf.mxu0  ;;  %5569 = vmatprep.mubr.bf16.mxu1 %v9182_v29 }
 0x3ae   : > { %v5373_v60 = vpop.f32.mrf.mxu1 }
 0x3af   : > { %v4829_v61 = vpop.f32.mrf.mxu0  ;;  %v5372_v60 = vadd.f32 %v5371_v1, %v4827_v30  ;;  %v11764_v1 = vpack.c.bf16 %v10436_v48, %v10421_v54  ;;  %v9183_v30 = vld [vmem:[%s11676_s2 + $0x520] ss:$16 sps:$4 sm:$0xff]   ;;  %v9194_v48 = vld [vmem:[%s11676_s2 + $0x54c] ss:$16 sps:$4 sm:$0xff]  }
 0x3b0   : > { %v4830_v58 = vadd.f32 %v4829_v61, %v9704_v3  ;;  %v5374_v53 = vpop.f32.mrf.mxu1 }
 0x3b1   : > { %v4831_v41 = vpop.f32.mrf.mxu0 }
 0x3b2   : > { %v5375_v14 = vadd.f32 %v5374_v53, %v4830_v58  ;;  %v5376_v23 = vpop.f32.mrf.mxu1  ;;  %v9186_v58 = vld [vmem:[%s11676_s2 + $0x528] ss:$16 sps:$4 sm:$0xff]  }
 0x3b3   : > { %v4834_v29 = vpop.f32.mrf.mxu0  ;;  %5025 = vmatmul.mubr.bf16.gmra.mxu0 %v9177_v32 }
 0x3b4   : > { %v5777_v3 = vpack.c.bf16 %v5375_v14, %v5372_v60  ;;  %v4835_v61 = vadd.f32 %v4834_v29, %v9706_v15  ;;  %v5379_v24 = vpop.f32.mrf.mxu1  ;;  %5570 = vmatmul.mubr.bf16.gmra.mxu1 %v9180_v16  ;;  %5032 = vmatprep.mubr.bf16.mxu0 %v9185_v27  ;;  %v9191_v16 = vld [vmem:[%s11676_s2 + $0x544] ss:$16 sps:$4 sm:$0xff]   ;;  %v11765_v60 = vpack.c.bf16 %v10416_v34, %v10401_v40 }
 0x3b5   : > { %v4836_v4 = vpop.f32.mrf.mxu0  ;;  %5577 = vmatprep.mubr.bf16.mxu1 %v9188_v52  ;;  %v11766_v14 = vpack.c.bf16 %v10556_v36, %v10554_v51  ;;  %v11767_v34 = vpack.c.bf16 %v10396_v20, %v10381_v26  ;;  %v9192_v51 = vld [vmem:[%s11676_s2 + $0x548] ss:$16 sps:$4 sm:$0xff]   ;;  %v11768_v36 = vpack.c.bf16 %v10536_v0, %v10534_v8  ;;  %v9200_v26 = vld [vmem:[%s11676_s2 + $0x56c] ss:$16 sps:$4 sm:$0xff]  }
 0x3b6   : > { %v10589_v59 = vadd.f32 %v5379_v24, %v4835_v61  ;;  %v5381_v18 = vpop.f32.mrf.mxu1  ;;  %8055 = vmatprep.subr.bf16.mxu0 %v5777_v3 }
 0x3b7   : > { %v4837_v31 = vpop.f32.mrf.mxu0  ;;  %8056 = vmatpush3.bf16.msra.mxu0 %v11764_v1  ;;  %v9197_v18 = vld [vmem:[%s11676_s2 + $0x564] ss:$16 sps:$4 sm:$0xff]  }
 0x3b8   : > { %v4838_v15 = vadd.f32 %v4837_v31, %v9712_v45  ;;  %v5382_v32 = vpop.f32.mrf.mxu1  ;;  %8057 = vmatprep.subr.bf16.mxu0 %v5776_v43  ;;  %v11796_v45 = vld [vmem:[#allocation26_spill] sm:$0xff] }
 0x3b9   : > { %v4839_v53 = vpop.f32.mrf.mxu0 }
 0x3ba   : > { %v10604_v27 = vadd.f32 %v5382_v32, %v4838_v15  ;;  %v5384_v54 = vpop.f32.mrf.mxu1  ;;  %v11770_v15 = vpack.c.bf16 %v10516_v7, %v10514_v55  ;;  %v9198_v55 = vld [vmem:[%s11676_s2 + $0x568] ss:$16 sps:$4 sm:$0xff]   ;;  %v11772_v7 = vpack.c.bf16 %v10496_v37, %v10481_v44 }
 0x3bb   : > { %v4842_v41 = vpop.f32.mrf.mxu0  ;;  %5033 = vmatmul.mubr.bf16.gmra.mxu0 %v9183_v30  ;;  %v11769_v30 = vpack.c.bf16 %v10376_v50, %v10361_v12  ;;  %v11771_v50 = vpack.c.bf16 %v10356_v57, %v10341_v19  ;;  %v9206_v19 = vld [vmem:[%s11676_s2 + $0x58c] ss:$16 sps:$4 sm:$0xff]  }
 0x3bc   : > { %v4843_v43 = vadd.f32 %v4842_v41, %v9716_v56  ;;  %v5387_v52 = vpop.f32.mrf.mxu1  ;;  %8058 = vmatpush3.bf16.msra.mxu0 %v11765_v60  ;;  %5578 = vmatmul.mubr.bf16.gmra.mxu1 %v9186_v58  ;;  %v9189_v56 = vld [vmem:[%s11676_s2 + $0x540] ss:$16 sps:$4 sm:$0xff]   ;;  %v9203_v41 = vld [vmem:[%s11676_s2 + $0x584] ss:$16 sps:$4 sm:$0xff]   ;;  %v11773_v60 = vpack.c.bf16 %v10336_v22, %v10321_v42  ;;  %v11775_v22 = vpack.c.bf16 %v10316_v38, %v10301_v47 }
 0x3bd   : > { %8059 = vmatprep.subr.bf16.mxu0 %v11766_v14  ;;  %v4844_v23 = vpop.f32.mrf.mxu0  ;;  %5040 = vmatprep.mubr.bf16.mxu0 %v9191_v16  ;;  %v11774_v14 = vpack.c.bf16 %v10476_v21, %v10461_v28  ;;  %v9204_v28 = vld [vmem:[%s11676_s2 + $0x588] ss:$16 sps:$4 sm:$0xff]   ;;  %v11776_v21 = vpack.c.bf16 %v10456_v62, %v10441_v5 }
 0x3be   : > { %v10618_v29 = vadd.f32 %v5387_v52, %v4843_v43  ;;  %v5389_v3 = vpop.f32.mrf.mxu1  ;;  %5585 = vmatprep.mubr.bf16.mxu1 %v9194_v48 }
 0x3bf   : > { %v4845_v61 = vpop.f32.mrf.mxu0 }
 0x3c0   : > { %v4846_v24 = vadd.f32 %v4845_v61, %v9718_v10  ;;  %v5390_v40 = vpop.f32.mrf.mxu1  ;;  %8060 = vmatpush3.bf16.msra.mxu0 %v11767_v34  ;;  %v9209_v34 = vld [vmem:[%s11676_s2 + $0x5a4] ss:$16 sps:$4 sm:$0xff]  }
 0x3c1   : > { %8061 = vmatprep.subr.bf16.mxu0 %v11768_v36  ;;  %v4847_v4 = vpop.f32.mrf.mxu0 }
 0x3c2   : > { %v10636_v31 = vadd.f32 %v5390_v40, %v4846_v24  ;;  %v5392_v10 = vpop.f32.mrf.mxu1  ;;  %v11777_v4 = vpack.c.bf16 %v10296_v2, %v10281_v46  ;;  %v9210_v46 = vld [vmem:[%s11676_s2 + $0x5a8] ss:$16 sps:$4 sm:$0xff]   ;;  %v9215_v2 = vld [vmem:[%s11676_s2 + $0x5c4] ss:$16 sps:$4 sm:$0xff]  }
 0x3c3   : > { %v4850_v20 = vpop.f32.mrf.mxu0  ;;  %5041 = vmatmul.mubr.bf16.gmra.mxu0 %v9189_v56 }
 0x3c4   : > { %v5779_v1 = vpack.c.bf16 %v10636_v31, %v10618_v29  ;;  %v4851_v8 = vadd.f32 %v4850_v20, %v9724_v35  ;;  %v5395_v0 = vpop.f32.mrf.mxu1  ;;  %8062 = vmatpush3.bf16.msra.mxu0 %v11769_v30  ;;  %5586 = vmatmul.mubr.bf16.gmra.mxu1 %v9192_v51  ;;  %v9195_v35 = vld [vmem:[%s11676_s2 + $0x560] ss:$16 sps:$4 sm:$0xff]   ;;  %v9305_v29 = vld [vmem:[%s11676_s2 + $0x7a4] ss:$16 sps:$4 sm:$0xff]  }
 0x3c5   : > { %8063 = vmatprep.subr.bf16.mxu0 %v11770_v15  ;;  %v4852_v32 = vpop.f32.mrf.mxu0  ;;  %5048 = vmatprep.mubr.bf16.mxu0 %v9197_v18  ;;  %v9218_v15 = vld [vmem:[%s11676_s2 + $0x5cc] ss:$16 sps:$4 sm:$0xff]  }
 0x3c6   : > { %v10650_v58 = vadd.f32 %v5395_v0, %v4851_v8  ;;  %v5397_v53 = vpop.f32.mrf.mxu1  ;;  %5593 = vmatprep.mubr.bf16.mxu1 %v9200_v26  ;;  %v9207_v8 = vld [vmem:[%s11676_s2 + $0x5a0] ss:$16 sps:$4 sm:$0xff]  }
 0x3c7   : > { %v4853_v16 = vpop.f32.mrf.mxu0 }
 0x3c8   : > { %v4854_v54 = vadd.f32 %v4853_v16, %v9732_v6  ;;  %v5398_v12 = vpop.f32.mrf.mxu1  ;;  %8064 = vmatpush3.bf16.msra.mxu0 %v11771_v50 }
 0x3c9   : > { %8065 = vmatprep.subr.bf16.mxu0 %v11772_v7  ;;  %v4855_v48 = vpop.f32.mrf.mxu0 }
 0x3ca   : > { %v10668_v43 = vadd.f32 %v5398_v12, %v4854_v54  ;;  %v5400_v6 = vpop.f32.mrf.mxu1  ;;  %v9213_v48 = vld [vmem:[%s11676_s2 + $0x5c0] ss:$16 sps:$4 sm:$0xff]  }
 0x3cb   : > { %v4858_v57 = vpop.f32.mrf.mxu0  ;;  %5049 = vmatmul.mubr.bf16.gmra.mxu0 %v9195_v35 }
 0x3cc   : > { %v5780_v52 = vpack.c.bf16 %v10668_v43, %v10650_v58  ;;  %v4859_v44 = vadd.f32 %v4858_v57, %v9739_v33  ;;  %v5403_v37 = vpop.f32.mrf.mxu1  ;;  %8066 = vmatpush3.bf16.msra.mxu0 %v11773_v60  ;;  %5594 = vmatmul.mubr.bf16.gmra.mxu1 %v9198_v55  ;;  %v9201_v33 = vld [vmem:[%s11676_s2 + $0x580] ss:$16 sps:$4 sm:$0xff]  }
 0x3cd   : > { %8067 = vmatprep.subr.bf16.mxu0 %v11774_v14  ;;  %v4860_v23 = vpop.f32.mrf.mxu0  ;;  %5056 = vmatprep.mubr.bf16.mxu0 %v9203_v41  ;;  %v9297_v58 = vld [vmem:[%s11676_s2 + $0x780] ss:$16 sps:$4 sm:$0xff]  }
 0x3ce   : > { %v10682_v3 = vadd.f32 %v5403_v37, %v4859_v44  ;;  %v5405_v61 = vpop.f32.mrf.mxu1  ;;  %5601 = vmatprep.mubr.bf16.mxu1 %v9206_v19  ;;  %v9221_v19 = vld [vmem:[%s11676_s2 + $0x5e4] ss:$16 sps:$4 sm:$0xff]   ;;  %v9224_v44 = vld [vmem:[%s11676_s2 + $0x5ec] ss:$16 sps:$4 sm:$0xff]  }
 0x3cf   : > { %v4861_v56 = vpop.f32.mrf.mxu0  ;;  %v11778_v23 = vld [vmem:[#allocation8_spill] sm:$0xff]  ;;  %v11804_v43 = vld [vmem:[#allocation34_spill] sm:$0xff] }
 0x3d0   : > { %v4862_v24 = vadd.f32 %v4861_v56, %v9748_v9  ;;  %v5406_v42 = vpop.f32.mrf.mxu1  ;;  %8068 = vmatpush3.bf16.msra.mxu0 %v11775_v22  ;;  %v9212_v9 = vld [vmem:[%s11676_s2 + $0x5ac] ss:$16 sps:$4 sm:$0xff]  }
 0x3d1   : > { %8069 = vmatprep.subr.bf16.mxu0 %v11776_v21  ;;  %v4863_v40 = vpop.f32.mrf.mxu0  ;;  %v11779_v21 = vld [vmem:[#allocation9_spill] sm:$0xff] }
 0x3d2   : > { %v10703_v51 = vadd.f32 %v5406_v42, %v4862_v24  ;;  %v5408_v47 = vpop.f32.mrf.mxu1 }
 0x3d3   : > { %v4866_v38 = vpop.f32.mrf.mxu0  ;;  %5057 = vmatmul.mubr.bf16.gmra.mxu0 %v9201_v33  ;;  %v9227_v47 = vld [vmem:[%s11676_s2 + $0x604] ss:$16 sps:$4 sm:$0xff]  }
 0x3d4   : > { %v5781_v36 = vpack.c.bf16 %v10703_v51, %v10682_v3  ;;  %v4867_v5 = vadd.f32 %v4866_v38, %v9755_v39  ;;  %v5411_v62 = vpop.f32.mrf.mxu1  ;;  %8070 = vmatpush3.bf16.msra.mxu0 %v11777_v4  ;;  %5602 = vmatmul.mubr.bf16.gmra.mxu1 %v9204_v28  ;;  %v9219_v28 = vld [vmem:[%s11676_s2 + $0x5e0] ss:$16 sps:$4 sm:$0xff]   ;;  %v9299_v3 = vld [vmem:[%s11676_s2 + $0x784] ss:$16 sps:$4 sm:$0xff]   ;;  %v9302_v51 = vld [vmem:[%s11676_s2 + $0x78c] ss:$16 sps:$4 sm:$0xff]  }
 0x3d5   : > { %v4868_v18 = vpop.f32.mrf.mxu0  ;;  %5064 = vmatprep.mubr.bf16.mxu0 %v9209_v34  ;;  %5609 = vmatprep.mubr.bf16.mxu1 %v9212_v9  ;;  %v9222_v9 = vld [vmem:[%s11676_s2 + $0x5e8] ss:$16 sps:$4 sm:$0xff]  }
 0x3d6   : > { %v10711_v10 = vadd.f32 %v5411_v62, %v4867_v5  ;;  %v5413_v26 = vpop.f32.mrf.mxu1  ;;  %v9230_v5 = vld [vmem:[%s11676_s2 + $0x60c] ss:$16 sps:$4 sm:$0xff]  }
 0x3d7   : > { %v4869_v20 = vpop.f32.mrf.mxu0 }
 0x3d8   : > { %v4870_v0 = vadd.f32 %v4869_v20, %v9764_v17  ;;  %v5414_v39 = vpop.f32.mrf.mxu1  ;;  %v11780_v20 = vld [vmem:[#allocation10_spill] sm:$0xff] }
 0x3d9   : > { %v4871_v30 = vpop.f32.mrf.mxu0 }
 0x3da   : > { %v10726_v32 = vadd.f32 %v5414_v39, %v4870_v0  ;;  %v5416_v53 = vpop.f32.mrf.mxu1 }
 0x3db   : > { %v4874_v16 = vpop.f32.mrf.mxu0  ;;  %5065 = vmatmul.mubr.bf16.gmra.mxu0 %v9207_v8 }
 0x3dc   : > { %v5782_v17 = vpack.c.bf16 %v10726_v32, %v10711_v10  ;;  %v4875_v35 = vadd.f32 %v4874_v16, %v9771_v49  ;;  %v5419_v54 = vpop.f32.mrf.mxu1  ;;  %5610 = vmatmul.mubr.bf16.gmra.mxu1 %v9210_v46  ;;  %5072 = vmatprep.mubr.bf16.mxu0 %v9215_v2  ;;  %v9216_v49 = vld [vmem:[%s11676_s2 + $0x5c8] ss:$16 sps:$4 sm:$0xff]   ;;  %v9291_v10 = vld [vmem:[%s11676_s2 + $0x760] ss:$16 sps:$4 sm:$0xff]  }
 0x3dd   : > { %v4876_v12 = vpop.f32.mrf.mxu0  ;;  %5617 = vmatprep.mubr.bf16.mxu1 %v9218_v15  ;;  %v9225_v15 = vld [vmem:[%s11676_s2 + $0x600] ss:$16 sps:$4 sm:$0xff]  }
 0x3de   : > { %v10731_v50 = vadd.f32 %v5419_v54, %v4875_v35  ;;  %v5421_v55 = vpop.f32.mrf.mxu1  ;;  %v9228_v35 = vld [vmem:[%s11676_s2 + $0x608] ss:$16 sps:$4 sm:$0xff]   ;;  %v9233_v54 = vld [vmem:[%s11676_s2 + $0x624] ss:$16 sps:$4 sm:$0xff]  }
 0x3df   : > { %v4877_v7 = vpop.f32.mrf.mxu0  ;;  %v9236_v55 = vld [vmem:[%s11676_s2 + $0x62c] ss:$16 sps:$4 sm:$0xff]   ;;  %v11802_v32 = vld [vmem:[#allocation32_spill] sm:$0xff] }
 0x3e0   : > { %v4878_v41 = vadd.f32 %v4877_v7, %v9780_v25  ;;  %v5422_v6 = vpop.f32.mrf.mxu1 }
 0x3e1   : > { %v4879_v57 = vpop.f32.mrf.mxu0 }
 0x3e2   : > { %v10746_v37 = vadd.f32 %v5422_v6, %v4878_v41  ;;  %v5424_v60 = vpop.f32.mrf.mxu1  ;;  %v11781_v6 = vld [vmem:[#allocation11_spill] sm:$0xff] }
 0x3e3   : > { %v4882_v14 = vpop.f32.mrf.mxu0  ;;  %5073 = vmatmul.mubr.bf16.gmra.mxu0 %v9213_v48 }
 0x3e4   : > { %v5783_v25 = vpack.c.bf16 %v10746_v37, %v10731_v50  ;;  %v4883_v61 = vadd.f32 %v4882_v14, %v11778_v23  ;;  %v5427_v56 = vpop.f32.mrf.mxu1  ;;  %5618 = vmatmul.mubr.bf16.gmra.mxu1 %v9216_v49  ;;  %5080 = vmatprep.mubr.bf16.mxu0 %v9221_v19  ;;  %v9231_v23 = vld [vmem:[%s11676_s2 + $0x620] ss:$16 sps:$4 sm:$0xff]   ;;  %v9293_v50 = vld [vmem:[%s11676_s2 + $0x764] ss:$16 sps:$4 sm:$0xff]   ;;  %v9296_v37 = vld [vmem:[%s11676_s2 + $0x76c] ss:$16 sps:$4 sm:$0xff]  }
 0x3e5   : > { %v4884_v33 = vpop.f32.mrf.mxu0  ;;  %5625 = vmatprep.mubr.bf16.mxu1 %v9224_v44 }
 0x3e6   : > { %v10751_v24 = vadd.f32 %v5427_v56, %v4883_v61  ;;  %v5429_v42 = vpop.f32.mrf.mxu1  ;;  %v11782_v61 = vld [vmem:[#allocation12_spill] sm:$0xff] }
 0x3e7   : > { %v4885_v22 = vpop.f32.mrf.mxu0  ;;  %v9234_v42 = vld [vmem:[%s11676_s2 + $0x628] ss:$16 sps:$4 sm:$0xff]  }
 0x3e8   : > { %v4886_v40 = vadd.f32 %v4885_v22, %v11779_v21  ;;  %v5430_v34 = vpop.f32.mrf.mxu1  ;;  %v9239_v22 = vld [vmem:[%s11676_s2 + $0x644] ss:$16 sps:$4 sm:$0xff]   ;;  %v9242_v21 = vld [vmem:[%s11676_s2 + $0x64c] ss:$16 sps:$4 sm:$0xff]  }
 0x3e9   : > { %v4887_v38 = vpop.f32.mrf.mxu0 }
 0x3ea   : > { %v10766_v62 = vadd.f32 %v5430_v34, %v4886_v40  ;;  %v5432_v4 = vpop.f32.mrf.mxu1  ;;  %v11783_v38 = vld [vmem:[#allocation13_spill] sm:$0xff] }
 0x3eb   : > { %v4890_v18 = vpop.f32.mrf.mxu0  ;;  %5081 = vmatmul.mubr.bf16.gmra.mxu0 %v9219_v28 }
 0x3ec   : > { %v5784_v26 = vpack.c.bf16 %v10766_v62, %v10751_v24  ;;  %v4891_v8 = vadd.f32 %v4890_v18, %v11780_v20  ;;  %v5435_v0 = vpop.f32.mrf.mxu1  ;;  %5626 = vmatmul.mubr.bf16.gmra.mxu1 %v9222_v9  ;;  %5088 = vmatprep.mubr.bf16.mxu0 %v9227_v47  ;;  %v9285_v24 = vld [vmem:[%s11676_s2 + $0x740] ss:$16 sps:$4 sm:$0xff]  }
 0x3ed   : > { %v4892_v39 = vpop.f32.mrf.mxu0  ;;  %5633 = vmatprep.mubr.bf16.mxu1 %v9230_v5  ;;  %v11800_v62 = vld [vmem:[#allocation30_spill] sm:$0xff] }
 0x3ee   : > { %v10771_v46 = vadd.f32 %v5435_v0, %v4891_v8  ;;  %v5437_v2 = vpop.f32.mrf.mxu1  ;;  %v9237_v39 = vld [vmem:[%s11676_s2 + $0x640] ss:$16 sps:$4 sm:$0xff]  }
 0x3ef   : > { %v4893_v30 = vpop.f32.mrf.mxu0  ;;  %v11784_v2 = vld [vmem:[#allocation14_spill] sm:$0xff] }
 0x3f0   : > { %v4894_v53 = vadd.f32 %v4893_v30, %v9812_v13  ;;  %v5438_v16 = vpop.f32.mrf.mxu1 }
 0x3f1   : > { %v4895_v12 = vpop.f32.mrf.mxu0 }
 0x3f2   : > { %v10786_v7 = vadd.f32 %v5438_v16, %v4894_v53  ;;  %v5440_v48 = vpop.f32.mrf.mxu1  ;;  %v9240_v53 = vld [vmem:[%s11676_s2 + $0x648] ss:$16 sps:$4 sm:$0xff]   ;;  %v9245_v16 = vld [vmem:[%s11676_s2 + $0x664] ss:$16 sps:$4 sm:$0xff]  }
 0x3f3   : > { %v4898_v41 = vpop.f32.mrf.mxu0  ;;  %5089 = vmatmul.mubr.bf16.gmra.mxu0 %v9225_v15 }
 0x3f4   : > { %v5785_v13 = vpack.c.bf16 %v10786_v7, %v10771_v46  ;;  %v4899_v49 = vadd.f32 %v4898_v41, %v11781_v6  ;;  %v5443_v19 = vpop.f32.mrf.mxu1  ;;  %5634 = vmatmul.mubr.bf16.gmra.mxu1 %v9228_v35  ;;  %5096 = vmatprep.mubr.bf16.mxu0 %v9233_v54  ;;  %v9248_v54 = vld [vmem:[%s11676_s2 + $0x66c] ss:$16 sps:$4 sm:$0xff]  }
 0x3f5   : > { %v4900_v57 = vpop.f32.mrf.mxu0  ;;  %5641 = vmatprep.mubr.bf16.mxu1 %v9236_v55  ;;  %v9290_v46 = vld [vmem:[%s11676_s2 + $0x74c] ss:$16 sps:$4 sm:$0xff]  }
 0x3f6   : > { %v10791_v44 = vadd.f32 %v5443_v19, %v4899_v49  ;;  %v5445_v60 = vpop.f32.mrf.mxu1  ;;  %v11785_v19 = vld [vmem:[#allocation15_spill] sm:$0xff] }
 0x3f7   : > { %v4901_v14 = vpop.f32.mrf.mxu0 }
 0x3f8   : > { %v4902_v56 = vadd.f32 %v4901_v14, %v11782_v61  ;;  %v5446_v33 = vpop.f32.mrf.mxu1  ;;  %v11786_v61 = vld [vmem:[#allocation16_spill] sm:$0xff] }
 0x3f9   : > { %v4903_v28 = vpop.f32.mrf.mxu0 }
 0x3fa   : > { %v10806_v40 = vadd.f32 %v5446_v33, %v4902_v56  ;;  %v5448_v34 = vpop.f32.mrf.mxu1 }
 0x3fb   : > { %v4906_v9 = vpop.f32.mrf.mxu0  ;;  %5097 = vmatmul.mubr.bf16.gmra.mxu0 %v9231_v23  ;;  %v9243_v23 = vld [vmem:[%s11676_s2 + $0x660] ss:$16 sps:$4 sm:$0xff]  }
 0x3fc   : > { %v5786_v47 = vpack.c.bf16 %v10806_v40, %v10791_v44  ;;  %v4907_v5 = vadd.f32 %v4906_v9, %v11783_v38  ;;  %v5451_v4 = vpop.f32.mrf.mxu1  ;;  %5642 = vmatmul.mubr.bf16.gmra.mxu1 %v9234_v42  ;;  %5104 = vmatprep.mubr.bf16.mxu0 %v9239_v22  ;;  %v9246_v42 = vld [vmem:[%s11676_s2 + $0x668] ss:$16 sps:$4 sm:$0xff]   ;;  %v9251_v22 = vld [vmem:[%s11676_s2 + $0x684] ss:$16 sps:$4 sm:$0xff]   ;;  %v11805_v44 = vpack.c.bf16 %v10604_v27, %v10589_v59 }
 0x3fd   : > { %v4908_v18 = vpop.f32.mrf.mxu0  ;;  %5649 = vmatprep.mubr.bf16.mxu1 %v9242_v21  ;;  %v9254_v21 = vld [vmem:[%s11676_s2 + $0x68c] ss:$16 sps:$4 sm:$0xff]   ;;  %v11807_v59 = vld [vmem:[#allocation36_spill] sm:$0xff] }
 0x3fe   : > { %v10811_v20 = vadd.f32 %v5451_v4, %v4907_v5  ;;  %v5453_v8 = vpop.f32.mrf.mxu1  ;;  %v11828_v40 = vld [vmem:[#allocation57_spill] sm:$0xff] }
 0x3ff   : > { %v4909_v0 = vpop.f32.mrf.mxu0 }
 0x400   : > { %v4910_v30 = vadd.f32 %v4909_v0, %v11784_v2  ;;  %v5454_v15 = vpop.f32.mrf.mxu1  ;;  %v11787_v0 = vld [vmem:[#allocation17_spill] sm:$0xff] }
 0x401   : > { %v4911_v35 = vpop.f32.mrf.mxu0 }
 0x402   : > { %v10826_v12 = vadd.f32 %v5454_v15, %v4910_v30  ;;  %v5456_v55 = vpop.f32.mrf.mxu1  ;;  %v9249_v15 = vld [vmem:[%s11676_s2 + $0x680] ss:$16 sps:$4 sm:$0xff]  }
 0x403   : > { %v4914_v48 = vpop.f32.mrf.mxu0  ;;  %5105 = vmatmul.mubr.bf16.gmra.mxu0 %v9237_v39  ;;  %v9257_v55 = vld [vmem:[%s11676_s2 + $0x6a4] ss:$16 sps:$4 sm:$0xff]  }
 0x404   : > { %v5787_v41 = vpack.c.bf16 %v10826_v12, %v10811_v20  ;;  %v5459_v6 = vpop.f32.mrf.mxu1  ;;  %5650 = vmatmul.mubr.bf16.gmra.mxu1 %v9240_v53  ;;  %5112 = vmatprep.mubr.bf16.mxu0 %v9245_v16  ;;  %v4915_v57 = vadd.f32 %v4914_v48, %v11785_v19  ;;  %v11788_v53 = vld [vmem:[#allocation18_spill] sm:$0xff]  ;;  %v9300_v12 = vld [vmem:[%s11676_s2 + $0x788] ss:$16 sps:$4 sm:$0xff]  }
 0x405   : > { %v4916_v49 = vpop.f32.mrf.mxu0  ;;  %5657 = vmatprep.mubr.bf16.mxu1 %v9248_v54  ;;  %v9252_v54 = vld [vmem:[%s11676_s2 + $0x688] ss:$16 sps:$4 sm:$0xff]  }
 0x406   : > { %v5461_v60 = vpop.f32.mrf.mxu1  ;;  %v10844_v34 = vadd.f32 %v5459_v6, %v4915_v57  ;;  %v9260_v6 = vld [vmem:[%s11676_s2 + $0x6ac] ss:$16 sps:$4 sm:$0xff]  }
 0x407   : > { %v4917_v14 = vpop.f32.mrf.mxu0 }
 0x408   : > { %v4918_v56 = vadd.f32 %v4917_v14, %v11786_v61  ;;  %v5462_v33 = vpop.f32.mrf.mxu1 }
 0x409   : > { %v4919_v28 = vpop.f32.mrf.mxu0 }
 0x40a   : > { %v10846_v9 = vadd.f32 %v5462_v33, %v4918_v56  ;;  %v5464_v38 = vpop.f32.mrf.mxu1  ;;  %v11789_v56 = vld [vmem:[#allocation19_spill] sm:$0xff]  ;;  %v9255_v28 = vld [vmem:[%s11676_s2 + $0x6a0] ss:$16 sps:$4 sm:$0xff]  }
 0x40b   : > { %v4922_v5 = vpop.f32.mrf.mxu0  ;;  %5113 = vmatmul.mubr.bf16.gmra.mxu0 %v9243_v23 }
 0x40c   : > { %v5788_v4 = vpack.c.bf16 %v10846_v9, %v10844_v34  ;;  %v5467_v18 = vpop.f32.mrf.mxu1  ;;  %5658 = vmatmul.mubr.bf16.gmra.mxu1 %v9246_v42  ;;  %5120 = vmatprep.mubr.bf16.mxu0 %v9251_v22  ;;  %v4923_v39 = vadd.f32 %v4922_v5, %v11787_v0  ;;  %v11803_v9 = vld [vmem:[#allocation33_spill] sm:$0xff] }
 0x40d   : > { %v4924_v8 = vpop.f32.mrf.mxu0  ;;  %5665 = vmatprep.mubr.bf16.mxu1 %v9254_v21  ;;  %v11790_v21 = vld [vmem:[#allocation20_spill] sm:$0xff] }
 0x40e   : > { %v5469_v2 = vpop.f32.mrf.mxu1  ;;  %v10864_v49 = vadd.f32 %v5467_v18, %v4923_v39  ;;  %v9258_v18 = vld [vmem:[%s11676_s2 + $0x6a8] ss:$16 sps:$4 sm:$0xff]   ;;  %v9263_v8 = vld [vmem:[%s11676_s2 + $0x6c4] ss:$16 sps:$4 sm:$0xff]   ;;  %v9266_v39 = vld [vmem:[%s11676_s2 + $0x6cc] ss:$16 sps:$4 sm:$0xff]  }
 0x40f   : > { %v4925_v30 = vpop.f32.mrf.mxu0 }
 0x410   : > { %v4926_v16 = vadd.f32 %v4925_v30, %v11788_v53  ;;  %v5470_v35 = vpop.f32.mrf.mxu1 }
 0x411   : > { %v4927_v48 = vpop.f32.mrf.mxu0 }
 0x412   : > { %v10866_v19 = vadd.f32 %v5470_v35, %v4926_v16  ;;  %v5472_v57 = vpop.f32.mrf.mxu1 }
 0x413   : > { %v4930_v60 = vpop.f32.mrf.mxu0  ;;  %5121 = vmatmul.mubr.bf16.gmra.mxu0 %v9249_v15 }
 0x414   : > { %v5789_v14 = vpack.c.bf16 %v10866_v19, %v10864_v49  ;;  %v5475_v23 = vpop.f32.mrf.mxu1  ;;  %5666 = vmatmul.mubr.bf16.gmra.mxu1 %v9252_v54  ;;  %5128 = vmatprep.mubr.bf16.mxu0 %v9257_v55  ;;  %v4931_v33 = vadd.f32 %v4930_v60, %v11789_v56  ;;  %v11791_v55 = vld [vmem:[#allocation21_spill] sm:$0xff]  ;;  %v9261_v60 = vld [vmem:[%s11676_s2 + $0x6c0] ss:$16 sps:$4 sm:$0xff]  }
 0x415   : > { %v4932_v61 = vpop.f32.mrf.mxu0  ;;  %5673 = vmatprep.mubr.bf16.mxu1 %v9260_v6  ;;  %v9294_v19 = vld [vmem:[%s11676_s2 + $0x768] ss:$16 sps:$4 sm:$0xff]  }
 0x416   : > { %v5477_v42 = vpop.f32.mrf.mxu1  ;;  %v10884_v2 = vadd.f32 %v5475_v23, %v4931_v33  ;;  %v11792_v23 = vld [vmem:[#allocation22_spill] sm:$0xff]  ;;  %v9264_v33 = vld [vmem:[%s11676_s2 + $0x6c8] ss:$16 sps:$4 sm:$0xff]  }
 0x417   : > { %v4933_v22 = vpop.f32.mrf.mxu0  ;;  %v9269_v42 = vld [vmem:[%s11676_s2 + $0x6e4] ss:$16 sps:$4 sm:$0xff]  }
 0x418   : > { %v4934_v38 = vadd.f32 %v4933_v22, %v11790_v21  ;;  %v5478_v5 = vpop.f32.mrf.mxu1 }
 0x419   : > { %v4935_v0 = vpop.f32.mrf.mxu0 }
 0x41a   : > { %v10886_v30 = vadd.f32 %v5478_v5, %v4934_v38  ;;  %v5480_v15 = vpop.f32.mrf.mxu1 }
 0x41b   : > { %v4938_v53 = vpop.f32.mrf.mxu0  ;;  %5129 = vmatmul.mubr.bf16.gmra.mxu0 %v9255_v28  ;;  %v9272_v28 = vld [vmem:[%s11676_s2 + $0x6ec] ss:$16 sps:$4 sm:$0xff]  }
 0x41c   : > { %v5790_v16 = vpack.c.bf16 %v10886_v30, %v10884_v2  ;;  %v5483_v35 = vpop.f32.mrf.mxu1  ;;  %5674 = vmatmul.mubr.bf16.gmra.mxu1 %v9258_v18  ;;  %5136 = vmatprep.mubr.bf16.mxu0 %v9263_v8  ;;  %v4939_v48 = vadd.f32 %v4938_v53, %v11791_v55  ;;  %v11793_v15 = vld [vmem:[#allocation23_spill] sm:$0xff] }
 0x41d   : > { %v4940_v54 = vpop.f32.mrf.mxu0  ;;  %5681 = vmatprep.mubr.bf16.mxu1 %v9266_v39  ;;  %v11801_v30 = vld [vmem:[#allocation31_spill] sm:$0xff] }
 0x41e   : > { %v5485_v6 = vpop.f32.mrf.mxu1  ;;  %v10904_v21 = vadd.f32 %v5483_v35, %v4939_v48  ;;  %v9267_v35 = vld [vmem:[%s11676_s2 + $0x6e0] ss:$16 sps:$4 sm:$0xff]  }
 0x41f   : > { %v4941_v57 = vpop.f32.mrf.mxu0  ;;  %v11794_v48 = vld [vmem:[#allocation24_spill] sm:$0xff] }
 0x420   : > { %v4942_v61 = vadd.f32 %v4941_v57, %v11792_v23  ;;  %v5486_v56 = vpop.f32.mrf.mxu1  ;;  %v9275_v23 = vld [vmem:[%s11676_s2 + $0x704] ss:$16 sps:$4 sm:$0xff]  }
 0x421   : > { %v4943_v22 = vpop.f32.mrf.mxu0 }
 0x422   : > { %v10906_v38 = vadd.f32 %v5486_v56, %v4942_v61  ;;  %v5488_v5 = vpop.f32.mrf.mxu1  ;;  %v9278_v56 = vld [vmem:[%s11676_s2 + $0x70c] ss:$16 sps:$4 sm:$0xff]  }
 0x423   : > { %v4946_v18 = vpop.f32.mrf.mxu0  ;;  %5137 = vmatmul.mubr.bf16.gmra.mxu0 %v9261_v60  ;;  %v9270_v60 = vld [vmem:[%s11676_s2 + $0x6e8] ss:$16 sps:$4 sm:$0xff]  }
 0x424   : > { %v5791_v8 = vpack.c.bf16 %v10906_v38, %v10904_v21  ;;  %v5491_v0 = vpop.f32.mrf.mxu1  ;;  %5682 = vmatmul.mubr.bf16.gmra.mxu1 %v9264_v33  ;;  %5144 = vmatprep.mubr.bf16.mxu0 %v9269_v42  ;;  %v4947_v53 = vadd.f32 %v4946_v18, %v11793_v15  ;;  %v11795_v15 = vld [vmem:[#allocation25_spill] sm:$0xff] }
 0x425   : > { %v4948_v39 = vpop.f32.mrf.mxu0  ;;  %5689 = vmatprep.mubr.bf16.mxu1 %v9272_v28  ;;  %v9288_v38 = vld [vmem:[%s11676_s2 + $0x748] ss:$16 sps:$4 sm:$0xff]  }
 0x426   : > { %v5493_v54 = vpop.f32.mrf.mxu1  ;;  %v5492_v33 = vadd.f32 %v5491_v0, %v4947_v53 }
 0x427   : > { %v4949_v55 = vpop.f32.mrf.mxu0 }
 0x428   : > { %v4950_v6 = vadd.f32 %v4949_v55, %v11794_v48  ;;  %v5494_v57 = vpop.f32.mrf.mxu1 }
 0x429   : > { %v4951_v61 = vpop.f32.mrf.mxu0 }
 0x42a   : > { %v5495_v42 = vadd.f32 %v5494_v57, %v4950_v6  ;;  %v5496_v22 = vpop.f32.mrf.mxu1  ;;  %v9273_v61 = vld [vmem:[%s11676_s2 + $0x700] ss:$16 sps:$4 sm:$0xff]   ;;  %v9281_v6 = vld [vmem:[%s11676_s2 + $0x724] ss:$16 sps:$4 sm:$0xff]  }
 0x42b   : > { %v4954_v28 = vpop.f32.mrf.mxu0  ;;  %5145 = vmatmul.mubr.bf16.gmra.mxu0 %v9267_v35  ;;  %v9276_v35 = vld [vmem:[%s11676_s2 + $0x708] ss:$16 sps:$4 sm:$0xff]  }
 0x42c   : > { %v5792_v5 = vpack.c.bf16 %v5495_v42, %v5492_v33  ;;  %v5499_v18 = vpop.f32.mrf.mxu1  ;;  %5690 = vmatmul.mubr.bf16.gmra.mxu1 %v9270_v60  ;;  %5152 = vmatprep.mubr.bf16.mxu0 %v9275_v23  ;;  %v4955_v54 = vadd.f32 %v4954_v28, %v11795_v15  ;;  %v9284_v60 = vld [vmem:[%s11676_s2 + $0x72c] ss:$16 sps:$4 sm:$0xff]  }
 0x42d   : > { %v4956_v39 = vpop.f32.mrf.mxu0  ;;  %5697 = vmatprep.mubr.bf16.mxu1 %v9278_v56  ;;  %v11797_v22 = vld [vmem:[#allocation27_spill] sm:$0xff] }
 0x42e   : > { %v5501_v55 = vpop.f32.mrf.mxu1  ;;  %v5500_v23 = vadd.f32 %v5499_v18, %v4955_v54  ;;  %v9279_v18 = vld [vmem:[%s11676_s2 + $0x720] ss:$16 sps:$4 sm:$0xff]  }
 0x42f   : > { %v4957_v48 = vpop.f32.mrf.mxu0  ;;  %v11798_v54 = vld [vmem:[#allocation28_spill] sm:$0xff] }
 0x430   : > { %v4958_v0 = vadd.f32 %v4957_v48, %v11796_v45  ;;  %v5502_v53 = vpop.f32.mrf.mxu1 }
 0x431   : > { %v4959_v57 = vpop.f32.mrf.mxu0 }
 0x432   : > { %v5503_v56 = vadd.f32 %v5502_v53, %v4958_v0  ;;  %v5504_v33 = vpop.f32.mrf.mxu1  ;;  %v9282_v53 = vld [vmem:[%s11676_s2 + $0x728] ss:$16 sps:$4 sm:$0xff]  }
 0x433   : > { %v4962_v42 = vpop.f32.mrf.mxu0  ;;  %5153 = vmatmul.mubr.bf16.gmra.mxu0 %v9273_v61 }
 0x434   : > { %v5793_v45 = vpack.c.bf16 %v5503_v56, %v5500_v23  ;;  %v4963_v28 = vadd.f32 %v4962_v42, %v11797_v22  ;;  %v5507_v39 = vpop.f32.mrf.mxu1  ;;  %5698 = vmatmul.mubr.bf16.gmra.mxu1 %v9276_v35  ;;  %5160 = vmatprep.mubr.bf16.mxu0 %v9281_v6  ;;  %v9287_v6 = vld [vmem:[%s11676_s2 + $0x744] ss:$16 sps:$4 sm:$0xff]   ;;  %v11799_v23 = vld [vmem:[#allocation29_spill] sm:$0xff] }
 0x435   : > { %v4964_v15 = vpop.f32.mrf.mxu0  ;;  %5705 = vmatprep.mubr.bf16.mxu1 %v9284_v60 }
 0x436   : > { %v10939_v55 = vadd.f32 %v5507_v39, %v4963_v28  ;;  %8167 = vmatprep.subr.bf16.mxu1 %v5793_v45  ;;  %v5509_v48 = vpop.f32.mrf.mxu1 }
 0x437   : > { %v4965_v57 = vpop.f32.mrf.mxu0  ;;  %8168 = vmatpush3.bf16.msra.mxu1 %v5785_v13 }
 0x438   : > { %v4966_v61 = vadd.f32 %v4965_v57, %v11798_v54  ;;  %8169 = vmatprep.subr.bf16.mxu1 %v5792_v5  ;;  %v5510_v0 = vpop.f32.mrf.mxu1 }
 0x439   : > { %v4967_v35 = vpop.f32.mrf.mxu0 }
 0x43a   : > { %v10957_v7 = vadd.f32 %v5510_v0, %v4966_v61  ;;  %v5512_v13 = vpop.f32.mrf.mxu1 }
 0x43b   : > { %v4970_v60 = vpop.f32.mrf.mxu0  ;;  %5161 = vmatmul.mubr.bf16.gmra.mxu0 %v9279_v18  ;;  %8170 = vmatpush3.bf16.msra.mxu1 %v5784_v26 }
 0x43c   : > { %v4971_v56 = vadd.f32 %v4970_v60, %v11799_v23  ;;  %8171 = vmatprep.subr.bf16.mxu1 %v5791_v8  ;;  %v5515_v33 = vpop.f32.mrf.mxu1  ;;  %5706 = vmatmul.mubr.bf16.gmra.mxu1 %v9282_v53 }
 0x43d   : > { %v4972_v42 = vpop.f32.mrf.mxu0  ;;  %5168 = vmatprep.mubr.bf16.mxu0 %v9287_v6  ;;  %5713 = vmatprep.mubr.bf16.mxu1 %v9290_v46 }
 0x43e   : > { %v10968_v45 = vadd.f32 %v5515_v33, %v4971_v56  ;;  %v5517_v22 = vpop.f32.mrf.mxu1 }
 0x43f   : > { %v4973_v28 = vpop.f32.mrf.mxu0  ;;  %8172 = vmatpush3.bf16.msra.mxu1 %v5783_v25 }
 0x440   : > { %v4974_v26 = vadd.f32 %v4973_v28, %v11800_v62  ;;  %8173 = vmatprep.subr.bf16.mxu1 %v5790_v16  ;;  %v5518_v21 = vpop.f32.mrf.mxu1 }
 0x441   : > { %v4975_v8 = vpop.f32.mrf.mxu0 }
 0x442   : > { %v10989_v25 = vadd.f32 %v5518_v21, %v4974_v26  ;;  %v5520_v39 = vpop.f32.mrf.mxu1  ;;  %v9303_v26 = vld [vmem:[%s11676_s2 + $0x7a0] ss:$16 sps:$4 sm:$0xff]   ;;  %v9311_v8 = vld [vmem:[%s11676_s2 + $0x7c4] ss:$16 sps:$4 sm:$0xff]  }
 0x443   : > { %v4978_v15 = vpop.f32.mrf.mxu0  ;;  %5169 = vmatmul.mubr.bf16.gmra.mxu0 %v9285_v24  ;;  %8174 = vmatpush3.bf16.msra.mxu1 %v5782_v17 }
 0x444   : > { %v4979_v16 = vadd.f32 %v4978_v15, %v11801_v30  ;;  %8175 = vmatprep.subr.bf16.mxu1 %v5789_v14  ;;  %v5523_v48 = vpop.f32.mrf.mxu1  ;;  %5714 = vmatmul.mubr.bf16.gmra.mxu1 %v9288_v38  ;;  %v9306_v38 = vld [vmem:[%s11676_s2 + $0x7a8] ss:$16 sps:$4 sm:$0xff]  }
 0x445   : > { %v4980_v57 = vpop.f32.mrf.mxu0  ;;  %5176 = vmatprep.mubr.bf16.mxu0 %v9293_v50  ;;  %5721 = vmatprep.mubr.bf16.mxu1 %v9296_v37  ;;  %v9314_v37 = vld [vmem:[%s11676_s2 + $0x7cc] ss:$16 sps:$4 sm:$0xff]  }
 0x446   : > { %v11000_v18 = vadd.f32 %v5523_v48, %v4979_v16  ;;  %v5525_v54 = vpop.f32.mrf.mxu1 }
 0x447   : > { %v4981_v61 = vpop.f32.mrf.mxu0  ;;  %8176 = vmatpush3.bf16.msra.mxu1 %v5781_v36 }
 0x448   : > { %v4982_v17 = vadd.f32 %v4981_v61, %v11802_v32  ;;  %8177 = vmatprep.subr.bf16.mxu1 %v5788_v4  ;;  %v5526_v49 = vpop.f32.mrf.mxu1 }
 0x449   : > { %v4983_v14 = vpop.f32.mrf.mxu0 }
 0x44a   : > { %v11021_v36 = vadd.f32 %v5526_v49, %v4982_v17  ;;  %v5528_v0 = vpop.f32.mrf.mxu1  ;;  %v9309_v17 = vld [vmem:[%s11676_s2 + $0x7c0] ss:$16 sps:$4 sm:$0xff]   ;;  %v9317_v14 = vld [vmem:[%s11676_s2 + $0x7e4] ss:$16 sps:$4 sm:$0xff]  }
 0x44b   : > { %v4986_v53 = vpop.f32.mrf.mxu0  ;;  %5177 = vmatmul.mubr.bf16.gmra.mxu0 %v9291_v10  ;;  %8178 = vmatpush3.bf16.msra.mxu1 %v5780_v52 }
 0x44c   : > { %v4987_v4 = vadd.f32 %v4986_v53, %v11803_v9  ;;  %8179 = vmatprep.subr.bf16.mxu1 %v5787_v41  ;;  %v5531_v35 = vpop.f32.mrf.mxu1  ;;  %5722 = vmatmul.mubr.bf16.gmra.mxu1 %v9294_v19 }
 0x44d   : > { %v4988_v6 = vpop.f32.mrf.mxu0  ;;  %5184 = vmatprep.mubr.bf16.mxu0 %v9299_v3  ;;  %5729 = vmatprep.mubr.bf16.mxu1 %v9302_v51  ;;  %v9320_v51 = vld [vmem:[%s11676_s2 + $0x7ec] ss:$16 sps:$4 sm:$0xff]  }
 0x44e   : > { %v11032_v46 = vadd.f32 %v5531_v35, %v4987_v4  ;;  %v5533_v13 = vpop.f32.mrf.mxu1  ;;  %v11808_v4 = vld [vmem:[#allocation37_spill] sm:$0xff] }
 0x44f   : > { %v4989_v60 = vpop.f32.mrf.mxu0  ;;  %8180 = vmatpush3.bf16.msra.mxu1 %v5779_v1  ;;  %v9308_v1 = vld [vmem:[%s11676_s2 + $0x7ac] ss:$16 sps:$4 sm:$0xff]  }
 0x450   : > { %v4990_v52 = vadd.f32 %v4989_v60, %v11804_v43  ;;  %8181 = vmatprep.subr.bf16.mxu1 %v5786_v47  ;;  %v5534_v20 = vpop.f32.mrf.mxu1  ;;  %v11806_v47 = vld [vmem:[#allocation35_spill] sm:$0xff]  ;;  %v5826_v60 = vld [vmem:[#allocation4] sm:$0xff] }
 0x451   : > { %v4991_v31 = vpop.f32.mrf.mxu0 }
 0x452   : > { %v11053_v41 = vadd.f32 %v5534_v20, %v4990_v52  ;;  %v5536_v23 = vpop.f32.mrf.mxu1  ;;  %v5827_v20 = vld [vmem:[#allocation4 + $0x8] sm:$0xff]  ;;  %v9315_v31 = vld [vmem:[%s11676_s2 + $0x7e0] ss:$16 sps:$4 sm:$0xff]  }
 0x453   : > { %v4994_v56 = vpop.f32.mrf.mxu0  ;;  %5185 = vmatmul.mubr.bf16.gmra.mxu0 %v9297_v58  ;;  %8182 = vmatpush3.bf16.msra.mxu1 %v11805_v44  ;;  %v5830_v58 = vld [vmem:[#allocation4 + $0x20] sm:$0xff]  ;;  %v9318_v44 = vld [vmem:[%s11676_s2 + $0x7e8] ss:$16 sps:$4 sm:$0xff]  }
 0x454   : > { %v4995_v33 = vadd.f32 %v4994_v56, %v11806_v47  ;;  %v5539_v42 = vpop.f32.mrf.mxu1  ;;  %5730 = vmatmul.mubr.bf16.gmra.mxu1 %v9300_v12  ;;  %5192 = vmatprep.mubr.bf16.mxu0 %v9305_v29  ;;  %v5831_v12 = vld [vmem:[#allocation4 + $0x28] sm:$0xff]  ;;  %v7923_v47 = vcombine.high %v5826_v60, %v5830_v58 }
 0x455   : > { %v4996_v22 = vpop.f32.mrf.mxu0  ;;  %5737 = vmatprep.mubr.bf16.mxu1 %v9308_v1  ;;  %v11809_v1 = vld [vmem:[#allocation38_spill] sm:$0xff] }
 0x456   : > { %v11061_v28 = vadd.f32 %v5539_v42, %v4995_v33  ;;  %v5541_v24 = vpop.f32.mrf.mxu1  ;;  %v7925_v42 = vcombine.high %v5827_v20, %v5831_v12 }
 0x457   : > { %v4997_v62 = vpop.f32.mrf.mxu0 }
 0x458   : > { %v4998_v27 = vadd.f32 %v4997_v62, %v11807_v59  ;;  %v5542_v21 = vpop.f32.mrf.mxu1  ;;  %v11810_v59 = vld [vmem:[#allocation39_spill] sm:$0xff] }
 0x459   : > { %v4999_v50 = vpop.f32.mrf.mxu0 }
 0x45a   : > { %v11076_v39 = vadd.f32 %v5542_v21, %v4998_v27  ;;  %v5544_v15 = vpop.f32.mrf.mxu1  ;;  %v5838_v50 = vld [vmem:[#allocation4 + $0x60] sm:$0xff] }
 0x45b   : > { %v5002_v30 = vpop.f32.mrf.mxu0  ;;  %5193 = vmatmul.mubr.bf16.gmra.mxu0 %v9303_v26 }
 0x45c   : > { %v5798_v16 = vpack.c.bf16 %v11076_v39, %v11061_v28  ;;  %v5003_v48 = vadd.f32 %v5002_v30, %v9866_v63  ;;  %v5547_v57 = vpop.f32.mrf.mxu1  ;;  %5738 = vmatmul.mubr.bf16.gmra.mxu1 %v9306_v38  ;;  %5200 = vmatprep.mubr.bf16.mxu0 %v9311_v8  ;;  %v9312_v63 = vld [vmem:[%s11676_s2 + $0x7c8] ss:$16 sps:$4 sm:$0xff]   ;;  %v5834_v8 = vld [vmem:[#allocation4 + $0x40] sm:$0xff] }
 0x45d   : > { %v5004_v54 = vpop.f32.mrf.mxu0  ;;  %5745 = vmatprep.mubr.bf16.mxu1 %v9314_v37  ;;  %v5835_v30 = vld [vmem:[#allocation4 + $0x48] sm:$0xff]  ;;  %v5922_v28 = vld [vmem:[#allocation4 + $0x300] sm:$0xff] }
 0x45e   : > { %v11081_v61 = vadd.f32 %v5547_v57, %v5003_v48  ;;  %v5549_v10 = vpop.f32.mrf.mxu1  ;;  %v5839_v48 = vld [vmem:[#allocation4 + $0x68] sm:$0xff]  ;;  %v7922_v54 = vcombine.low %v5826_v60, %v5830_v58  ;;  %v5842_v60 = vld [vmem:[#allocation4 + $0x80] sm:$0xff] }
 0x45f   : > { %v5005_v32 = vpop.f32.mrf.mxu0  ;;  %v11811_v10 = vld [vmem:[#allocation40_spill] sm:$0xff] }
 0x460   : > { %v5006_v49 = vadd.f32 %v5005_v32, %v9868_v11  ;;  %v5550_v19 = vpop.f32.mrf.mxu1  ;;  %v5846_v58 = vld [vmem:[#allocation4 + $0xa0] sm:$0xff] }
 0x461   : > { %v5007_v3 = vpop.f32.mrf.mxu0  ;;  %v5926_v39 = vld [vmem:[#allocation4 + $0x320] sm:$0xff] }
 0x462   : > { %v11096_v0 = vadd.f32 %v5550_v19, %v5006_v49  ;;  %v5552_v53 = vpop.f32.mrf.mxu1  ;;  %v7924_v49 = vcombine.low %v5827_v20, %v5831_v12  ;;  %v7931_v19 = vcombine.high %v5834_v8, %v5838_v50  ;;  %v5843_v12 = vld [vmem:[#allocation4 + $0x88] sm:$0xff] }
 0x463   : > { %v5010_v9 = vpop.f32.mrf.mxu0  ;;  %5201 = vmatmul.mubr.bf16.gmra.mxu0 %v9309_v17 }
 0x464   : > { %v5799_v11 = vpack.c.bf16 %v11096_v0, %v11081_v61  ;;  %v5011_v35 = vadd.f32 %v5010_v9, %v11808_v4  ;;  %v5555_v6 = vpop.f32.mrf.mxu1  ;;  %5746 = vmatmul.mubr.bf16.gmra.mxu1 %v9312_v63  ;;  %5208 = vmatprep.mubr.bf16.mxu0 %v9317_v14  ;;  %v7933_v14 = vcombine.high %v5835_v30, %v5839_v48  ;;  %v11812_v4 = vld [vmem:[#allocation41_spill] sm:$0xff]  ;;  %v5904_v61 = vld [vmem:[#allocation4 + $0x270] sm:$0xff] }
 0x465   : > { %v5012_v13 = vpop.f32.mrf.mxu0  ;;  %5753 = vmatprep.mubr.bf16.mxu1 %v9320_v51  ;;  %v11832_v0 = vld [vmem:[#allocation61_spill] sm:$0xff] }
 0x466   : > { %v11101_v43 = vadd.f32 %v5555_v6, %v5011_v35  ;;  %v5557_v52 = vpop.f32.mrf.mxu1 }
 0x467   : > { %v5013_v29 = vpop.f32.mrf.mxu0 }
 0x468   : > { %v5014_v23 = vadd.f32 %v5013_v29, %v11809_v1  ;;  %v5558_v56 = vpop.f32.mrf.mxu1  ;;  %v5847_v29 = vld [vmem:[#allocation4 + $0xa8] sm:$0xff]  ;;  %v7930_v1 = vcombine.low %v5834_v8, %v5838_v50  ;;  %v5850_v50 = vld [vmem:[#allocation4 + $0xc0] sm:$0xff] }
 0x469   : > { %v5015_v33 = vpop.f32.mrf.mxu0 }
 0x46a   : > { %v11110_v22 = vadd.f32 %v5558_v56, %v5014_v23  ;;  %v5560_v24 = vpop.f32.mrf.mxu1  ;;  %v11813_v23 = vld [vmem:[#allocation42_spill] sm:$0xff]  ;;  %v7939_v33 = vcombine.high %v5842_v60, %v5846_v58 }
 0x46b   : > { %v5018_v62 = vpop.f32.mrf.mxu0  ;;  %5209 = vmatmul.mubr.bf16.gmra.mxu0 %v9315_v31  ;;  %v7941_v24 = vcombine.high %v5843_v12, %v5847_v29 }
 0x46c   : > { %v5800_v26 = vpack.c.bf16 %v11110_v22, %v11101_v43  ;;  %v5019_v27 = vadd.f32 %v5018_v62, %v11810_v59  ;;  %v5563_v21 = vpop.f32.mrf.mxu1  ;;  %5754 = vmatmul.mubr.bf16.gmra.mxu1 %v9318_v44  ;;  %6626 = vmatprep.mubr.bf16.mxu0 %v7923_v47  ;;  %v7932_v47 = vcombine.low %v5835_v30, %v5839_v48  ;;  %v5854_v30 = vld [vmem:[#allocation4 + $0xe0] sm:$0xff] }
 0x46d   : > { %v5020_v38 = vpop.f32.mrf.mxu0  ;;  %6787 = vmatprep.mubr.bf16.mxu1 %v7925_v42  ;;  %v5914_v43 = vld [vmem:[#allocation4 + $0x2c0] sm:$0xff] }
 0x46e   : > { %v11115_v37 = vadd.f32 %v5563_v21, %v5019_v27  ;;  %v5565_v15 = vpop.f32.mrf.mxu1  ;;  %v11814_v38 = vld [vmem:[#allocation43_spill] sm:$0xff]  ;;  %v5918_v22 = vld [vmem:[#allocation4 + $0x2e0] sm:$0xff] }
 0x46f   : > { %v5021_v57 = vpop.f32.mrf.mxu0 }
 0x470   : > { %v5022_v32 = vadd.f32 %v5021_v57, %v11811_v10  ;;  %v5566_v17 = vpop.f32.mrf.mxu1  ;;  %v5851_v10 = vld [vmem:[#allocation4 + $0xc8] sm:$0xff] }
 0x471   : > { %v5023_v63 = vpop.f32.mrf.mxu0 }
 0x472   : > { %v11118_v3 = vadd.f32 %v5566_v17, %v5022_v32  ;;  %v5568_v51 = vpop.f32.mrf.mxu1  ;;  %v5855_v32 = vld [vmem:[#allocation4 + $0xe8] sm:$0xff] }
 0x473   : > { %v5026_v53 = vpop.f32.mrf.mxu0  ;;  %6627 = vmatmul.mubr.bf16.vlgmr.msra.gmra.mxu0 %v7922_v54  ;;  %v7940_v51 = vcombine.low %v5843_v12, %v5847_v29 }
 0x474   : > { %v5801_v9 = vpack.c.bf16 %v11118_v3, %v11115_v37  ;;  %v5027_v35 = vadd.f32 %v5026_v53, %v11812_v4  ;;  %v5571_v6 = vpop.f32.mrf.mxu1  ;;  %6788 = vmatmul.mubr.bf16.vlgmr.msra.gmra.mxu1 %v7924_v49  ;;  %6634 = vmatprep.mubr.bf16.mxu0 %v7931_v19  ;;  %v7938_v49 = vcombine.low %v5842_v60, %v5846_v58  ;;  %v11815_v19 = vld [vmem:[#allocation44_spill] sm:$0xff]  ;;  %v11830_v3 = vld [vmem:[#allocation59_spill] sm:$0xff] }
 0x475   : > { %v5028_v13 = vpop.f32.mrf.mxu0  ;;  %6795 = vmatprep.mubr.bf16.mxu1 %v7933_v14  ;;  %v7947_v53 = vcombine.high %v5850_v50, %v5854_v30  ;;  %v5858_v60 = vld [vmem:[#allocation4 + $0x100] sm:$0xff] }
 0x476   : > { %v11123_v52 = vadd.f32 %v5571_v6, %v5027_v35  ;;  %v5573_v20 = vpop.f32.mrf.mxu1  ;;  %v7949_v35 = vcombine.high %v5851_v10, %v5855_v32  ;;  %v5862_v58 = vld [vmem:[#allocation4 + $0x120] sm:$0xff] }
 0x477   : > { %v5029_v31 = vpop.f32.mrf.mxu0 }
 0x478   : > { %v5030_v56 = vadd.f32 %v5029_v31, %v11813_v23  ;;  %v5574_v44 = vpop.f32.mrf.mxu1 }
 0x479   : > { %v5031_v42 = vpop.f32.mrf.mxu0 }
 0x47a   : > { %v11126_v62 = vadd.f32 %v5574_v44, %v5030_v56  ;;  %v5576_v59 = vpop.f32.mrf.mxu1  ;;  %v11816_v56 = vld [vmem:[#allocation45_spill] sm:$0xff]  ;;  %v7946_v42 = vcombine.low %v5850_v50, %v5854_v30  ;;  %v5866_v30 = vld [vmem:[#allocation4 + $0x140] sm:$0xff] }
 0x47b   : > { %v5034_v27 = vpop.f32.mrf.mxu0  ;;  %6635 = vmatmul.mubr.bf16.gmra.mxu0 %v7930_v1  ;;  %v5859_v44 = vld [vmem:[#allocation4 + $0x108] sm:$0xff] }
 0x47c   : > { %v5035_v15 = vadd.f32 %v5034_v27, %v11814_v38  ;;  %v5579_v57 = vpop.f32.mrf.mxu1  ;;  %6796 = vmatmul.mubr.bf16.gmra.mxu1 %v7932_v47  ;;  %6642 = vmatprep.mubr.bf16.mxu0 %v7939_v33  ;;  %v5863_v47 = vld [vmem:[#allocation4 + $0x128] sm:$0xff]  ;;  %v7948_v38 = vcombine.low %v5851_v10, %v5855_v32  ;;  %v5870_v10 = vld [vmem:[#allocation4 + $0x160] sm:$0xff]  ;;  %v11818_v32 = vld [vmem:[#allocation47_spill] sm:$0xff] }
 0x47d   : > { %v5036_v8 = vpop.f32.mrf.mxu0  ;;  %6803 = vmatprep.mubr.bf16.mxu1 %v7941_v24  ;;  %v11817_v24 = vld [vmem:[#allocation46_spill] sm:$0xff] }
 0x47e   : > { %v11131_v48 = vadd.f32 %v5579_v57, %v5035_v15  ;;  %v5581_v54 = vpop.f32.mrf.mxu1  ;;  %v7955_v15 = vcombine.high %v5858_v60, %v5862_v58  ;;  %v7957_v8 = vcombine.high %v5859_v44, %v5863_v47 }
 0x47f   : > { %v5037_v17 = vpop.f32.mrf.mxu0 }
 0x480   : > { %v5038_v63 = vadd.f32 %v5037_v17, %v11815_v19  ;;  %v5582_v14 = vpop.f32.mrf.mxu1 }
 0x481   : > { %v5039_v4 = vpop.f32.mrf.mxu0 }
 0x482   : > { %v11134_v6 = vadd.f32 %v5582_v14, %v5038_v63  ;;  %v5584_v13 = vpop.f32.mrf.mxu1  ;;  %v5867_v4 = vld [vmem:[#allocation4 + $0x148] sm:$0xff] }
 0x483   : > { %v5042_v20 = vpop.f32.mrf.mxu0  ;;  %6643 = vmatmul.mubr.bf16.gmra.mxu0 %v7938_v49 }
 0x484   : > { %v5587_v1 = vpop.f32.mrf.mxu1  ;;  %6804 = vmatmul.mubr.bf16.gmra.mxu1 %v7940_v51  ;;  %6650 = vmatprep.mubr.bf16.mxu0 %v7947_v53  ;;  %v5043_v12 = vadd.f32 %v5042_v20, %v11816_v56  ;;  %v7954_v20 = vcombine.low %v5858_v60, %v5862_v58  ;;  %v5874_v58 = vld [vmem:[#allocation4 + $0x180] sm:$0xff] }
 0x485   : > { %v5044_v23 = vpop.f32.mrf.mxu0  ;;  %6811 = vmatprep.mubr.bf16.mxu1 %v7949_v35  ;;  %v5871_v35 = vld [vmem:[#allocation4 + $0x168] sm:$0xff] }
 0x486   : > { %v5589_v29 = vpop.f32.mrf.mxu1  ;;  %v11140_v54 = vadd.f32 %v5587_v1, %v5043_v12  ;;  %v11819_v1 = vld [vmem:[#allocation48_spill] sm:$0xff]  ;;  %v7956_v12 = vcombine.low %v5859_v44, %v5863_v47  ;;  %v11820_v47 = vld [vmem:[#allocation49_spill] sm:$0xff] }
 0x487   : > { %v5045_v33 = vpop.f32.mrf.mxu0  ;;  %v7963_v29 = vcombine.high %v5866_v30, %v5870_v10  ;;  %v5878_v44 = vld [vmem:[#allocation4 + $0x1a0] sm:$0xff] }
 0x488   : > { %v5046_v59 = vadd.f32 %v5045_v33, %v11817_v24  ;;  %v5590_v27 = vpop.f32.mrf.mxu1 }
 0x489   : > { %v5047_v57 = vpop.f32.mrf.mxu0 }
 0x48a   : > { %v11142_v17 = vadd.f32 %v5590_v27, %v5046_v59  ;;  %v5592_v49 = vpop.f32.mrf.mxu1 }
 0x48b   : > { %v5050_v19 = vpop.f32.mrf.mxu0  ;;  %6651 = vmatmul.mubr.bf16.gmra.mxu0 %v7946_v42  ;;  %v7965_v42 = vcombine.high %v5867_v4, %v5871_v35 }
 0x48c   : > { %v5595_v14 = vpop.f32.mrf.mxu1  ;;  %6812 = vmatmul.mubr.bf16.gmra.mxu1 %v7948_v38  ;;  %6658 = vmatprep.mubr.bf16.mxu0 %v7955_v15  ;;  %v5051_v51 = vadd.f32 %v5050_v19, %v11818_v32  ;;  %v5875_v19 = vld [vmem:[#allocation4 + $0x188] sm:$0xff]  ;;  %v7962_v32 = vcombine.low %v5866_v30, %v5870_v10  ;;  %v5882_v10 = vld [vmem:[#allocation4 + $0x1c0] sm:$0xff] }
 0x48d   : > { %v5052_v50 = vpop.f32.mrf.mxu0  ;;  %6819 = vmatprep.mubr.bf16.mxu1 %v7957_v8 }
 0x48e   : > { %v5597_v53 = vpop.f32.mrf.mxu1  ;;  %v11148_v24 = vadd.f32 %v5595_v14, %v5051_v51  ;;  %v5879_v14 = vld [vmem:[#allocation4 + $0x1a8] sm:$0xff]  ;;  %v11821_v51 = vld [vmem:[#allocation50_spill] sm:$0xff] }
 0x48f   : > { %v5053_v13 = vpop.f32.mrf.mxu0 }
 0x490   : > { %v5054_v23 = vadd.f32 %v5053_v13, %v11819_v1  ;;  %v5598_v56 = vpop.f32.mrf.mxu1  ;;  %v7971_v1 = vcombine.high %v5874_v58, %v5878_v44 }
 0x491   : > { %v5055_v33 = vpop.f32.mrf.mxu0 }
 0x492   : > { %v11150_v59 = vadd.f32 %v5598_v56, %v5054_v23  ;;  %v5600_v27 = vpop.f32.mrf.mxu1  ;;  %v7973_v56 = vcombine.high %v5875_v19, %v5879_v14 }
 0x493   : > { %v5058_v38 = vpop.f32.mrf.mxu0  ;;  %6659 = vmatmul.mubr.bf16.gmra.mxu0 %v7954_v20  ;;  %v7964_v20 = vcombine.low %v5867_v4, %v5871_v35  ;;  %v5886_v4 = vld [vmem:[#allocation4 + $0x1e0] sm:$0xff]  ;;  %v11822_v35 = vld [vmem:[#allocation51_spill] sm:$0xff] }
 0x494   : > { %v5805_v15 = vpack.c.bf16 %v11150_v59, %v11148_v24  ;;  %v5603_v57 = vpop.f32.mrf.mxu1  ;;  %6820 = vmatmul.mubr.bf16.gmra.mxu1 %v7956_v12  ;;  %6666 = vmatprep.mubr.bf16.mxu0 %v7963_v29  ;;  %v5059_v8 = vadd.f32 %v5058_v38, %v11820_v47  ;;  %v11834_v24 = vld [vmem:[#allocation62_spill] sm:$0xff] }
 0x495   : > { %v5060_v60 = vpop.f32.mrf.mxu0  ;;  %6827 = vmatprep.mubr.bf16.mxu1 %v7965_v42 }
 0x496   : > { %v5605_v49 = vpop.f32.mrf.mxu1  ;;  %v11156_v12 = vadd.f32 %v5603_v57, %v5059_v8  ;;  %v5883_v57 = vld [vmem:[#allocation4 + $0x1c8] sm:$0xff] }
 0x497   : > { %v5061_v50 = vpop.f32.mrf.mxu0  ;;  %v5887_v8 = vld [vmem:[#allocation4 + $0x1e8] sm:$0xff] }
 0x498   : > { %v5062_v53 = vadd.f32 %v5061_v50, %v11821_v51  ;;  %v5606_v13 = vpop.f32.mrf.mxu1  ;;  %v7970_v50 = vcombine.low %v5874_v58, %v5878_v44  ;;  %v11823_v51 = vld [vmem:[#allocation52_spill] sm:$0xff]  ;;  %v7981_v5 = vcombine.high %v5883_v57, %v5887_v8 }
 0x499   : > { %v5063_v23 = vpop.f32.mrf.mxu0  ;;  %v5890_v44 = vld [vmem:[#allocation4 + $0x200] sm:$0xff] }
 0x49a   : > { %v11158_v29 = vadd.f32 %v5606_v13, %v5062_v53  ;;  %v5608_v33 = vpop.f32.mrf.mxu1  ;;  %v7972_v13 = vcombine.low %v5875_v19, %v5879_v14  ;;  %v7979_v23 = vcombine.high %v5882_v10, %v5886_v4  ;;  %v5894_v19 = vld [vmem:[#allocation4 + $0x220] sm:$0xff]  ;;  %v11824_v14 = vld [vmem:[#allocation53_spill] sm:$0xff] }
 0x49b   : > { %v5066_v42 = vpop.f32.mrf.mxu0  ;;  %6667 = vmatmul.mubr.bf16.gmra.mxu0 %v7962_v32  ;;  %v7987_v21 = vcombine.high %v5890_v44, %v5894_v19 }
 0x49c   : > { %v5806_v27 = vpack.c.bf16 %v11158_v29, %v11156_v12  ;;  %v5611_v38 = vpop.f32.mrf.mxu1  ;;  %6828 = vmatmul.mubr.bf16.gmra.mxu1 %v7964_v20  ;;  %6674 = vmatprep.mubr.bf16.mxu0 %v7971_v1  ;;  %v5067_v60 = vadd.f32 %v5066_v42, %v11822_v35 }
 0x49d   : > { %v5068_v30 = vpop.f32.mrf.mxu0  ;;  %6835 = vmatprep.mubr.bf16.mxu1 %v7973_v56 }
 0x49e   : > { %v5613_v47 = vpop.f32.mrf.mxu1  ;;  %v11164_v20 = vadd.f32 %v5611_v38, %v5067_v60  ;;  %v5891_v38 = vld [vmem:[#allocation4 + $0x208] sm:$0xff] }
 0x49f   : > { %v5069_v49 = vpop.f32.mrf.mxu0  ;;  %v5895_v60 = vld [vmem:[#allocation4 + $0x228] sm:$0xff] }
 0x4a0   : > { %v5070_v53 = vadd.f32 %v5069_v49, %v11823_v51  ;;  %v5614_v32 = vpop.f32.mrf.mxu1  ;;  %v7989_v31 = vcombine.high %v5891_v38, %v5895_v60 }
 0x4a1   : > { %v5071_v33 = vpop.f32.mrf.mxu0 }
 0x4a2   : > { %v11166_v1 = vadd.f32 %v5614_v32, %v5070_v53  ;;  %v5616_v56 = vpop.f32.mrf.mxu1  ;;  %v7978_v53 = vcombine.low %v5882_v10, %v5886_v4  ;;  %v11825_v32 = vld [vmem:[#allocation54_spill] sm:$0xff]  ;;  %v5902_v10 = vld [vmem:[#allocation4 + $0x260] sm:$0xff]  ;;  %v11826_v4 = vld [vmem:[#allocation55_spill] sm:$0xff] }
 0x4a3   : > { %v5074_v30 = vpop.f32.mrf.mxu0  ;;  %6675 = vmatmul.mubr.bf16.gmra.mxu0 %v7970_v50  ;;  %v7980_v56 = vcombine.low %v5883_v57, %v5887_v8  ;;  %v5899_v57 = vld [vmem:[#allocation4 + $0x248] sm:$0xff] }
 0x4a4   : > { %v5807_v42 = vpack.c.bf16 %v11166_v1, %v11164_v20  ;;  %v5619_v35 = vpop.f32.mrf.mxu1  ;;  %6836 = vmatmul.mubr.bf16.gmra.mxu1 %v7972_v13  ;;  %6682 = vmatprep.mubr.bf16.mxu0 %v7979_v23  ;;  %v5075_v47 = vadd.f32 %v5074_v30, %v11824_v14  ;;  %v5898_v14 = vld [vmem:[#allocation4 + $0x240] sm:$0xff]  ;;  %v5903_v8 = vld [vmem:[#allocation4 + $0x268] sm:$0xff] }
 0x4a5   : > { %v5076_v58 = vpop.f32.mrf.mxu0  ;;  %6843 = vmatprep.mubr.bf16.mxu1 %v7981_v5  ;;  %v11831_v20 = vld [vmem:[#allocation60_spill] sm:$0xff] }
 0x4a6   : > { %v5621_v49 = vpop.f32.mrf.mxu1  ;;  %v5620_v13 = vadd.f32 %v5619_v35, %v5075_v47  ;;  %v11827_v35 = vld [vmem:[#allocation56_spill] sm:$0xff] }
 0x4a7   : > { %v5077_v51 = vpop.f32.mrf.mxu0 }
 0x4a8   : > { %v5078_v33 = vadd.f32 %v5077_v51, %v11825_v32  ;;  %v5622_v50 = vpop.f32.mrf.mxu1  ;;  %v7986_v32 = vcombine.low %v5890_v44, %v5894_v19 }
 0x4a9   : > { %v5079_v2 = vpop.f32.mrf.mxu0 }
 0x4aa   : > { %v5623_v23 = vadd.f32 %v5622_v50, %v5078_v33  ;;  %v5624_v58 = vpop.f32.mrf.mxu1  ;;  %v7988_v50 = vcombine.low %v5891_v38, %v5895_v60  ;;  %v5906_v38 = vld [vmem:[#allocation4 + $0x280] sm:$0xff] }
 0x4ab   : > { %v5082_v5 = vpop.f32.mrf.mxu0  ;;  %6683 = vmatmul.mubr.bf16.gmra.mxu0 %v7978_v53  ;;  %v7995_v53 = vcombine.high %v5898_v14, %v5902_v10  ;;  %v5910_v60 = vld [vmem:[#allocation4 + $0x2a0] sm:$0xff] }
 0x4ac   : > { %v5808_v34 = vpack.c.bf16 %v5623_v23, %v5620_v13  ;;  %v5627_v63 = vpop.f32.mrf.mxu1  ;;  %6844 = vmatmul.mubr.bf16.gmra.mxu1 %v7980_v56  ;;  %6690 = vmatprep.mubr.bf16.mxu0 %v7987_v21  ;;  %v5083_v49 = vadd.f32 %v5082_v5, %v11826_v4  ;;  %v7997_v23 = vcombine.high %v5899_v57, %v5903_v8 }
 0x4ad   : > { %v5084_v30 = vpop.f32.mrf.mxu0  ;;  %6851 = vmatprep.mubr.bf16.mxu1 %v7989_v31 }
 0x4ae   : > { %v5629_v51 = vpop.f32.mrf.mxu1  ;;  %v5628_v56 = vadd.f32 %v5627_v63, %v5083_v49  ;;  %v5907_v63 = vld [vmem:[#allocation4 + $0x288] sm:$0xff] }
 0x4af   : > { %v5085_v2 = vpop.f32.mrf.mxu0  ;;  %v5911_v49 = vld [vmem:[#allocation4 + $0x2a8] sm:$0xff] }
 0x4b0   : > { %v5086_v47 = vadd.f32 %v5085_v2, %v11827_v35  ;;  %v5630_v33 = vpop.f32.mrf.mxu1 }
 0x4b1   : > { %v5087_v13 = vpop.f32.mrf.mxu0 }
 0x4b2   : > { %v5631_v21 = vadd.f32 %v5630_v33, %v5086_v47  ;;  %v5632_v58 = vpop.f32.mrf.mxu1  ;;  %v7994_v47 = vcombine.low %v5898_v14, %v5902_v10 }
 0x4b3   : > { %v5090_v31 = vpop.f32.mrf.mxu0  ;;  %6691 = vmatmul.mubr.bf16.gmra.mxu0 %v7986_v32  ;;  %v11829_v32 = vld [vmem:[#allocation58_spill] sm:$0xff]  ;;  %v5919_v58 = vld [vmem:[#allocation4 + $0x2e8] sm:$0xff] }
 0x4b4   : > { %v5809_v30 = vpack.c.bf16 %v5631_v21, %v5628_v56  ;;  %v5091_v5 = vadd.f32 %v5090_v31, %v11828_v40  ;;  %v5635_v4 = vpop.f32.mrf.mxu1  ;;  %6852 = vmatmul.mubr.bf16.gmra.mxu1 %v7988_v50  ;;  %6698 = vmatprep.mubr.bf16.mxu0 %v7995_v53  ;;  %v7996_v50 = vcombine.low %v5899_v57, %v5903_v8  ;;  %v5915_v8 = vld [vmem:[#allocation4 + $0x2c8] sm:$0xff] }
 0x4b5   : > { %v5092_v51 = vpop.f32.mrf.mxu0  ;;  %6859 = vmatprep.mubr.bf16.mxu1 %v7997_v23  ;;  %v8003_v53 = vcombine.high %v5906_v38, %v5910_v60  ;;  %v8005_v56 = vcombine.high %v5907_v63, %v5911_v49  ;;  %v8002_v31 = vcombine.low %v5906_v38, %v5910_v60  ;;  %v11833_v60 = vpack.c.bf16 %v11053_v41, %v11032_v46 }
 0x4b6   : > { %v11175_v44 = vadd.f32 %v5635_v4, %v5091_v5  ;;  %8279 = vmatprep.subr.bf16.mxu0 %v5809_v30  ;;  %v5637_v19 = vpop.f32.mrf.mxu1  ;;  %v8004_v5 = vcombine.low %v5907_v63, %v5911_v49  ;;  %v8011_v4 = vcombine.high %v5914_v43, %v5918_v22  ;;  %v5923_v63 = vld [vmem:[#allocation4 + $0x308] sm:$0xff]  ;;  %v11836_v46 = vpack.c.bf16 %v11021_v36, %v11000_v18  ;;  %v5930_v18 = vld [vmem:[#allocation4 + $0x340] sm:$0xff] }
 0x4b7   : > { %v5093_v2 = vpop.f32.mrf.mxu0  ;;  %8280 = vmatpush3.bf16.msra.mxu0 %v5801_v9  ;;  %v5927_v49 = vld [vmem:[#allocation4 + $0x328] sm:$0xff]  ;;  %v5934_v36 = vld [vmem:[#allocation4 + $0x360] sm:$0xff] }
 0x4b8   : > { %v5094_v40 = vadd.f32 %v5093_v2, %v11829_v32  ;;  %8281 = vmatprep.subr.bf16.mxu0 %v5808_v34  ;;  %v5638_v35 = vpop.f32.mrf.mxu1  ;;  %v8013_v2 = vcombine.high %v5915_v8, %v5919_v58 }
 0x4b9   : > { %v5095_v33 = vpop.f32.mrf.mxu0 }
 0x4ba   : > { %v11181_v13 = vadd.f32 %v5638_v35, %v5094_v40  ;;  %v5640_v23 = vpop.f32.mrf.mxu1  ;;  %v8010_v35 = vcombine.low %v5914_v43, %v5918_v22  ;;  %v8012_v33 = vcombine.low %v5915_v8, %v5919_v58  ;;  %v11839_v22 = vpack.c.bf16 %v10989_v25, %v10968_v45  ;;  %v5935_v8 = vld [vmem:[#allocation4 + $0x368] sm:$0xff]  ;;  %v11246_v25 = vld [vmem:[#allocation4 + $0x18] sm:$0xff] }
 0x4bb   : > { %v5098_v21 = vpop.f32.mrf.mxu0  ;;  %8282 = vmatpush3.bf16.msra.mxu0 %v5800_v26  ;;  %v11841_v58 = vpack.c.bf16 %v11126_v62, %v11123_v52  ;;  %v11842_v45 = vpack.c.bf16 %v10957_v7, %v10939_v55  ;;  %v11843_v62 = vld [vmem:[#allocation65_spill] sm:$0xff]  ;;  %v5938_v7 = vld [vmem:[#allocation4 + $0x380] sm:$0xff] }
 0x4bc   : > { %v5099_v9 = vadd.f32 %v5098_v21, %v11830_v3  ;;  %8283 = vmatprep.subr.bf16.mxu0 %v5807_v42  ;;  %v5643_v34 = vpop.f32.mrf.mxu1  ;;  %6699 = vmatmul.mubr.bf16.gmra.mxu0 %v7994_v47  ;;  %v11837_v3 = vld [vmem:[#allocation63_spill] sm:$0xff] }
 0x4bd   : > { %v5100_v14 = vpop.f32.mrf.mxu0  ;;  %6860 = vmatmul.mubr.bf16.gmra.mxu1 %v7996_v50  ;;  %6706 = vmatprep.mubr.bf16.mxu0 %v8003_v53  ;;  %v8019_v50 = vcombine.high %v5922_v28, %v5926_v39 }
 0x4be   : > { %v11192_v10 = vadd.f32 %v5643_v34, %v5099_v9  ;;  %v5645_v57 = vpop.f32.mrf.mxu1  ;;  %6867 = vmatprep.mubr.bf16.mxu1 %v8005_v56  ;;  %v8021_v56 = vcombine.high %v5923_v63, %v5927_v49 }
 0x4bf   : > { %v5101_v26 = vpop.f32.mrf.mxu0  ;;  %8284 = vmatpush3.bf16.msra.mxu0 %v5799_v11 }
 0x4c0   : > { %v5102_v1 = vadd.f32 %v5101_v26, %v11831_v20  ;;  %8285 = vmatprep.subr.bf16.mxu0 %v5806_v27  ;;  %v5646_v42 = vpop.f32.mrf.mxu1  ;;  %v5931_v26 = vld [vmem:[#allocation4 + $0x348] sm:$0xff] }
 0x4c1   : > { %v5103_v30 = vpop.f32.mrf.mxu0 }
 0x4c2   : > { %v11201_v51 = vadd.f32 %v5646_v42, %v5102_v1  ;;  %v5648_v19 = vpop.f32.mrf.mxu1  ;;  %v8018_v1 = vcombine.low %v5922_v28, %v5926_v39  ;;  %v8027_v30 = vcombine.high %v5930_v18, %v5934_v36  ;;  %v5942_v28 = vld [vmem:[#allocation4 + $0x3a0] sm:$0xff] }
 0x4c3   : > { %v5106_v32 = vpop.f32.mrf.mxu0  ;;  %8286 = vmatpush3.bf16.msra.mxu0 %v5798_v16  ;;  %v8029_v19 = vcombine.high %v5931_v26, %v5935_v8 }
 0x4c4   : > { %v5107_v11 = vadd.f32 %v5106_v32, %v11832_v0  ;;  %8287 = vmatprep.subr.bf16.mxu0 %v5805_v15  ;;  %v5651_v12 = vpop.f32.mrf.mxu1  ;;  %6707 = vmatmul.mubr.bf16.gmra.mxu0 %v8002_v31  ;;  %v11835_v15 = vpack.c.bf16 %v11142_v17, %v11140_v54  ;;  %v11838_v17 = vpack.c.bf16 %v11134_v6, %v11131_v48  ;;  %v11840_v48 = vld [vmem:[#allocation64_spill] sm:$0xff]  ;;  %v11248_v32 = vld [vmem:[#allocation4 + $0x38] sm:$0xff] }
 0x4c5   : > { %v5108_v29 = vpop.f32.mrf.mxu0  ;;  %6868 = vmatmul.mubr.bf16.gmra.mxu1 %v8004_v5  ;;  %6714 = vmatprep.mubr.bf16.mxu0 %v8011_v4  ;;  %v8020_v31 = vcombine.low %v5923_v63, %v5927_v49  ;;  %v11844_v63 = vld [vmem:[#allocation66_spill] sm:$0xff] }
 0x4c6   : > { %v11212_v27 = vadd.f32 %v5651_v12, %v5107_v11  ;;  %v5653_v38 = vpop.f32.mrf.mxu1  ;;  %6875 = vmatprep.mubr.bf16.mxu1 %v8013_v2 }
 0x4c7   : > { %v5109_v16 = vpop.f32.mrf.mxu0  ;;  %8288 = vmatpush3.bf16.msra.mxu0 %v11833_v60  ;;  %v5943_v60 = vld [vmem:[#allocation4 + $0x3a8] sm:$0xff] }
 0x4c8   : > { %v5110_v59 = vadd.f32 %v5109_v16, %v11834_v24  ;;  %8289 = vmatprep.subr.bf16.mxu0 %v11835_v15  ;;  %v5654_v40 = vpop.f32.mrf.mxu1  ;;  %v5939_v16 = vld [vmem:[#allocation4 + $0x388] sm:$0xff] }
 0x4c9   : > { %v5111_v47 = vpop.f32.mrf.mxu0 }
 0x4ca   : > { %v11221_v53 = vadd.f32 %v5654_v40, %v5110_v59  ;;  %v5656_v23 = vpop.f32.mrf.mxu1  ;;  %v8026_v59 = vcombine.low %v5930_v18, %v5934_v36  ;;  %v8028_v40 = vcombine.low %v5931_v26, %v5935_v8  ;;  %v5947_v36 = vld [vmem:[#allocation4 + $0x3c8] sm:$0xff] }
 0x4cb   : > { %v5114_v21 = vpop.f32.mrf.mxu0  ;;  %8290 = vmatpush3.bf16.msra.mxu0 %v11836_v46 }
 0x4cc   : > { %v5812_v41 = vpack.c.bf16 %v11221_v53, %v11212_v27  ;;  %v5115_v54 = vadd.f32 %v5114_v21, %v11837_v3  ;;  %8291 = vmatprep.subr.bf16.mxu0 %v11838_v17  ;;  %v5659_v9 = vpop.f32.mrf.mxu1  ;;  %6715 = vmatmul.mubr.bf16.gmra.mxu0 %v8010_v35  ;;  %v8035_v35 = vcombine.high %v5938_v7, %v5942_v28  ;;  %v11845_v21 = vld [vmem:[#allocation67_spill] sm:$0xff] }
 0x4cd   : > { %v5116_v34 = vpop.f32.mrf.mxu0  ;;  %6876 = vmatmul.mubr.bf16.gmra.mxu1 %v8012_v33  ;;  %6722 = vmatprep.mubr.bf16.mxu0 %v8019_v50  ;;  %v8037_v50 = vcombine.high %v5939_v16, %v5943_v60  ;;  %v11868_v27 = vpack.c.bf16 %v11201_v51, %v11192_v10  ;;  %v11870_v10 = vpack.c.bf16 %v11181_v13, %v11175_v44 }
 0x4ce   : > { %v11232_v14 = vadd.f32 %v5659_v9, %v5115_v54  ;;  %v5661_v57 = vpop.f32.mrf.mxu1  ;;  %6883 = vmatprep.mubr.bf16.mxu1 %v8021_v56  ;;  %v5946_v34 = vld [vmem:[#allocation4 + $0x3c0] sm:$0xff] }
 0x4cf   : > { %v5117_v43 = vpop.f32.mrf.mxu0  ;;  %8292 = vmatpush3.bf16.msra.mxu0 %v11839_v22  ;;  %v5950_v57 = vld [vmem:[#allocation4 + $0x3e0] sm:$0xff] }
 0x4d0   : > { %v5118_v6 = vadd.f32 %v5117_v43, %v11840_v48  ;;  %8293 = vmatprep.subr.bf16.mxu0 %v11841_v58  ;;  %v5662_v20 = vpop.f32.mrf.mxu1  ;;  %v5951_v43 = vld [vmem:[#allocation4 + $0x3e8] sm:$0xff]  ;;  %v11846_v22 = vld [vmem:[#allocation68_spill] sm:$0xff]  ;;  %v8034_v48 = vcombine.low %v5938_v7, %v5942_v28  ;;  %v8036_v58 = vcombine.low %v5939_v16, %v5943_v60  ;;  %v11848_v28 = vld [vmem:[#allocation70_spill] sm:$0xff]  ;;  %v8042_v60 = vcombine.low %v5946_v34, %v5950_v57 }
 0x4d1   : > { %v5119_v42 = vpop.f32.mrf.mxu0 }
 0x4d2   : > { %v11241_v5 = vadd.f32 %v5662_v20, %v5118_v6  ;;  %v5664_v4 = vpop.f32.mrf.mxu1  ;;  %v8043_v20 = vcombine.high %v5946_v34, %v5950_v57  ;;  %v5840_v34 = vld [vmem:[#allocation4 + $0x70] sm:$0xff] }
 0x4d3   : > { %v5122_v2 = vpop.f32.mrf.mxu0  ;;  %8294 = vmatpush3.bf16.msra.mxu0 %v11842_v45 }
 0x4d4   : > { %v5813_v52 = vpack.c.bf16 %v11241_v5, %v11232_v14  ;;  %v5123_v0 = vadd.f32 %v5122_v2, %v11843_v62  ;;  %v5667_v11 = vpop.f32.mrf.mxu1  ;;  %6723 = vmatmul.mubr.bf16.gmra.mxu0 %v8018_v1 }
 0x4d5   : > { %v5124_v29 = vpop.f32.mrf.mxu0  ;;  %6884 = vmatmul.mubr.bf16.gmra.mxu1 %v8020_v31  ;;  %6730 = vmatprep.mubr.bf16.mxu0 %v8027_v30  ;;  %v8045_v31 = vcombine.high %v5947_v36, %v5951_v43 }
 0x4d6   : > { %v11255_v38 = vadd.f32 %v5667_v11, %v5123_v0  ;;  %v5669_v55 = vpop.f32.mrf.mxu1  ;;  %6891 = vmatprep.mubr.bf16.mxu1 %v8029_v19  ;;  %v11847_v19 = vld [vmem:[#allocation69_spill] sm:$0xff]  ;;  %v5828_v29 = vld [vmem:[#allocation4 + $0x10] sm:$0xff] }
 0x4d7   : > { %v5125_v39 = vpop.f32.mrf.mxu0  ;;  %v5832_v55 = vld [vmem:[#allocation4 + $0x30] sm:$0xff] }
 0x4d8   : > { %v5126_v49 = vadd.f32 %v5125_v39, %v11844_v63  ;;  %v5670_v24 = vpop.f32.mrf.mxu1 }
 0x4d9   : > { %v5127_v15 = vpop.f32.mrf.mxu0 }
 0x4da   : > { %v11258_v47 = vadd.f32 %v5670_v24, %v5126_v49  ;;  %v5672_v33 = vpop.f32.mrf.mxu1  ;;  %v8044_v49 = vcombine.low %v5947_v36, %v5951_v43  ;;  %v7927_v24 = vcombine.high %v5828_v29, %v5832_v55 }
 0x4db   : > { %v5130_v23 = vpop.f32.mrf.mxu0 }
 0x4dc   : > { %v5814_v56 = vpack.c.bf16 %v11258_v47, %v11255_v38  ;;  %v5131_v46 = vadd.f32 %v5130_v23, %v11845_v21  ;;  %v5675_v3 = vpop.f32.mrf.mxu1  ;;  %6731 = vmatmul.mubr.bf16.gmra.mxu0 %v8026_v59 }
 0x4dd   : > { %v5132_v54 = vpop.f32.mrf.mxu0  ;;  %6892 = vmatmul.mubr.bf16.gmra.mxu1 %v8028_v40  ;;  %6738 = vmatprep.mubr.bf16.mxu0 %v8035_v35  ;;  %v7929_v40 = vcombine.high %v11246_v25, %v11248_v32 }
 0x4de   : > { %v11263_v17 = vadd.f32 %v5675_v3, %v5131_v46  ;;  %v5677_v9 = vpop.f32.mrf.mxu1  ;;  %6899 = vmatprep.mubr.bf16.mxu1 %v8037_v50  ;;  %v11849_v50 = vld [vmem:[#allocation71_spill] sm:$0xff] }
 0x4df   : > { %v5133_v18 = vpop.f32.mrf.mxu0  ;;  %v5836_v9 = vld [vmem:[#allocation4 + $0x50] sm:$0xff] }
 0x4e0   : > { %v5134_v26 = vadd.f32 %v5133_v18, %v11846_v22  ;;  %v5678_v8 = vpop.f32.mrf.mxu1  ;;  %v11850_v18 = vld [vmem:[#allocation72_spill] sm:$0xff]  ;;  %v7926_v22 = vcombine.low %v5828_v29, %v5832_v55  ;;  %v11852_v55 = vld [vmem:[#allocation74_spill] sm:$0xff] }
 0x4e1   : > { %v5135_v6 = vpop.f32.mrf.mxu0 }
 0x4e2   : > { %v11266_v1 = vadd.f32 %v5678_v8, %v5134_v26  ;;  %v5680_v42 = vpop.f32.mrf.mxu1  ;;  %v7935_v8 = vcombine.high %v5836_v9, %v5840_v34 }
 0x4e3   : > { %v5138_v30 = vpop.f32.mrf.mxu0  ;;  %v11851_v42 = vld [vmem:[#allocation73_spill] sm:$0xff] }
 0x4e4   : > { %v5815_v4 = vpack.c.bf16 %v11266_v1, %v11263_v17  ;;  %v5139_v2 = vadd.f32 %v5138_v30, %v11847_v19  ;;  %v5683_v45 = vpop.f32.mrf.mxu1  ;;  %6739 = vmatmul.mubr.bf16.gmra.mxu0 %v8034_v48 }
 0x4e5   : > { %v5140_v62 = vpop.f32.mrf.mxu0  ;;  %6900 = vmatmul.mubr.bf16.gmra.mxu1 %v8036_v58  ;;  %6746 = vmatprep.mubr.bf16.mxu0 %v8043_v20 }
 0x4e6   : > { %v11271_v0 = vadd.f32 %v5683_v45, %v5139_v2  ;;  %v5685_v11 = vpop.f32.mrf.mxu1  ;;  %6907 = vmatprep.mubr.bf16.mxu1 %v8045_v31  ;;  %v5844_v62 = vld [vmem:[#allocation4 + $0x90] sm:$0xff] }
 0x4e7   : > { %v5141_v7 = vpop.f32.mrf.mxu0  ;;  %v5848_v11 = vld [vmem:[#allocation4 + $0xb0] sm:$0xff] }
 0x4e8   : > { %v5142_v39 = vadd.f32 %v5141_v7, %v11848_v28  ;;  %v5686_v16 = vpop.f32.mrf.mxu1 }
 0x4e9   : > { %v5143_v63 = vpop.f32.mrf.mxu0 }
 0x4ea   : > { %v11274_v59 = vadd.f32 %v5686_v16, %v5142_v39  ;;  %v5688_v15 = vpop.f32.mrf.mxu1  ;;  %v7934_v39 = vcombine.low %v5836_v9, %v5840_v34  ;;  %v5856_v9 = vld [vmem:[#allocation4 + $0xf0] sm:$0xff] }
 0x4eb   : > { %v5146_v35 = vpop.f32.mrf.mxu0 }
 0x4ec   : > { %v5816_v33 = vpack.c.bf16 %v11274_v59, %v11271_v0  ;;  %v5147_v23 = vadd.f32 %v5146_v35, %v11849_v50  ;;  %v5691_v21 = vpop.f32.mrf.mxu1  ;;  %6747 = vmatmul.mubr.bf16.gmra.mxu0 %v8042_v60  ;;  %v7943_v60 = vcombine.high %v5844_v62, %v5848_v11 }
 0x4ed   : > { %v5148_v46 = vpop.f32.mrf.mxu0  ;;  %6908 = vmatmul.mubr.bf16.gmra.mxu1 %v8044_v49  ;;  %6948 = vmatprep.mubr.bf16.mxu0 %v7927_v24 }
 0x4ee   : > { %v11281_v3 = vadd.f32 %v5691_v21, %v5147_v23  ;;  %v5693_v54 = vpop.f32.mrf.mxu1  ;;  %7109 = vmatprep.mubr.bf16.mxu1 %v7929_v40  ;;  %v11853_v40 = vld [vmem:[#allocation75_spill] sm:$0xff] }
 0x4ef   : > { %v5149_v57 = vpop.f32.mrf.mxu0  ;;  %v5852_v54 = vld [vmem:[#allocation4 + $0xd0] sm:$0xff] }
 0x4f0   : > { %v5150_v36 = vadd.f32 %v5149_v57, %v11850_v18  ;;  %v5694_v43 = vpop.f32.mrf.mxu1  ;;  %v11854_v57 = vld [vmem:[#allocation76_spill] sm:$0xff] }
 0x4f1   : > { %v5151_v26 = vpop.f32.mrf.mxu0 }
 0x4f2   : > { %v11284_v48 = vadd.f32 %v5694_v43, %v5150_v36  ;;  %v5696_v6 = vpop.f32.mrf.mxu1  ;;  %v7942_v43 = vcombine.low %v5844_v62, %v5848_v11  ;;  %v7951_v26 = vcombine.high %v5852_v54, %v5856_v9  ;;  %v11856_v62 = vld [vmem:[#allocation78_spill] sm:$0xff] }
 0x4f3   : > { %v5154_v58 = vpop.f32.mrf.mxu0 }
 0x4f4   : > { %v5817_v20 = vpack.c.bf16 %v11284_v48, %v11281_v3  ;;  %v5155_v31 = vadd.f32 %v5154_v58, %v11851_v42  ;;  %v5699_v30 = vpop.f32.mrf.mxu1  ;;  %6949 = vmatmul.mubr.bf16.vlgmr.msra.gmra.mxu0 %v7926_v22 }
 0x4f5   : > { %v5156_v19 = vpop.f32.mrf.mxu0  ;;  %6956 = vmatprep.mubr.bf16.mxu0 %v7935_v8 }
 0x4f6   : > { %v11289_v2 = vadd.f32 %v5699_v30, %v5155_v31  ;;  %v5701_v45 = vpop.f32.mrf.mxu1  ;;  %v11855_v19 = vld [vmem:[#allocation77_spill] sm:$0xff] }
 0x4f7   : > { %v5157_v29 = vpop.f32.mrf.mxu0 }
 0x4f8   : > { %v5158_v7 = vadd.f32 %v5157_v29, %v11852_v55  ;;  %v5702_v28 = vpop.f32.mrf.mxu1  ;;  %v5860_v55 = vld [vmem:[#allocation4 + $0x110] sm:$0xff] }
 0x4f9   : > { %v5159_v16 = vpop.f32.mrf.mxu0 }
 0x4fa   : > { %v11292_v63 = vadd.f32 %v5702_v28, %v5158_v7  ;;  %v5704_v49 = vpop.f32.mrf.mxu1  ;;  %v5864_v7 = vld [vmem:[#allocation4 + $0x130] sm:$0xff]  ;;  %v7950_v16 = vcombine.low %v5852_v54, %v5856_v9 }
 0x4fb   : > { %v5162_v24 = vpop.f32.mrf.mxu0  ;;  %v7959_v49 = vcombine.high %v5860_v55, %v5864_v7  ;;  %v5872_v54 = vld [vmem:[#allocation4 + $0x170] sm:$0xff] }
 0x4fc   : > { %v5163_v35 = vadd.f32 %v5162_v24, %v11853_v40  ;;  %v5707_v50 = vpop.f32.mrf.mxu1  ;;  %6957 = vmatmul.mubr.bf16.gmra.mxu0 %v7934_v39 }
 0x4fd   : > { %v5164_v23 = vpop.f32.mrf.mxu0  ;;  %6964 = vmatprep.mubr.bf16.mxu0 %v7943_v60 }
 0x4fe   : > { %v11297_v21 = vadd.f32 %v5707_v50, %v5163_v35  ;;  %v5709_v46 = vpop.f32.mrf.mxu1 }
 0x4ff   : > { %v5165_v34 = vpop.f32.mrf.mxu0 }
 0x500   : > { %v5166_v18 = vadd.f32 %v5165_v34, %v11854_v57  ;;  %v5710_v36 = vpop.f32.mrf.mxu1  ;;  %v11857_v57 = vld [vmem:[#allocation79_spill] sm:$0xff] }
 0x501   : > { %v5167_v22 = vpop.f32.mrf.mxu0 }
 0x502   : > { %v11300_v8 = vadd.f32 %v5710_v36, %v5166_v18  ;;  %v5712_v6 = vpop.f32.mrf.mxu1  ;;  %v11858_v22 = vld [vmem:[#allocation80_spill] sm:$0xff] }
 0x503   : > { %v5170_v58 = vpop.f32.mrf.mxu0 }
 0x504   : > { %v5715_v31 = vpop.f32.mrf.mxu1  ;;  %6965 = vmatmul.mubr.bf16.gmra.mxu0 %v7942_v43  ;;  %v5171_v45 = vadd.f32 %v5170_v58, %v11855_v19  ;;  %v5868_v43 = vld [vmem:[#allocation4 + $0x150] sm:$0xff]  ;;  %v7958_v58 = vcombine.low %v5860_v55, %v5864_v7 }
 0x505   : > { %v5172_v30 = vpop.f32.mrf.mxu0  ;;  %6972 = vmatprep.mubr.bf16.mxu0 %v7951_v26  ;;  %v5880_v55 = vld [vmem:[#allocation4 + $0x1b0] sm:$0xff] }
 0x506   : > { %v5717_v29 = vpop.f32.mrf.mxu1  ;;  %v11306_v24 = vadd.f32 %v5715_v31, %v5171_v45  ;;  %v7967_v30 = vcombine.high %v5868_v43, %v5872_v54 }
 0x507   : > { %v5173_v28 = vpop.f32.mrf.mxu0 }
 0x508   : > { %v5174_v11 = vadd.f32 %v5173_v28, %v11856_v62  ;;  %v5718_v39 = vpop.f32.mrf.mxu1 }
 0x509   : > { %v5175_v60 = vpop.f32.mrf.mxu0 }
 0x50a   : > { %v11308_v40 = vadd.f32 %v5718_v39, %v5174_v11  ;;  %v5720_v35 = vpop.f32.mrf.mxu1 }
 0x50b   : > { %v5178_v50 = vpop.f32.mrf.mxu0  ;;  %v5876_v35 = vld [vmem:[#allocation4 + $0x190] sm:$0xff] }
 0x50c   : > { %v5820_v23 = vpack.c.bf16 %v11308_v40, %v11306_v24  ;;  %v5723_v46 = vpop.f32.mrf.mxu1  ;;  %6973 = vmatmul.mubr.bf16.gmra.mxu0 %v7950_v16  ;;  %v5179_v18 = vadd.f32 %v5178_v50, %v11857_v57  ;;  %v11859_v16 = vld [vmem:[#allocation81_spill] sm:$0xff]  ;;  %v11860_v50 = vld [vmem:[#allocation82_spill] sm:$0xff]  ;;  %v7966_v57 = vcombine.low %v5868_v43, %v5872_v54 }
 0x50d   : > { %v5180_v34 = vpop.f32.mrf.mxu0  ;;  %6980 = vmatprep.mubr.bf16.mxu0 %v7959_v49  ;;  %v5888_v43 = vld [vmem:[#allocation4 + $0x1f0] sm:$0xff] }
 0x50e   : > { %v5725_v36 = vpop.f32.mrf.mxu1  ;;  %v11314_v19 = vadd.f32 %v5723_v46, %v5179_v18 }
 0x50f   : > { %v5181_v9 = vpop.f32.mrf.mxu0  ;;  %v7975_v36 = vcombine.high %v5876_v35, %v5880_v55 }
 0x510   : > { %v5182_v26 = vadd.f32 %v5181_v9, %v11858_v22  ;;  %v5726_v6 = vpop.f32.mrf.mxu1 }
 0x511   : > { %v5183_v31 = vpop.f32.mrf.mxu0 }
 0x512   : > { %v11316_v45 = vadd.f32 %v5726_v6, %v5182_v26  ;;  %v5728_v29 = vpop.f32.mrf.mxu1 }
 0x513   : > { %v5186_v28 = vpop.f32.mrf.mxu0  ;;  %v11861_v29 = vld [vmem:[#allocation83_spill] sm:$0xff] }
 0x514   : > { %v5821_v62 = vpack.c.bf16 %v11316_v45, %v11314_v19  ;;  %v5731_v11 = vpop.f32.mrf.mxu1  ;;  %6981 = vmatmul.mubr.bf16.gmra.mxu0 %v7958_v58  ;;  %v5187_v60 = vadd.f32 %v5186_v28, %v11859_v16  ;;  %v5884_v16 = vld [vmem:[#allocation4 + $0x1d0] sm:$0xff] }
 0x515   : > { %v5188_v39 = vpop.f32.mrf.mxu0  ;;  %6988 = vmatprep.mubr.bf16.mxu0 %v7967_v30 }
 0x516   : > { %v5733_v49 = vpop.f32.mrf.mxu1  ;;  %v11322_v9 = vadd.f32 %v5731_v11, %v5187_v60 }
 0x517   : > { %v5189_v7 = vpop.f32.mrf.mxu0  ;;  %v11862_v49 = vld [vmem:[#allocation84_spill] sm:$0xff] }
 0x518   : > { %v5190_v46 = vadd.f32 %v5189_v7, %v11860_v50  ;;  %v5734_v34 = vpop.f32.mrf.mxu1  ;;  %v7974_v7 = vcombine.low %v5876_v35, %v5880_v55  ;;  %v5896_v35 = vld [vmem:[#allocation4 + $0x230] sm:$0xff] }
 0x519   : > { %v5191_v18 = vpop.f32.mrf.mxu0 }
 0x51a   : > { %v11324_v22 = vadd.f32 %v5734_v34, %v5190_v46  ;;  %v5736_v26 = vpop.f32.mrf.mxu1  ;;  %v7983_v46 = vcombine.high %v5884_v16, %v5888_v43 }
 0x51b   : > { %v5194_v6 = vpop.f32.mrf.mxu0 }
 0x51c   : > { %v5822_v58 = vpack.c.bf16 %v11324_v22, %v11322_v9  ;;  %v5739_v31 = vpop.f32.mrf.mxu1  ;;  %6989 = vmatmul.mubr.bf16.gmra.mxu0 %v7966_v57  ;;  %v5195_v28 = vadd.f32 %v5194_v6, %v11861_v29  ;;  %v11863_v29 = vld [vmem:[#allocation85_spill] sm:$0xff] }
 0x51d   : > { %v5196_v30 = vpop.f32.mrf.mxu0  ;;  %6996 = vmatprep.mubr.bf16.mxu0 %v7975_v36 }
 0x51e   : > { %v5741_v39 = vpop.f32.mrf.mxu1  ;;  %v11330_v34 = vadd.f32 %v5739_v31, %v5195_v28 }
 0x51f   : > { %v5197_v54 = vpop.f32.mrf.mxu0 }
 0x520   : > { %v5198_v11 = vadd.f32 %v5197_v54, %v11862_v49  ;;  %v5742_v60 = vpop.f32.mrf.mxu1  ;;  %v5892_v49 = vld [vmem:[#allocation4 + $0x210] sm:$0xff] }
 0x521   : > { %v5199_v50 = vpop.f32.mrf.mxu0 }
 0x522   : > { %v11332_v18 = vadd.f32 %v5742_v60, %v5198_v11  ;;  %v5744_v26 = vpop.f32.mrf.mxu1  ;;  %v11864_v50 = vld [vmem:[#allocation86_spill] sm:$0xff]  ;;  %v7982_v11 = vcombine.low %v5884_v16, %v5888_v43  ;;  %v7990_v43 = vcombine.low %v5892_v49, %v5896_v35 }
 0x523   : > { %v5202_v57 = vpop.f32.mrf.mxu0  ;;  %v7991_v26 = vcombine.high %v5892_v49, %v5896_v35 }
 0x524   : > { %v5823_v36 = vpack.c.bf16 %v11332_v18, %v11330_v34  ;;  %v5747_v6 = vpop.f32.mrf.mxu1  ;;  %6997 = vmatmul.mubr.bf16.gmra.mxu0 %v7974_v7  ;;  %v5203_v39 = vadd.f32 %v5202_v57, %v11863_v29  ;;  %v11865_v57 = vld [vmem:[#allocation87_spill] sm:$0xff] }
 0x525   : > { %v5204_v30 = vpop.f32.mrf.mxu0  ;;  %7004 = vmatprep.mubr.bf16.mxu0 %v7983_v46 }
 0x526   : > { %v5749_v54 = vpop.f32.mrf.mxu1  ;;  %v5748_v12 = vadd.f32 %v5747_v6, %v5203_v39 }
 0x527   : > { %v5205_v55 = vpop.f32.mrf.mxu0  ;;  %v5900_v54 = vld [vmem:[#allocation4 + $0x250] sm:$0xff] }
 0x528   : > { %v5206_v31 = vadd.f32 %v5205_v55, %v11864_v50  ;;  %v5750_v28 = vpop.f32.mrf.mxu1  ;;  %v11866_v55 = vld [vmem:[#allocation88_spill] sm:$0xff]  ;;  %v7999_v6 = vcombine.high %v5900_v54, %v5904_v61 }
 0x529   : > { %v5207_v60 = vpop.f32.mrf.mxu0 }
 0x52a   : > { %v5751_v37 = vadd.f32 %v5750_v28, %v5206_v31  ;;  %v5752_v15 = vpop.f32.mrf.mxu1 }
 0x52b   : > { %v5210_v34 = vpop.f32.mrf.mxu0 }
 0x52c   : > { %v5824_v18 = vpack.c.bf16 %v5751_v37, %v5748_v12  ;;  %v5755_v7 = vpop.f32.mrf.mxu1  ;;  %7005 = vmatmul.mubr.bf16.gmra.mxu0 %v7982_v11  ;;  %v5211_v30 = vadd.f32 %v5210_v34, %v11865_v57  ;;  %v5912_v57 = vld [vmem:[#allocation4 + $0x2b0] sm:$0xff] }
 0x52d   : > { %v5212_v46 = vpop.f32.mrf.mxu0  ;;  %7012 = vmatprep.mubr.bf16.mxu0 %v7991_v26 }
 0x52e   : > { %v5757_v29 = vpop.f32.mrf.mxu1  ;;  %v5756_v39 = vadd.f32 %v5755_v7, %v5211_v30  ;;  %v5908_v46 = vld [vmem:[#allocation4 + $0x290] sm:$0xff]  ;;  %v7998_v7 = vcombine.low %v5900_v54, %v5904_v61 }
 0x52f   : > { %v5213_v42 = vpop.f32.mrf.mxu0  ;;  %v5916_v54 = vld [vmem:[#allocation4 + $0x2d0] sm:$0xff] }
 0x530   : > { %v5214_v50 = vadd.f32 %v5213_v42, %v11866_v55  ;;  %v5758_v16 = vpop.f32.mrf.mxu1  ;;  %v8007_v55 = vcombine.high %v5908_v46, %v5912_v57 }
 0x531   : > { %v5215_v60 = vpop.f32.mrf.mxu0 }
 0x532   : > { %v5759_v15 = vadd.f32 %v5758_v16, %v5214_v50  ;;  %v5760_v31 = vpop.f32.mrf.mxu1 }
 0x533   : > { %v8071_v37 = vpop.f32.mrf.mxu0 }
 0x534   : > { %v5825_v12 = vpack.c.bf16 %v5759_v15, %v5756_v39  ;;  %7013 = vmatmul.mubr.bf16.gmra.mxu0 %v7990_v43  ;;  %v8183_v28 = vpop.f32.mrf.mxu1 }
 0x535   : > { %v8072_v11 = vpop.f32.mrf.mxu0  ;;  %7020 = vmatprep.mubr.bf16.mxu0 %v7999_v6  ;;  %v5920_v6 = vld [vmem:[#allocation4 + $0x2f0] sm:$0xff] }
 0x536   : > { %8391 = vmatprep.subr.bf16.mxu1 %v5825_v12  ;;  %v8073_v26 = vadd.f32 %v8072_v11, %v8071_v37  ;;  %v8184_v34 = vpop.f32.mrf.mxu1  ;;  %v8015_v31 = vcombine.high %v5916_v54, %v5920_v6  ;;  %v5924_v11 = vld [vmem:[#allocation4 + $0x310] sm:$0xff]  ;;  %v8014_v19 = vcombine.low %v5916_v54, %v5920_v6  ;;  %v11871_v6 = vcombine.low %v11246_v25, %v11248_v32 }
 0x537   : > { %8392 = vmatpush3.bf16.msra.mxu1 %v5817_v20  ;;  %v8074_v42 = vpop.f32.mrf.mxu0  ;;  %v8185_v49 = vadd.f32 %v8184_v34, %v8183_v28 }
 0x538   : > { %8393 = vmatprep.subr.bf16.mxu1 %v5824_v18  ;;  %v8186_v35 = vpop.f32.mrf.mxu1 }
 0x539   : > { %v11343_v30 = vadd.f32 %v8185_v49, %v8073_v26  ;;  %v8075_v29 = vpop.f32.mrf.mxu0  ;;  %v5928_v26 = vld [vmem:[#allocation4 + $0x330] sm:$0xff] }
 0x53a   : > { %v8076_v50 = vadd.f32 %v8075_v29, %v8074_v42  ;;  %v8187_v16 = vpop.f32.mrf.mxu1  ;;  %v8023_v34 = vcombine.high %v5924_v11, %v5928_v26  ;;  %v5841_v29 = vld [vmem:[#allocation4 + $0x78] sm:$0xff] }
 0x53b   : > { %8394 = vmatpush3.bf16.msra.mxu1 %v5816_v33  ;;  %v8077_v43 = vpop.f32.mrf.mxu0  ;;  %v8188_v60 = vadd.f32 %v8187_v16, %v8186_v35  ;;  %v8006_v33 = vcombine.low %v5908_v46, %v5912_v57  ;;  %v5932_v35 = vld [vmem:[#allocation4 + $0x350] sm:$0xff] }
 0x53c   : > { %8395 = vmatprep.subr.bf16.mxu1 %v5823_v36  ;;  %7021 = vmatmul.mubr.bf16.gmra.mxu0 %v7998_v7  ;;  %v8189_v3 = vpop.f32.mrf.mxu1  ;;  %v5936_v7 = vld [vmem:[#allocation4 + $0x370] sm:$0xff] }
 0x53d   : > { %v11348_v48 = vadd.f32 %v8188_v60, %v8076_v50  ;;  %v8078_v20 = vpop.f32.mrf.mxu0  ;;  %7028 = vmatprep.mubr.bf16.mxu0 %v8007_v55  ;;  %v8022_v50 = vcombine.low %v5924_v11, %v5928_v26  ;;  %v8031_v60 = vcombine.high %v5932_v35, %v5936_v7 }
 0x53e   : > { %v8079_v61 = vadd.f32 %v8078_v20, %v8077_v43  ;;  %v8190_v18 = vpop.f32.mrf.mxu1 }
 0x53f   : > { %8396 = vmatpush3.bf16.msra.mxu1 %v5815_v4  ;;  %v8080_v39 = vpop.f32.mrf.mxu0  ;;  %v8191_v0 = vadd.f32 %v8190_v18, %v8189_v3 }
 0x540   : > { %8397 = vmatprep.subr.bf16.mxu1 %v5822_v58  ;;  %v8192_v59 = vpop.f32.mrf.mxu1 }
 0x541   : > { %v11356_v36 = vadd.f32 %v8191_v0, %v8079_v61  ;;  %v8081_v15 = vpop.f32.mrf.mxu0 }
 0x542   : > { %v8082_v37 = vadd.f32 %v8081_v15, %v8080_v39  ;;  %v8193_v12 = vpop.f32.mrf.mxu1  ;;  %v5845_v15 = vld [vmem:[#allocation4 + $0x98] sm:$0xff] }
 0x543   : > { %8398 = vmatpush3.bf16.msra.mxu1 %v5814_v56  ;;  %v8083_v17 = vpop.f32.mrf.mxu0  ;;  %v8194_v1 = vadd.f32 %v8193_v12, %v8192_v59  ;;  %v5940_v59 = vld [vmem:[#allocation4 + $0x390] sm:$0xff]  ;;  %v8030_v12 = vcombine.low %v5932_v35, %v5936_v7 }
 0x544   : > { %8399 = vmatprep.subr.bf16.mxu1 %v5821_v62  ;;  %7029 = vmatmul.mubr.bf16.gmra.mxu0 %v8006_v33  ;;  %v8195_v4 = vpop.f32.mrf.mxu1  ;;  %v5944_v33 = vld [vmem:[#allocation4 + $0x3b0] sm:$0xff] }
 0x545   : > { %v11364_v9 = vadd.f32 %v8194_v1, %v8082_v37  ;;  %v8084_v22 = vpop.f32.mrf.mxu0  ;;  %7036 = vmatprep.mubr.bf16.mxu0 %v8015_v31  ;;  %v5849_v31 = vld [vmem:[#allocation4 + $0xb8] sm:$0xff] }
 0x546   : > { %v8085_v58 = vadd.f32 %v8084_v22, %v8083_v17  ;;  %v8196_v28 = vpop.f32.mrf.mxu1  ;;  %v7945_v25 = vcombine.high %v5845_v15, %v5849_v31  ;;  %v7944_v35 = vcombine.low %v5845_v15, %v5849_v31 }
 0x547   : > { %8400 = vmatpush3.bf16.msra.mxu1 %v5813_v52  ;;  %v8086_v38 = vpop.f32.mrf.mxu0  ;;  %v8197_v47 = vadd.f32 %v8196_v28, %v8195_v4  ;;  %v11867_v52 = vpack.c.bf16 %v11300_v8, %v11297_v21  ;;  %v11869_v21 = vpack.c.bf16 %v11292_v63, %v11289_v2  ;;  %v5837_v8 = vld [vmem:[#allocation4 + $0x58] sm:$0xff]  ;;  %v8039_v4 = vcombine.high %v5940_v59, %v5944_v33 }
 0x548   : > { %8401 = vmatprep.subr.bf16.mxu1 %v5820_v23  ;;  %v8198_v56 = vpop.f32.mrf.mxu1  ;;  %v7937_v51 = vcombine.high %v5837_v8, %v5841_v29  ;;  %v7936_v22 = vcombine.low %v5837_v8, %v5841_v29 }
 0x549   : > { %v11372_v45 = vadd.f32 %v8197_v47, %v8085_v58  ;;  %v8087_v62 = vpop.f32.mrf.mxu0 }
 0x54a   : > { %v8088_v46 = vadd.f32 %v8087_v62, %v8086_v38  ;;  %v8199_v57 = vpop.f32.mrf.mxu1  ;;  %v5948_v62 = vld [vmem:[#allocation4 + $0x3d0] sm:$0xff] }
 0x54b   : > { %8402 = vmatpush3.bf16.msra.mxu1 %v5812_v41  ;;  %v8089_v14 = vpop.f32.mrf.mxu0  ;;  %v8200_v5 = vadd.f32 %v8199_v57, %v8198_v56 }
 0x54c   : > { %8403 = vmatprep.subr.bf16.mxu1 %v11867_v52  ;;  %7037 = vmatmul.mubr.bf16.gmra.mxu0 %v8014_v19  ;;  %v8201_v24 = vpop.f32.mrf.mxu1 }
 0x54d   : > { %v11380_v40 = vadd.f32 %v8200_v5, %v8088_v46  ;;  %v8090_v23 = vpop.f32.mrf.mxu0  ;;  %7044 = vmatprep.mubr.bf16.mxu0 %v8023_v34  ;;  %v5952_v34 = vld [vmem:[#allocation4 + $0x3f0] sm:$0xff]  ;;  %v5857_v5 = vld [vmem:[#allocation4 + $0xf8] sm:$0xff] }
 0x54e   : > { %v8091_v42 = vadd.f32 %v8090_v23, %v8089_v14  ;;  %v8202_v49 = vpop.f32.mrf.mxu1  ;;  %v5853_v14 = vld [vmem:[#allocation4 + $0xd8] sm:$0xff] }
 0x54f   : > { %8404 = vmatpush3.bf16.msra.mxu1 %v11868_v27  ;;  %v8092_v53 = vpop.f32.mrf.mxu0  ;;  %v8203_v41 = vadd.f32 %v8202_v49, %v8201_v24  ;;  %v8038_v24 = vcombine.low %v5940_v59, %v5944_v33  ;;  %v8047_v49 = vcombine.high %v5948_v62, %v5952_v34 }
 0x550   : > { %8405 = vmatprep.subr.bf16.mxu1 %v11869_v21  ;;  %v8204_v55 = vpop.f32.mrf.mxu1 }
 0x551   : > { %v11388_v16 = vadd.f32 %v8203_v41, %v8091_v42  ;;  %v8093_v43 = vpop.f32.mrf.mxu0 }
 0x552   : > { %v8094_v3 = vadd.f32 %v8093_v43, %v8092_v53  ;;  %v8205_v20 = vpop.f32.mrf.mxu1  ;;  %v7953_v53 = vcombine.high %v5853_v14, %v5857_v5 }
 0x553   : > { %8406 = vmatpush3.bf16.msra.mxu1 %v11870_v10  ;;  %v8095_v61 = vpop.f32.mrf.mxu0  ;;  %v8206_v18 = vadd.f32 %v8205_v20, %v8204_v55  ;;  %v5861_v20 = vld [vmem:[#allocation4 + $0x118] sm:$0xff] }
 0x554   : > { %7045 = vmatmul.mubr.bf16.gmra.mxu0 %v8022_v50  ;;  %v8207_v2 = vpop.f32.mrf.mxu1  ;;  %v5865_v10 = vld [vmem:[#allocation4 + $0x138] sm:$0xff] }
 0x555   : > { %v11393_v63 = vadd.f32 %v8206_v18, %v8094_v3  ;;  %v8096_v54 = vpop.f32.mrf.mxu0  ;;  %7052 = vmatprep.mubr.bf16.mxu0 %v8031_v60 }
 0x556   : > { %7110 = vmatmul.mubr.bf16.vlgmr.msra.gmra.mxu1 %v11871_v6  ;;  %v8097_v39 = vadd.f32 %v8096_v54, %v8095_v61  ;;  %v8208_v0 = vpop.f32.mrf.mxu1  ;;  %v8046_v61 = vcombine.low %v5948_v62, %v5952_v34  ;;  %v7952_v54 = vcombine.low %v5853_v14, %v5857_v5 }
 0x557   : > { %7117 = vmatprep.mubr.bf16.mxu1 %v7937_v51  ;;  %v8098_v44 = vpop.f32.mrf.mxu0  ;;  %v8209_v13 = vadd.f32 %v8208_v0, %v8207_v2  ;;  %v7961_v0 = vcombine.high %v5861_v20, %v5865_v10 }
 0x558   : > { %v8210_v37 = vpop.f32.mrf.mxu1 }
 0x559   : > { %v11398_v17 = vadd.f32 %v8209_v13, %v8097_v39  ;;  %v8099_v1 = vpop.f32.mrf.mxu0 }
 0x55a   : > { %v8100_v58 = vadd.f32 %v8099_v1, %v8098_v44  ;;  %v8211_v28 = vpop.f32.mrf.mxu1 }
 0x55b   : > { %v8101_v32 = vpop.f32.mrf.mxu0  ;;  %v8212_v11 = vadd.f32 %v8211_v28, %v8210_v37 }
 0x55c   : > { %7053 = vmatmul.mubr.bf16.gmra.mxu0 %v8030_v12  ;;  %v8213_v26 = vpop.f32.mrf.mxu1 }
 0x55d   : > { %v11400_v38 = vadd.f32 %v8212_v11, %v8100_v58  ;;  %v8102_v47 = vpop.f32.mrf.mxu0  ;;  %7060 = vmatprep.mubr.bf16.mxu0 %v8039_v4  ;;  %v5869_v4 = vld [vmem:[#allocation4 + $0x158] sm:$0xff] }
 0x55e   : > { %7118 = vmatmul.mubr.bf16.gmra.mxu1 %v7936_v22  ;;  %v8103_v56 = vadd.f32 %v8102_v47, %v8101_v32  ;;  %v8214_v19 = vpop.f32.mrf.mxu1  ;;  %v5873_v22 = vld [vmem:[#allocation4 + $0x178] sm:$0xff]  ;;  %v7960_v32 = vcombine.low %v5861_v20, %v5865_v10 }
 0x55f   : > { %7125 = vmatprep.mubr.bf16.mxu1 %v7945_v25  ;;  %v8104_v46 = vpop.f32.mrf.mxu0  ;;  %v8215_v57 = vadd.f32 %v8214_v19, %v8213_v26  ;;  %v7969_v47 = vcombine.high %v5869_v4, %v5873_v22  ;;  %v5885_v10 = vld [vmem:[#allocation4 + $0x1d8] sm:$0xff] }
 0x560   : > { %v8216_v52 = vpop.f32.mrf.mxu1 }
 0x561   : > { %v11402_v23 = vadd.f32 %v8215_v57, %v8103_v56  ;;  %v8105_v42 = vpop.f32.mrf.mxu0 }
 0x562   : > { %v8106_v7 = vadd.f32 %v8105_v42, %v8104_v46  ;;  %v8217_v27 = vpop.f32.mrf.mxu1  ;;  %v5881_v42 = vld [vmem:[#allocation4 + $0x1b8] sm:$0xff] }
 0x563   : > { %v8107_v41 = vpop.f32.mrf.mxu0  ;;  %v8218_v21 = vadd.f32 %v8217_v27, %v8216_v52  ;;  %v7968_v27 = vcombine.low %v5869_v4, %v5873_v22 }
 0x564   : > { %7061 = vmatmul.mubr.bf16.gmra.mxu0 %v8038_v24  ;;  %v8219_v8 = vpop.f32.mrf.mxu1  ;;  %v5877_v24 = vld [vmem:[#allocation4 + $0x198] sm:$0xff] }
 0x565   : > { %v11404_v29 = vadd.f32 %v8218_v21, %v8106_v7  ;;  %v8108_v55 = vpop.f32.mrf.mxu0  ;;  %7068 = vmatprep.mubr.bf16.mxu0 %v8047_v49  ;;  %v7977_v21 = vcombine.high %v5877_v24, %v5881_v42 }
 0x566   : > { %7126 = vmatmul.mubr.bf16.gmra.mxu1 %v7944_v35  ;;  %v8109_v50 = vadd.f32 %v8108_v55, %v8107_v41  ;;  %v8220_v43 = vpop.f32.mrf.mxu1 }
 0x567   : > { %7133 = vmatprep.mubr.bf16.mxu1 %v7953_v53  ;;  %v8110_v60 = vpop.f32.mrf.mxu0  ;;  %v8221_v3 = vadd.f32 %v8220_v43, %v8219_v8 }
 0x568   : > { %v8222_v51 = vpop.f32.mrf.mxu1 }
 0x569   : > { %v11406_v18 = vadd.f32 %v8221_v3, %v8109_v50  ;;  %v8111_v2 = vpop.f32.mrf.mxu0 }
 0x56a   : > { %v8112_v6 = vadd.f32 %v8111_v2, %v8110_v60  ;;  %v8223_v39 = vpop.f32.mrf.mxu1 }
 0x56b   : > { %v8113_v59 = vpop.f32.mrf.mxu0  ;;  %v8224_v33 = vadd.f32 %v8223_v39, %v8222_v51  ;;  %v5889_v51 = vld [vmem:[#allocation4 + $0x1f8] sm:$0xff] }
 0x56c   : > { %7069 = vmatmul.mubr.bf16.gmra.mxu0 %v8046_v61  ;;  %v8225_v44 = vpop.f32.mrf.mxu1 }
 0x56d   : > { %v11408_v13 = vadd.f32 %v8224_v33, %v8112_v6  ;;  %v8114_v15 = vpop.f32.mrf.mxu0  ;;  %v7976_v6 = vcombine.low %v5877_v24, %v5881_v42 }
 0x56e   : > { %7134 = vmatmul.mubr.bf16.gmra.mxu1 %v7952_v54  ;;  %v8115_v31 = vadd.f32 %v8114_v15, %v8113_v59  ;;  %v8226_v37 = vpop.f32.mrf.mxu1  ;;  %v7985_v59 = vcombine.high %v5885_v10, %v5889_v51 }
 0x56f   : > { %7141 = vmatprep.mubr.bf16.mxu1 %v7961_v0  ;;  %v8116_v12 = vpop.f32.mrf.mxu0  ;;  %v8227_v1 = vadd.f32 %v8226_v37, %v8225_v44 }
 0x570   : > { %v8228_v58 = vpop.f32.mrf.mxu1 }
 0x571   : > { %v11410_v28 = vadd.f32 %v8227_v1, %v8115_v31  ;;  %v8117_v25 = vpop.f32.mrf.mxu0 }
 0x572   : > { %v8118_v11 = vadd.f32 %v8117_v25, %v8116_v12  ;;  %v8229_v26 = vpop.f32.mrf.mxu1  ;;  %v5897_v25 = vld [vmem:[#allocation4 + $0x238] sm:$0xff] }
 0x573   : > { %v8119_v56 = vpop.f32.mrf.mxu0  ;;  %v8230_v19 = vadd.f32 %v8229_v26, %v8228_v58  ;;  %v5893_v58 = vld [vmem:[#allocation4 + $0x218] sm:$0xff] }
 0x574   : > { %v8231_v62 = vpop.f32.mrf.mxu1 }
 0x575   : > { %v11412_v34 = vadd.f32 %v8230_v19, %v8118_v11  ;;  %v8120_v46 = vpop.f32.mrf.mxu0 }
 0x576   : > { %7142 = vmatmul.mubr.bf16.gmra.mxu1 %v7960_v32  ;;  %v8121_v57 = vadd.f32 %v8120_v46, %v8119_v56  ;;  %v8232_v14 = vpop.f32.mrf.mxu1 }
 0x577   : > { %7149 = vmatprep.mubr.bf16.mxu1 %v7969_v47  ;;  %v8122_v5 = vpop.f32.mrf.mxu0  ;;  %v8233_v52 = vadd.f32 %v8232_v14, %v8231_v62  ;;  %v7984_v47 = vcombine.low %v5885_v10, %v5889_v51  ;;  %v7993_v62 = vcombine.high %v5893_v58, %v5897_v25 }
 0x578   : > { %v8234_v49 = vpop.f32.mrf.mxu1 }
 0x579   : > { %v11414_v35 = vadd.f32 %v8233_v52, %v8121_v57  ;;  %v8123_v7 = vpop.f32.mrf.mxu0 }
 0x57a   : > { %v8124_v53 = vadd.f32 %v8123_v7, %v8122_v5  ;;  %v8235_v41 = vpop.f32.mrf.mxu1 }
 0x57b   : > { %v8236_v8 = vadd.f32 %v8235_v41, %v8234_v49 }
 0x57c   : > { %v8125_v55 = vpop.f32.mrf.mxu0 }
 0x57d   : > { %v11416_v50 = vadd.f32 %v8236_v8, %v8124_v53  ;;  %v8237_v43 = vpop.f32.mrf.mxu1  ;;  %v5905_v53 = vld [vmem:[#allocation4 + $0x278] sm:$0xff] }
 0x57e   : > { %7150 = vmatmul.mubr.bf16.gmra.mxu1 %v7968_v27  ;;  %v8126_v60 = vpop.f32.mrf.mxu0  ;;  %v5901_v27 = vld [vmem:[#allocation4 + $0x258] sm:$0xff] }
 0x57f   : > { %11872 = vst [vmem:[#allocation8_spill] sm:$0xff] %v11416_v50  ;;  %7157 = vmatprep.mubr.bf16.mxu1 %v7977_v21  ;;  %v8127_v3 = vadd.f32 %v8126_v60, %v8125_v55  ;;  %v8238_v20 = vpop.f32.mrf.mxu1  ;;  %v7992_v55 = vcombine.low %v5893_v58, %v5897_v25 }
 0x580   : > { %v8128_v61 = vpop.f32.mrf.mxu0  ;;  %v8239_v2 = vadd.f32 %v8238_v20, %v8237_v43 }
 0x581   : > { %v8240_v54 = vpop.f32.mrf.mxu1 }
 0x582   : > { %v11418_v39 = vadd.f32 %v8239_v2, %v8127_v3  ;;  %v8129_v0 = vpop.f32.mrf.mxu0  ;;  %v8001_v3 = vcombine.high %v5901_v27, %v5905_v53 }
 0x583   : > { %v8130_v33 = vadd.f32 %v8129_v0, %v8128_v61  ;;  %v8241_v44 = vpop.f32.mrf.mxu1 }
 0x584   : > { %11873 = vst [vmem:[#allocation9_spill] sm:$0xff] %v11418_v39  ;;  %v8131_v15 = vpop.f32.mrf.mxu0  ;;  %v8242_v31 = vadd.f32 %v8241_v44, %v8240_v54  ;;  %v5913_v44 = vld [vmem:[#allocation4 + $0x2b8] sm:$0xff] }
 0x585   : > { %v8243_v37 = vpop.f32.mrf.mxu1 }
 0x586   : > { %7158 = vmatmul.mubr.bf16.gmra.mxu1 %v7976_v6  ;;  %v11420_v12 = vadd.f32 %v8242_v31, %v8130_v33  ;;  %v8132_v1 = vpop.f32.mrf.mxu0  ;;  %v5909_v33 = vld [vmem:[#allocation4 + $0x298] sm:$0xff] }
 0x587   : > { %7165 = vmatprep.mubr.bf16.mxu1 %v7985_v59  ;;  %v8133_v4 = vadd.f32 %v8132_v1, %v8131_v15  ;;  %v8244_v22 = vpop.f32.mrf.mxu1  ;;  %v8000_v1 = vcombine.low %v5901_v27, %v5905_v53  ;;  %v8009_v58 = vcombine.high %v5909_v33, %v5913_v44 }
 0x588   : > { %11874 = vst [vmem:[#allocation10_spill] sm:$0xff] %v11420_v12  ;;  %v8134_v32 = vpop.f32.mrf.mxu0  ;;  %v8245_v11 = vadd.f32 %v8244_v22, %v8243_v37 }
 0x589   : > { %v8246_v26 = vpop.f32.mrf.mxu1 }
 0x58a   : > { %v11422_v56 = vadd.f32 %v8245_v11, %v8133_v4  ;;  %v8135_v19 = vpop.f32.mrf.mxu0 }
 0x58b   : > { %v8136_v46 = vadd.f32 %v8135_v19, %v8134_v32  ;;  %v8247_v57 = vpop.f32.mrf.mxu1 }
 0x58c   : > { %11875 = vst [vmem:[#allocation11_spill] sm:$0xff] %v11422_v56  ;;  %v8137_v14 = vpop.f32.mrf.mxu0  ;;  %v8248_v5 = vadd.f32 %v8247_v57, %v8246_v26 }
 0x58d   : > { %v8249_v52 = vpop.f32.mrf.mxu1 }
 0x58e   : > { %7166 = vmatmul.mubr.bf16.gmra.mxu1 %v7984_v47  ;;  %v11424_v24 = vadd.f32 %v8248_v5, %v8136_v46  ;;  %v8138_v42 = vpop.f32.mrf.mxu0  ;;  %v5921_v5 = vld [vmem:[#allocation4 + $0x2f8] sm:$0xff] }
 0x58f   : > { %7173 = vmatprep.mubr.bf16.mxu1 %v7993_v62  ;;  %v8139_v49 = vadd.f32 %v8138_v42, %v8137_v14  ;;  %v8250_v7 = vpop.f32.mrf.mxu1  ;;  %v5917_v14 = vld [vmem:[#allocation4 + $0x2d8] sm:$0xff] }
 0x590   : > { %11876 = vst [vmem:[#allocation12_spill] sm:$0xff] %v11424_v24  ;;  %v8140_v41 = vpop.f32.mrf.mxu0  ;;  %v8251_v21 = vadd.f32 %v8250_v7, %v8249_v52  ;;  %v8008_v7 = vcombine.low %v5909_v33, %v5913_v44  ;;  %v8016_v44 = vcombine.low %v5917_v14, %v5921_v5 }
 0x591   : > { %v8252_v8 = vpop.f32.mrf.mxu1 }
 0x592   : > { %v11426_v43 = vadd.f32 %v8251_v21, %v8139_v49  ;;  %v8141_v60 = vpop.f32.mrf.mxu0 }
 0x593   : > { %v8142_v20 = vadd.f32 %v8141_v60, %v8140_v41  ;;  %v8253_v10 = vpop.f32.mrf.mxu1  ;;  %v8017_v41 = vcombine.high %v5917_v14, %v5921_v5 }
 0x594   : > { %11877 = vst [vmem:[#allocation13_spill] sm:$0xff] %v11426_v43  ;;  %v8143_v51 = vpop.f32.mrf.mxu0  ;;  %v8254_v61 = vadd.f32 %v8253_v10, %v8252_v8 }
 0x595   : > { %v8255_v2 = vpop.f32.mrf.mxu1 }
 0x596   : > { %7174 = vmatmul.mubr.bf16.gmra.mxu1 %v7992_v55  ;;  %v11428_v54 = vadd.f32 %v8254_v61, %v8142_v20  ;;  %v8144_v6 = vpop.f32.mrf.mxu0 }
 0x597   : > { %7181 = vmatprep.mubr.bf16.mxu1 %v8001_v3  ;;  %v8145_v0 = vadd.f32 %v8144_v6, %v8143_v51  ;;  %v8256_v59 = vpop.f32.mrf.mxu1  ;;  %v5929_v6 = vld [vmem:[#allocation4 + $0x338] sm:$0xff] }
 0x598   : > { %11878 = vst [vmem:[#allocation14_spill] sm:$0xff] %v11428_v54  ;;  %v8146_v15 = vpop.f32.mrf.mxu0  ;;  %v8257_v31 = vadd.f32 %v8256_v59, %v8255_v2  ;;  %v5925_v2 = vld [vmem:[#allocation4 + $0x318] sm:$0xff] }
 0x599   : > { %v8258_v37 = vpop.f32.mrf.mxu1 }
 0x59a   : > { %v11430_v4 = vadd.f32 %v8257_v31, %v8145_v0  ;;  %v8147_v22 = vpop.f32.mrf.mxu0 }
 0x59b   : > { %v8148_v25 = vadd.f32 %v8147_v22, %v8146_v15  ;;  %v8259_v32 = vpop.f32.mrf.mxu1 }
 0x59c   : > { %11879 = vst [vmem:[#allocation15_spill] sm:$0xff] %v11430_v4  ;;  %v8149_v11 = vpop.f32.mrf.mxu0  ;;  %v8260_v26 = vadd.f32 %v8259_v32, %v8258_v37  ;;  %v8025_v37 = vcombine.high %v5925_v2, %v5929_v6 }
 0x59d   : > { %v8261_v47 = vpop.f32.mrf.mxu1 }
 0x59e   : > { %7182 = vmatmul.mubr.bf16.gmra.mxu1 %v8000_v1  ;;  %v11432_v19 = vadd.f32 %v8260_v26, %v8148_v25  ;;  %v8150_v62 = vpop.f32.mrf.mxu0 }
 0x59f   : > { %7189 = vmatprep.mubr.bf16.mxu1 %v8009_v58  ;;  %v8151_v46 = vadd.f32 %v8150_v62, %v8149_v11  ;;  %v8262_v57 = vpop.f32.mrf.mxu1 }
 0x5a0   : > { %11880 = vst [vmem:[#allocation16_spill] sm:$0xff] %v11432_v19  ;;  %v8152_v52 = vpop.f32.mrf.mxu0  ;;  %v8263_v42 = vadd.f32 %v8262_v57, %v8261_v47  ;;  %v5937_v57 = vld [vmem:[#allocation4 + $0x378] sm:$0xff] }
 0x5a1   : > { %v8264_v49 = vpop.f32.mrf.mxu1 }
 0x5a2   : > { %v11434_v27 = vadd.f32 %v8263_v42, %v8151_v46  ;;  %v8153_v53 = vpop.f32.mrf.mxu0  ;;  %v5933_v46 = vld [vmem:[#allocation4 + $0x358] sm:$0xff]  ;;  %v8024_v42 = vcombine.low %v5925_v2, %v5929_v6 }
 0x5a3   : > { %v8154_v21 = vadd.f32 %v8153_v53, %v8152_v52  ;;  %v8265_v8 = vpop.f32.mrf.mxu1  ;;  %v8033_v53 = vcombine.high %v5933_v46, %v5937_v57 }
 0x5a4   : > { %11881 = vst [vmem:[#allocation17_spill] sm:$0xff] %v11434_v27  ;;  %v8155_v55 = vpop.f32.mrf.mxu0  ;;  %v8266_v60 = vadd.f32 %v8265_v8, %v8264_v49 }
 0x5a5   : > { %v8267_v3 = vpop.f32.mrf.mxu1 }
 0x5a6   : > { %7190 = vmatmul.mubr.bf16.gmra.mxu1 %v8008_v7  ;;  %v11436_v20 = vadd.f32 %v8266_v60, %v8154_v21  ;;  %v8156_v10 = vpop.f32.mrf.mxu0 }
 0x5a7   : > { %7197 = vmatprep.mubr.bf16.mxu1 %v8017_v41  ;;  %v8157_v51 = vadd.f32 %v8156_v10, %v8155_v55  ;;  %v8268_v61 = vpop.f32.mrf.mxu1  ;;  %v5941_v10 = vld [vmem:[#allocation4 + $0x398] sm:$0xff] }
 0x5a8   : > { %11882 = vst [vmem:[#allocation18_spill] sm:$0xff] %v11436_v20  ;;  %v8158_v0 = vpop.f32.mrf.mxu0  ;;  %v8269_v59 = vadd.f32 %v8268_v61, %v8267_v3 }
 0x5a9   : > { %v8270_v33 = vpop.f32.mrf.mxu1 }
 0x5aa   : > { %v11438_v15 = vadd.f32 %v8269_v59, %v8157_v51  ;;  %v8159_v31 = vpop.f32.mrf.mxu0  ;;  %v5945_v51 = vld [vmem:[#allocation4 + $0x3b8] sm:$0xff] }
 0x5ab   : > { %v8160_v1 = vadd.f32 %v8159_v31, %v8158_v0  ;;  %v8271_v22 = vpop.f32.mrf.mxu1  ;;  %v8032_v0 = vcombine.low %v5933_v46, %v5937_v57  ;;  %v5953_v31 = vld [vmem:[#allocation4 + $0x3f8] sm:$0xff] }
 0x5ac   : > { %11883 = vst [vmem:[#allocation19_spill] sm:$0xff] %v11438_v15  ;;  %v8161_v58 = vpop.f32.mrf.mxu0  ;;  %v8272_v25 = vadd.f32 %v8271_v22, %v8270_v33  ;;  %v8041_v33 = vcombine.high %v5941_v10, %v5945_v51 }
 0x5ad   : > { %v8273_v32 = vpop.f32.mrf.mxu1 }
 0x5ae   : > { %7198 = vmatmul.mubr.bf16.gmra.mxu1 %v8016_v44  ;;  %v11440_v11 = vadd.f32 %v8272_v25, %v8160_v1  ;;  %v8162_v26 = vpop.f32.mrf.mxu0  ;;  %v5949_v44 = vld [vmem:[#allocation4 + $0x3d8] sm:$0xff]  ;;  %v8040_v1 = vcombine.low %v5941_v10, %v5945_v51 }
 0x5af   : > { %7205 = vmatprep.mubr.bf16.mxu1 %v8025_v37  ;;  %v8163_v47 = vadd.f32 %v8162_v26, %v8161_v58  ;;  %v8274_v62 = vpop.f32.mrf.mxu1  ;;  %v8049_v58 = vcombine.high %v5949_v44, %v5953_v31 }
 0x5b0   : > { %11884 = vst [vmem:[#allocation20_spill] sm:$0xff] %v11440_v11  ;;  %v8164_v52 = vpop.f32.mrf.mxu0  ;;  %v8275_v14 = vadd.f32 %v8274_v62, %v8273_v32 }
 0x5b1   : > { %v8276_v5 = vpop.f32.mrf.mxu1 }
 0x5b2   : > { %v11442_v49 = vadd.f32 %v8275_v14, %v8163_v47  ;;  %v8165_v7 = vpop.f32.mrf.mxu0  ;;  %v8048_v47 = vcombine.low %v5949_v44, %v5953_v31 }
 0x5b3   : > { %v8166_v41 = vadd.f32 %v8165_v7, %v8164_v52  ;;  %v8277_v21 = vpop.f32.mrf.mxu1 }
 0x5b4   : > { %11885 = vst [vmem:[#allocation21_spill] sm:$0xff] %v11442_v49  ;;  %v8278_v8 = vadd.f32 %v8277_v21, %v8276_v5  ;;  %v8295_v55 = vpop.f32.mrf.mxu0 }
 0x5b6   : > { %7206 = vmatmul.mubr.bf16.gmra.mxu1 %v8024_v42  ;;  %v11444_v60 = vadd.f32 %v8278_v8, %v8166_v41  ;;  %v8296_v3 = vpop.f32.mrf.mxu0 }
 0x5b7   : > { %7213 = vmatprep.mubr.bf16.mxu1 %v8033_v53  ;;  %v8297_v49 = vadd.f32 %v8296_v3, %v8295_v55 }
 0x5b8   : > { %11886 = vst [vmem:[#allocation22_spill] sm:$0xff] %v11444_v60  ;;  %v8298_v61 = vpop.f32.mrf.mxu0 }
 0x5b9   : > { %v6951_v27 = vadd.f32 %v8297_v49, %v11343_v30 }
 0x5ba   : > { %v8299_v59 = vpop.f32.mrf.mxu0 }
 0x5bb   : > { %v8300_v4 = vadd.f32 %v8299_v59, %v8298_v61 }
 0x5bc   : > { %v8301_v2 = vpop.f32.mrf.mxu0 }
 0x5bd   : > { %v6954_v30 = vadd.f32 %v8300_v4, %v11348_v48 }
 0x5be   : > { %7214 = vmatmul.mubr.bf16.gmra.mxu1 %v8032_v0  ;;  %v8302_v6 = vpop.f32.mrf.mxu0 }
 0x5bf   : > { %7221 = vmatprep.mubr.bf16.mxu1 %v8041_v33 }
 0x5c0   : > { %v8304_v37 = vpop.f32.mrf.mxu0 }
 0x5c2   : > { %v8305_v22 = vpop.f32.mrf.mxu0 }
 0x5c4   : > { %v8307_v25 = vpop.f32.mrf.mxu0 }
 0x5c6   : > { %7222 = vmatmul.mubr.bf16.gmra.mxu1 %v8040_v1  ;;  %v8308_v32 = vpop.f32.mrf.mxu0 }
 0x5c7   : > { %7229 = vmatprep.mubr.bf16.mxu1 %v8049_v58  ;;  %v8309_v4 = vadd.f32 %v8308_v32, %v8307_v25 }
 0x5c8   : > { %v11446_v26 = vpop.f32.mrf.mxu0 }
 0x5ca   : > { %v11448_v62 = vpop.f32.mrf.mxu0 }
 0x5cc   : > { %v11450_v46 = vpop.f32.mrf.mxu0 }
 0x5ce   : > { %7230 = vmatmul.mubr.bf16.gmra.mxu1 %v8048_v47  ;;  %v11452_v57 = vpop.f32.mrf.mxu0 }
 0x5cf   : > { %v8315_v32 = vadd.f32 %v11452_v57, %v11450_v46 }
 0x5d0   : > { %v11454_v52 = vpop.f32.mrf.mxu0 }
 0x5d2   : > { %v11456_v14 = vpop.f32.mrf.mxu0 }
 0x5d4   : > { %v11458_v5 = vpop.f32.mrf.mxu0 }
 0x5d6   : > { %v11460_v42 = vpop.f32.mrf.mxu0 }
 0x5d8   : > { %v11462_v7 = vpop.f32.mrf.mxu0 }
 0x5da   : > { %v11464_v53 = vpop.f32.mrf.mxu0 }
 0x5dc   : > { %v11466_v41 = vpop.f32.mrf.mxu0 }
 0x5de   : > { %v11468_v21 = vpop.f32.mrf.mxu0 }
 0x5e0   : > { %v11470_v8 = vpop.f32.mrf.mxu0 }
 0x5e2   : > { %v11472_v10 = vpop.f32.mrf.mxu0 }
 0x5e4   : > { %v11474_v51 = vpop.f32.mrf.mxu0 }
 0x5e6   : > { %v11476_v0 = vpop.f32.mrf.mxu0 }
 0x5e8   : > { %v11478_v33 = vpop.f32.mrf.mxu0 }
 0x5ea   : > { %v11480_v44 = vpop.f32.mrf.mxu0 }
 0x5ec   : > { %v11482_v31 = vpop.f32.mrf.mxu0 }
 0x5ee   : > { %v11484_v1 = vpop.f32.mrf.mxu0 }
 0x5f0   : > { %v11486_v58 = vpop.f32.mrf.mxu0 }
 0x5f2   : > { %v11488_v47 = vpop.f32.mrf.mxu0 }
 0x5f4   : > { %v11490_v60 = vpop.f32.mrf.mxu0 }
 0x5f6   : > { %v11492_v15 = vpop.f32.mrf.mxu0 }
 0x5f8   : > { %v11501_v43 = vpop.f32.mrf.mxu0 }
 0x5fa   : > { %v11506_v61 = vpop.f32.mrf.mxu0 }
 0x5fc   : > { %v11511_v39 = vpop.f32.mrf.mxu0 }
 0x616   : > { %v8407_v11 = vpop.f32.mrf.mxu1 }
 0x618   : > { %v8408_v20 = vpop.f32.mrf.mxu1 }
 0x619   : > { %v8409_v19 = vadd.f32 %v8408_v20, %v8407_v11  ;;  %v8303_v11 = vadd.f32 %v8302_v6, %v8301_v2  ;;  %v11516_v6 = vpop.f32.mrf.mxu0 }
 0x61a   : > { %v8410_v54 = vpop.f32.mrf.mxu1 }
 0x61b   : > { %v7112_v55 = vadd.f32 %v8409_v19, %v6951_v27  ;;  %v6959_v56 = vadd.f32 %v8303_v11, %v11356_v36  ;;  %v8306_v19 = vadd.f32 %v8305_v22, %v8304_v37  ;;  %v6967_v36 = vadd.f32 %v8309_v4, %v11372_v45  ;;  %v11523_v37 = vpop.f32.mrf.mxu0 }
 0x61c   : > { %v8411_v3 = vpop.f32.mrf.mxu1 }
 0x61d   : > { %7239 = vst.msk [vmem:[%s11499_s12] sm:$0xff] %vm7238_vm0, %v7112_v55  ;;  %v8412_v20 = vadd.f32 %v8411_v3, %v8410_v54  ;;  %v6962_v48 = vadd.f32 %v8306_v19, %v11364_v9  ;;  %v11530_v45 = vpop.f32.mrf.mxu0 }
 0x61e   : > { %v8413_v49 = vpop.f32.mrf.mxu1 }
 0x61f   : > { %v7115_v59 = vadd.f32 %v8412_v20, %v6954_v30 }
 0x620   : > { %v8414_v24 = vpop.f32.mrf.mxu1 }
 0x621   : > { %7240 = vst.msk [vmem:[%s11499_s12 + $0x8] sm:$0xff] %vm7238_vm0, %v7115_v59  ;;  %v8415_v12 = vadd.f32 %v8414_v24, %v8413_v49  ;;  %v8318_v59 = vadd.f32 %v11456_v14, %v11454_v52 }
 0x622   : > { %v8416_v27 = vpop.f32.mrf.mxu1 }
 0x623   : > { %v7120_v55 = vadd.f32 %v8415_v12, %v6959_v56  ;;  %v8312_v12 = vadd.f32 %v11448_v62, %v11446_v26  ;;  %v6975_v26 = vadd.f32 %v8315_v32, %v11388_v16  ;;  %v6978_v46 = vadd.f32 %v8318_v59, %v11393_v63 }
 0x624   : > { %v8417_v50 = vpop.f32.mrf.mxu1  ;;  %v8336_v59 = vadd.f32 %v11480_v44, %v11478_v33 }
 0x625   : > { %7241 = vst.msk [vmem:[%s11499_s12 + $0x10] sm:$0xff] %vm7238_vm0, %v7120_v55  ;;  %v8418_v54 = vadd.f32 %v8417_v50, %v8416_v27  ;;  %v6970_v22 = vadd.f32 %v8312_v12, %v11380_v40  ;;  %v11537_v40 = vpop.f32.mrf.mxu0  ;;  %v8327_v12 = vadd.f32 %v11468_v21, %v11466_v41 }
 0x626   : > { %v8419_v2 = vpop.f32.mrf.mxu1 }
 0x627   : > { %v7123_v3 = vadd.f32 %v8418_v54, %v6962_v48  ;;  %v8321_v48 = vadd.f32 %v11460_v42, %v11458_v5  ;;  %v11544_v16 = vpop.f32.mrf.mxu0 }
 0x628   : > { %v8420_v30 = vpop.f32.mrf.mxu1 }
 0x629   : > { %7242 = vst.msk [vmem:[%s11499_s12 + $0x18] sm:$0xff] %vm7238_vm0, %v7123_v3  ;;  %v8421_v24 = vadd.f32 %v8420_v30, %v8419_v2  ;;  %v6983_v52 = vadd.f32 %v8321_v48, %v11398_v17  ;;  %v8324_v3 = vadd.f32 %v11464_v53, %v11462_v7  ;;  %v11551_v63 = vpop.f32.mrf.mxu0  ;;  %v6991_v7 = vadd.f32 %v8327_v12, %v11402_v23 }
 0x62a   : > { %v8422_v56 = vpop.f32.mrf.mxu1 }
 0x62b   : > { %v7128_v9 = vadd.f32 %v8421_v24, %v6967_v36  ;;  %v6986_v5 = vadd.f32 %v8324_v3, %v11400_v38  ;;  %v11558_v17 = vpop.f32.mrf.mxu0  ;;  %v8345_v3 = vadd.f32 %v11492_v15, %v11490_v60  ;;  %v11887_v15 = vld [vmem:[#allocation8_spill] sm:$0xff] }
 0x62c   : > { %v8423_v50 = vpop.f32.mrf.mxu1 }
 0x62d   : > { %7243 = vst.msk [vmem:[%s11499_s12 + $0x20] sm:$0xff] %vm7238_vm0, %v7128_v9  ;;  %v8424_v25 = vadd.f32 %v8423_v50, %v8422_v56  ;;  %v11565_v38 = vpop.f32.mrf.mxu0 }
 0x62e   : > { %v8425_v20 = vpop.f32.mrf.mxu1 }
 0x62f   : > { %v7131_v11 = vadd.f32 %v8424_v25, %v6970_v22  ;;  %v8330_v22 = vadd.f32 %v11472_v10, %v11470_v8  ;;  %v11572_v23 = vpop.f32.mrf.mxu0 }
 0x630   : > { %v8426_v49 = vpop.f32.mrf.mxu1 }
 0x631   : > { %7244 = vst.msk [vmem:[%s11499_s12 + $0x28] sm:$0xff] %vm7238_vm0, %v7131_v11  ;;  %v8427_v62 = vadd.f32 %v8426_v49, %v8425_v20  ;;  %v6994_v41 = vadd.f32 %v8330_v22, %v11404_v29  ;;  %v8333_v11 = vadd.f32 %v11476_v0, %v11474_v51  ;;  %v11579_v29 = vpop.f32.mrf.mxu0  ;;  %v7002_v51 = vadd.f32 %v8336_v59, %v11408_v13 }
 0x632   : > { %v8428_v19 = vpop.f32.mrf.mxu1 }
 0x633   : > { %v7136_v27 = vadd.f32 %v8427_v62, %v6975_v26  ;;  %v6999_v8 = vadd.f32 %v8333_v11, %v11406_v18  ;;  %v11586_v18 = vpop.f32.mrf.mxu0 }
 0x634   : > { %v8429_v55 = vpop.f32.mrf.mxu1 }
 0x635   : > { %7245 = vst.msk [vmem:[%s11499_s12 + $0x30] sm:$0xff] %vm7238_vm0, %v7136_v27  ;;  %v8430_v57 = vadd.f32 %v8429_v55, %v8428_v19  ;;  %v11593_v13 = vpop.f32.mrf.mxu0 }
 0x636   : > { %v8431_v54 = vpop.f32.mrf.mxu1 }
 0x637   : > { %v7139_v4 = vadd.f32 %v8430_v57, %v6978_v46  ;;  %v8339_v46 = vadd.f32 %v11484_v1, %v11482_v31 }
 0x638   : > { %v8432_v2 = vpop.f32.mrf.mxu1 }
 0x639   : > { %7246 = vst.msk [vmem:[%s11499_s12 + $0x38] sm:$0xff] %vm7238_vm0, %v7139_v4  ;;  %v8433_v14 = vadd.f32 %v8432_v2, %v8431_v54  ;;  %v7007_v33 = vadd.f32 %v8339_v46, %v11410_v28  ;;  %v8342_v4 = vadd.f32 %v11488_v47, %v11486_v58  ;;  %v8368_v28 = vpop.f32.mrf.mxu0  ;;  %v7015_v58 = vadd.f32 %v8345_v3, %v11414_v35 }
 0x63a   : > { %v8434_v30 = vpop.f32.mrf.mxu1 }
 0x63b   : > { %v7144_v36 = vadd.f32 %v8433_v14, %v6983_v52  ;;  %v7010_v31 = vadd.f32 %v8342_v4, %v11412_v34  ;;  %v8370_v12 = vpop.f32.mrf.mxu0 }
 0x63c   : > { %v8435_v24 = vpop.f32.mrf.mxu1 }
 0x63d   : > { %7247 = vst.msk [vmem:[%s11499_s12 + $0x40] sm:$0xff] %vm7238_vm0, %v7144_v36  ;;  %v8436_v42 = vadd.f32 %v8435_v24, %v8434_v30 }
 0x63e   : > { %v8437_v56 = vpop.f32.mrf.mxu1 }
 0x63f   : > { %v7147_v9 = vadd.f32 %v8436_v42, %v6986_v5  ;;  %v8348_v5 = vadd.f32 %v11506_v61, %v11501_v43  ;;  %v11888_v43 = vld [vmem:[#allocation9_spill] sm:$0xff] }
 0x640   : > { %v8438_v50 = vpop.f32.mrf.mxu1 }
 0x641   : > { %7248 = vst.msk [vmem:[%s11499_s12 + $0x48] sm:$0xff] %vm7238_vm0, %v7147_v9  ;;  %v8439_v53 = vadd.f32 %v8438_v50, %v8437_v56  ;;  %v7018_v60 = vadd.f32 %v8348_v5, %v11887_v15  ;;  %v8351_v50 = vadd.f32 %v11516_v6, %v11511_v39  ;;  %v11889_v39 = vld [vmem:[#allocation10_spill] sm:$0xff] }
 0x642   : > { %v8440_v25 = vpop.f32.mrf.mxu1 }
 0x643   : > { %v7152_v32 = vadd.f32 %v8439_v53, %v6991_v7  ;;  %v8371_v53 = vpop.f32.mrf.mxu0  ;;  %v7023_v61 = vadd.f32 %v8351_v50, %v11888_v43  ;;  %v11895_v50 = vld [vmem:[#allocation16_spill] sm:$0xff] }
 0x644   : > { %v8441_v20 = vpop.f32.mrf.mxu1 }
 0x645   : > { %7249 = vst.msk [vmem:[%s11499_s12 + $0x50] sm:$0xff] %vm7238_vm0, %v7152_v32  ;;  %v8442_v21 = vadd.f32 %v8441_v20, %v8440_v25  ;;  %v8354_v32 = vadd.f32 %v11530_v45, %v11523_v37  ;;  %v11890_v37 = vld [vmem:[#allocation11_spill] sm:$0xff] }
 0x646   : > { %v8443_v49 = vpop.f32.mrf.mxu1 }
 0x647   : > { %v7155_v26 = vadd.f32 %v8442_v21, %v6994_v41  ;;  %v8373_v41 = vpop.f32.mrf.mxu0  ;;  %v7026_v6 = vadd.f32 %v8354_v32, %v11889_v39 }
 0x648   : > { %v8444_v62 = vpop.f32.mrf.mxu1 }
 0x649   : > { %7250 = vst.msk [vmem:[%s11499_s12 + $0x58] sm:$0xff] %vm7238_vm0, %v7155_v26  ;;  %v8445_v10 = vadd.f32 %v8444_v62, %v8443_v49  ;;  %v8357_v26 = vadd.f32 %v11544_v16, %v11537_v40  ;;  %v11891_v40 = vld [vmem:[#allocation12_spill] sm:$0xff] }
 0x64a   : > { %v8446_v19 = vpop.f32.mrf.mxu1 }
 0x64b   : > { %v7160_v27 = vadd.f32 %v8445_v10, %v6999_v8  ;;  %v8374_v8 = vpop.f32.mrf.mxu0  ;;  %v7031_v45 = vadd.f32 %v8357_v26, %v11890_v37  ;;  %v11898_v37 = vld [vmem:[#allocation19_spill] sm:$0xff] }
 0x64c   : > { %v8447_v55 = vpop.f32.mrf.mxu1 }
 0x64d   : > { %7251 = vst.msk [vmem:[%s11499_s12 + $0x60] sm:$0xff] %vm7238_vm0, %v7160_v27  ;;  %v8448_v0 = vadd.f32 %v8447_v55, %v8446_v19  ;;  %v8360_v27 = vadd.f32 %v11558_v17, %v11551_v63  ;;  %v11892_v63 = vld [vmem:[#allocation13_spill] sm:$0xff] }
 0x64e   : > { %v8449_v57 = vpop.f32.mrf.mxu1 }
 0x64f   : > { %v7163_v48 = vadd.f32 %v8448_v0, %v7002_v51  ;;  %v8376_v51 = vpop.f32.mrf.mxu0  ;;  %v7034_v16 = vadd.f32 %v8360_v27, %v11891_v40  ;;  %v11899_v40 = vld [vmem:[#allocation20_spill] sm:$0xff] }
 0x650   : > { %v8450_v54 = vpop.f32.mrf.mxu1 }
 0x651   : > { %7252 = vst.msk [vmem:[%s11499_s12 + $0x68] sm:$0xff] %vm7238_vm0, %v7163_v48  ;;  %v8451_v44 = vadd.f32 %v8450_v54, %v8449_v57  ;;  %v8363_v48 = vadd.f32 %v11572_v23, %v11565_v38  ;;  %v11893_v38 = vld [vmem:[#allocation14_spill] sm:$0xff] }
 0x652   : > { %v8452_v2 = vpop.f32.mrf.mxu1 }
 0x653   : > { %v7168_v52 = vadd.f32 %v8451_v44, %v7007_v33  ;;  %v8377_v33 = vpop.f32.mrf.mxu0  ;;  %v7039_v17 = vadd.f32 %v8363_v48, %v11892_v63  ;;  %v11900_v63 = vld [vmem:[#allocation21_spill] sm:$0xff] }
 0x654   : > { %v8453_v14 = vpop.f32.mrf.mxu1  ;;  %v8378_v32 = vadd.f32 %v8377_v33, %v8376_v51 }
 0x655   : > { %7253 = vst.msk [vmem:[%s11499_s12 + $0x70] sm:$0xff] %vm7238_vm0, %v7168_v52  ;;  %v8454_v1 = vadd.f32 %v8453_v14, %v8452_v2  ;;  %v8366_v52 = vadd.f32 %v11586_v18, %v11579_v29 }
 0x656   : > { %v8455_v30 = vpop.f32.mrf.mxu1 }
 0x657   : > { %v7171_v36 = vadd.f32 %v8454_v1, %v7010_v31  ;;  %v8379_v31 = vpop.f32.mrf.mxu0  ;;  %v7042_v23 = vadd.f32 %v8366_v52, %v11893_v38 }
 0x658   : > { %v8456_v24 = vpop.f32.mrf.mxu1 }
 0x659   : > { %7254 = vst.msk [vmem:[%s11499_s12 + $0x78] sm:$0xff] %vm7238_vm0, %v7171_v36  ;;  %v8457_v47 = vadd.f32 %v8456_v24, %v8455_v30  ;;  %v8369_v36 = vadd.f32 %v8368_v28, %v11593_v13 }
 0x65a   : > { %v8458_v42 = vpop.f32.mrf.mxu1 }
 0x65b   : > { %v7176_v34 = vadd.f32 %v8457_v47, %v7015_v58  ;;  %v8380_v58 = vpop.f32.mrf.mxu0 }
 0x65c   : > { %v8459_v56 = vpop.f32.mrf.mxu1  ;;  %v8381_v26 = vadd.f32 %v8380_v58, %v8379_v31 }
 0x65d   : > { %7255 = vst.msk [vmem:[%s11499_s12 + $0x80] sm:$0xff] %vm7238_vm0, %v7176_v34  ;;  %v8460_v9 = vadd.f32 %v8459_v56, %v8458_v42  ;;  %v11894_v42 = vld [vmem:[#allocation15_spill] sm:$0xff]  ;;  %v8372_v34 = vadd.f32 %v8371_v53, %v8370_v12  ;;  %v8382_v15 = vpop.f32.mrf.mxu0 }
 0x65e   : > { %v8461_v7 = vpop.f32.mrf.mxu1  ;;  %v7047_v29 = vadd.f32 %v8369_v36, %v11894_v42 }
 0x65f   : > { %v7179_v35 = vadd.f32 %v8460_v9, %v7018_v60  ;;  %v7050_v13 = vadd.f32 %v8372_v34, %v11895_v50 }
 0x660   : > { %v8462_v22 = vpop.f32.mrf.mxu1 }
 0x661   : > { %7256 = vst.msk [vmem:[%s11499_s12 + $0x88] sm:$0xff] %vm7238_vm0, %v7179_v35  ;;  %v8463_v25 = vadd.f32 %v8462_v22, %v8461_v7  ;;  %v8375_v7 = vadd.f32 %v8374_v8, %v8373_v41  ;;  %v8383_v22 = vpop.f32.mrf.mxu0 }
 0x662   : > { %v8464_v20 = vpop.f32.mrf.mxu1  ;;  %v8384_v27 = vadd.f32 %v8383_v22, %v8382_v15 }
 0x663   : > { %v7184_v21 = vadd.f32 %v8463_v25, %v7023_v61  ;;  %v11896_v25 = vld [vmem:[#allocation17_spill] sm:$0xff] }
 0x664   : > { %v8465_v11 = vpop.f32.mrf.mxu1  ;;  %v7055_v12 = vadd.f32 %v8375_v7, %v11896_v25 }
 0x665   : > { %7257 = vst.msk [vmem:[%s11499_s12 + $0x90] sm:$0xff] %vm7238_vm0, %v7184_v21  ;;  %v8466_v49 = vadd.f32 %v8465_v11, %v8464_v20  ;;  %v8385_v21 = vpop.f32.mrf.mxu0 }
 0x666   : > { %v8467_v62 = vpop.f32.mrf.mxu1 }
 0x667   : > { %v7187_v10 = vadd.f32 %v8466_v49, %v7026_v6  ;;  %v11897_v6 = vld [vmem:[#allocation18_spill] sm:$0xff]  ;;  %v8386_v8 = vpop.f32.mrf.mxu0 }
 0x668   : > { %v8468_v59 = vpop.f32.mrf.mxu1  ;;  %v7058_v41 = vadd.f32 %v8378_v32, %v11897_v6  ;;  %v8387_v48 = vadd.f32 %v8386_v8, %v8385_v21 }
 0x669   : > { %7258 = vst.msk [vmem:[%s11499_s12 + $0x98] sm:$0xff] %vm7238_vm0, %v7187_v10  ;;  %v8469_v19 = vadd.f32 %v8468_v59, %v8467_v62  ;;  %v8388_v51 = vpop.f32.mrf.mxu0 }
 0x66a   : > { %v8470_v55 = vpop.f32.mrf.mxu1 }
 0x66b   : > { %v7192_v0 = vadd.f32 %v8469_v19, %v7031_v45  ;;  %v7063_v45 = vadd.f32 %v8381_v26, %v11898_v37  ;;  %v8389_v33 = vpop.f32.mrf.mxu0 }
 0x66c   : > { %v8471_v46 = vpop.f32.mrf.mxu1  ;;  %v8390_v52 = vadd.f32 %v8389_v33, %v8388_v51 }
 0x66d   : > { %7259 = vst.msk [vmem:[%s11499_s12 + $0xa0] sm:$0xff] %vm7238_vm0, %v7192_v0  ;;  %v8472_v57 = vadd.f32 %v8471_v46, %v8470_v55 }
 0x66e   : > { %v8473_v54 = vpop.f32.mrf.mxu1 }
 0x66f   : > { %v7195_v44 = vadd.f32 %v8472_v57, %v7034_v16  ;;  %v7066_v16 = vadd.f32 %v8384_v27, %v11899_v40 }
 0x670   : > { %v8474_v4 = vpop.f32.mrf.mxu1 }
 0x671   : > { %7260 = vst.msk [vmem:[%s11499_s12 + $0xa8] sm:$0xff] %vm7238_vm0, %v7195_v44  ;;  %v8475_v2 = vadd.f32 %v8474_v4, %v8473_v54 }
 0x672   : > { %v8476_v14 = vpop.f32.mrf.mxu1 }
 0x673   : > { %v7200_v1 = vadd.f32 %v8475_v2, %v7039_v17  ;;  %v7071_v17 = vadd.f32 %v8387_v48, %v11900_v63 }
 0x674   : > { %v8477_v3 = vpop.f32.mrf.mxu1 }
 0x675   : > { %7261 = vst.msk [vmem:[%s11499_s12 + $0xb0] sm:$0xff] %vm7238_vm0, %v7200_v1  ;;  %v8478_v30 = vadd.f32 %v8477_v3, %v8476_v14  ;;  %v11901_v3 = vld [vmem:[#allocation22_spill] sm:$0xff] }
 0x676   : > { %v8479_v24 = vpop.f32.mrf.mxu1  ;;  %v7074_v38 = vadd.f32 %v8390_v52, %v11901_v3 }
 0x677   : > { %v7203_v47 = vadd.f32 %v8478_v30, %v7042_v23 }
 0x678   : > { %v8480_v5 = vpop.f32.mrf.mxu1 }
 0x679   : > { %7262 = vst.msk [vmem:[%s11499_s12 + $0xb8] sm:$0xff] %vm7238_vm0, %v7203_v47  ;;  %v8481_v18 = vadd.f32 %v8480_v5, %v8479_v24 }
 0x67a   : > { %v8482_v56 = vpop.f32.mrf.mxu1 }
 0x67b   : > { %v7208_v60 = vadd.f32 %v8481_v18, %v7047_v29 }
 0x67c   : > { %v8483_v9 = vpop.f32.mrf.mxu1 }
 0x67d   : > { %7263 = vst.msk [vmem:[%s11499_s12 + $0xc0] sm:$0xff] %vm7238_vm0, %v7208_v60  ;;  %v8484_v28 = vadd.f32 %v8483_v9, %v8482_v56 }
 0x67e   : > { %v8485_v35 = vpop.f32.mrf.mxu1 }
 0x67f   : > { %v7211_v43 = vadd.f32 %v8484_v28, %v7050_v13 }
 0x680   : > { %v8486_v61 = vpop.f32.mrf.mxu1 }
 0x681   : > { %7264 = vst.msk [vmem:[%s11499_s12 + $0xc8] sm:$0xff] %vm7238_vm0, %v7211_v43  ;;  %v8487_v53 = vadd.f32 %v8486_v61, %v8485_v35 }
 0x682   : > { %v8488_v20 = vpop.f32.mrf.mxu1 }
 0x683   : > { %v7216_v11 = vadd.f32 %v8487_v53, %v7055_v12 }
 0x684   : > { %v8489_v39 = vpop.f32.mrf.mxu1 }
 0x685   : > { %7265 = vst.msk [vmem:[%s11499_s12 + $0xd0] sm:$0xff] %vm7238_vm0, %v7216_v11  ;;  %v8490_v49 = vadd.f32 %v8489_v39, %v8488_v20 }
 0x686   : > { %v8491_v62 = vpop.f32.mrf.mxu1 }
 0x687   : > { %v7219_v10 = vadd.f32 %v8490_v49, %v7058_v41 }
 0x688   : > { %v8492_v59 = vpop.f32.mrf.mxu1 }
 0x689   : > { %7266 = vst.msk [vmem:[%s11499_s12 + $0xd8] sm:$0xff] %vm7238_vm0, %v7219_v10  ;;  %v8493_v19 = vadd.f32 %v8492_v59, %v8491_v62 }
 0x68a   : > { %v8494_v55 = vpop.f32.mrf.mxu1 }
 0x68b   : > { %v7224_v0 = vadd.f32 %v8493_v19, %v7063_v45 }
 0x68c   : > { %v8495_v46 = vpop.f32.mrf.mxu1 }
 0x68d   : > { %7267 = vst.msk [vmem:[%s11499_s12 + $0xe0] sm:$0xff] %vm7238_vm0, %v7224_v0  ;;  %v8496_v57 = vadd.f32 %v8495_v46, %v8494_v55 }
 0x68e   : > { %v8497_v54 = vpop.f32.mrf.mxu1 }
 0x68f   : > { %v7227_v44 = vadd.f32 %v8496_v57, %v7066_v16 }
 0x690   : > { %v8498_v4 = vpop.f32.mrf.mxu1 }
 0x691   : > { %7268 = vst.msk [vmem:[%s11499_s12 + $0xe8] sm:$0xff] %vm7238_vm0, %v7227_v44  ;;  %v8499_v2 = vadd.f32 %v8498_v4, %v8497_v54 }
 0x692   : > { %v8500_v14 = vpop.f32.mrf.mxu1 }
 0x693   : > { %v7232_v31 = vadd.f32 %v8499_v2, %v7071_v17 }
 0x694   : > { %v8501_v1 = vpop.f32.mrf.mxu1 }
 0x695   : > { %7269 = vst.msk [vmem:[%s11499_s12 + $0xf0] sm:$0xff] %vm7238_vm0, %v7232_v31  ;;  %v8502_v23 = vadd.f32 %v8501_v1, %v8500_v14 }
 0x697   : > { %v7235_v30 = vadd.f32 %v8502_v23, %v7074_v38 }
 0x699   : > { %7270 = vst.msk [vmem:[%s11499_s12 + $0xf8] sm:$0xff] %vm7238_vm0, %v7235_v30 }
 0x69a PF: > { %s17_s20 = sadd.s32 1, %s9403_s20   ;;  %s11902_s18 = smov %s9399_s19 }
 0x69b   : > { %p14_p3 = scmp.ge.s32.totalorder %s17_s20, 4   ;;  %s11903_s19 = smov %s11905_s22 }
 0x69d   :  { %16 = sbr.rel (!%p14_p3) target bundleno = 3 (0x3), region = 82 }
 0x6a2   :  { %7298 = vsyncpa [#allocation3], 1 }
 0x6a3   :  { %7300 = vsyncpa [#allocation3 + $0x1], 1 }
 0x6a4   :  { %7301 = vsyncpa [#allocation5], 1 }

</bundles_post_ra>
